<compile_context>
chip_gen: v6e
topology: v6e:2x2x1
jax: 0.10.0
libtpu: 0.0.40
codegen_flags: <defaults>
</compile_context>

<pallas_src>
import numpy as np
import jax
import jax.numpy as jnp
from jax.experimental import pallas as pl
from jax.experimental.pallas import tpu as pltpu

EPS = 1e-5
LANE = 128


def _round_up(x, m):
    return (x + m - 1) // m * m


def _make_kernel(*, H, W, TH, Cpi, Cpm, Cpo, has_proj):
    """H, W: true spatial dims.  TH: output-row tile.  Cp*: lane-padded channels."""

    def kernel(x_ref, w1_ref, s1_ref, b1_ref, w2_ref, s2_ref, b2_ref, *rest):
        if has_proj:
            wr_ref, sr_ref, br_ref, out_ref, hpad_ref = rest
        else:
            out_ref, hpad_ref = rest

        t = pl.program_id(1)
        r0 = pl.multiple_of(t * TH, TH)          # first true output row of this tile

        # ---- conv1: 3x3, padding=1, computed for rows [r0-1, r0+TH] (TH+2 rows) ----
        # x_ref holds the whole padded image for this batch element:
        #   true row i -> padded row i+2, true col c -> padded col c+1 (zero borders).
        acc1 = None
        for kh in range(3):
            rows = x_ref[pl.ds(r0 + kh, TH + 2), :, :]           # (TH+2, W+2, Cpi) bf16
            for kw in range(3):
                patch = rows[:, kw:kw + W, :].reshape((TH + 2) * W, Cpi)
                d = jnp.dot(patch, w1_ref[kh * 3 + kw],
                            preferred_element_type=jnp.float32)
                acc1 = d if acc1 is None else acc1 + d

        # BN1 (folded) + ReLU in f32.
        h = jnp.maximum(acc1 * s1_ref[...] + b1_ref[...], 0.0)
        # Dropout2d(0.1) is identity in eval mode.
        # TODO(synk): training-mode channel dropout (pltpu.prng_*) not implemented.

        h = h.reshape(TH + 2, W, Cpm)
        # Rows outside the true image must be exactly zero: they implement conv2's
        # zero-padding at the top/bottom image boundary (and mask garbage rows when
        # H was padded up to a multiple of TH).
        gr = (r0 - 1) + jax.lax.broadcasted_iota(jnp.int32, (TH + 2, 1, 1), 0)
        h = jnp.where((gr >= 0) & (gr < H), h, 0.0)

        # Stage h (bf16) in a per-tile scratch; zero ONLY the 1-column border.
        zcol = jnp.zeros((TH + 2, 1, Cpm), jnp.bfloat16)
        hpad_ref[:, 0:1, :] = zcol
        hpad_ref[:, W + 1:W + 2, :] = zcol
        hpad_ref[:, 1:W + 1, :] = h.astype(jnp.bfloat16)

        # ---- conv2: 3x3, padding=1, output rows [r0, r0+TH) ----
        acc2 = None
        for kh in range(3):
            for kw in range(3):
                patch = hpad_ref[kh:kh + TH, kw:kw + W, :].reshape(TH * W, Cpm)
                d = jnp.dot(patch, w2_ref[kh * 3 + kw],
                            preferred_element_type=jnp.float32)
                acc2 = d if acc2 is None else acc2 + d
        y = acc2 * s2_ref[...] + b2_ref[...]

        # ---- residual path ----
        xr = x_ref[pl.ds(r0 + 2, TH), :, :]                      # true rows r0..r0+TH-1
        xin = xr[:, 1:W + 1, :].reshape(TH * W, Cpi)
        if has_proj:
            r = jnp.dot(xin, wr_ref[...], preferred_element_type=jnp.float32)
            r = r * sr_ref[...] + br_ref[...]
        else:
            r = xin.astype(jnp.float32)                          # identity (Cpi == Cpo)

        out = jnp.maximum(y + r, 0.0)
        out_ref[...] = out.reshape(TH, W, Cpo).astype(out_ref.dtype)

    return kernel


def residual_double_conv(x_nchw, p, *, tile_h=8):
    """x_nchw: (N, Cin, H, W) float32.  p: parameter dict (torch-layout weights)."""
    N, Cin, H, W = x_nchw.shape
    Cmid = p["w1"].shape[0]
    Cout = p["w2"].shape[0]
    has_proj = (Cin != Cout)

    Cpi = _round_up(Cin, LANE)
    Cpm = _round_up(Cmid, LANE)
    Cpo = _round_up(Cout, LANE)
    if not has_proj:
        assert Cpi == Cpo

    TH = min(tile_h, H)
    n_t = pl.cdiv(H, TH)
    Hp = n_t * TH                                  # H padded to a multiple of TH

    # NCHW -> NHWC, bf16, pad: 2 halo rows top / (2 + tile pad) bottom, 1 col each side,
    # channels to a lane multiple.  (Single fused XLA transpose+pad+convert.)
    x = jnp.transpose(x_nchw, (0, 2, 3, 1)).astype(jnp.bfloat16)
    xpad = jnp.pad(x, ((0, 0), (2, 2 + Hp - H), (1, 1), (0, Cpi - Cin)))

    def prep_w3x3(w, ci, cpi, co, cpo):            # OIHW -> (9, Cpi, Cpo) bf16
        wk = jnp.transpose(w, (2, 3, 1, 0)).reshape(9, ci, co)
        wk = jnp.pad(wk, ((0, 0), (0, cpi - ci), (0, cpo - co)))
        return wk.astype(jnp.bfloat16)

    def fold_bn(g, b, m, v, cp):
        s = g / jnp.sqrt(v + EPS)
        bb = b - m * s
        s = jnp.pad(s, (0, cp - s.shape[0]))[None, :].astype(jnp.float32)
        bb = jnp.pad(bb, (0, cp - bb.shape[0]))[None, :].astype(jnp.float32)
        return s, bb

    w1k = prep_w3x3(p["w1"], Cin, Cpi, Cmid, Cpm)
    w2k = prep_w3x3(p["w2"], Cmid, Cpm, Cout, Cpo)
    s1, b1 = fold_bn(p["g1"], p["b1"], p["m1"], p["v1"], Cpm)
    s2, b2 = fold_bn(p["g2"], p["b2"], p["m2"], p["v2"], Cpo)

    inputs = [xpad, w1k, s1, b1, w2k, s2, b2]
    in_specs = [
        pl.BlockSpec((None, Hp + 4, W + 2, Cpi), lambda n, t: (n, 0, 0, 0)),
        pl.BlockSpec((9, Cpi, Cpm), lambda n, t: (0, 0, 0)),
        pl.BlockSpec((1, Cpm), lambda n, t: (0, 0)),
        pl.BlockSpec((1, Cpm), lambda n, t: (0, 0)),
        pl.BlockSpec((9, Cpm, Cpo), lambda n, t: (0, 0, 0)),
        pl.BlockSpec((1, Cpo), lambda n, t: (0, 0)),
        pl.BlockSpec((1, Cpo), lambda n, t: (0, 0)),
    ]
    if has_proj:
        wrk = jnp.pad(jnp.transpose(p["wres"][:, :, 0, 0], (1, 0)),
                      ((0, Cpi - Cin), (0, Cpo - Cout))).astype(jnp.bfloat16)
        sr, br = fold_bn(p["gr"], p["br"], p["mr"], p["vr"], Cpo)
        inputs += [wrk, sr, br]
        in_specs += [
            pl.BlockSpec((Cpi, Cpo), lambda n, t: (0, 0)),
            pl.BlockSpec((1, Cpo), lambda n, t: (0, 0)),
            pl.BlockSpec((1, Cpo), lambda n, t: (0, 0)),
        ]

    kernel = _make_kernel(H=H, W=W, TH=TH, Cpi=Cpi, Cpm=Cpm, Cpo=Cpo, has_proj=has_proj)

    flops = N * Hp * W * 2 * 9 * (Cpi * Cpm + Cpm * Cpo)
    if has_proj:
        flops += N * Hp * W * 2 * Cpi * Cpo
    bytes_accessed = (sum(int(np.prod(a.shape)) * a.dtype.itemsize for a in inputs)
                      + N * Hp * W * Cpo * 4)

    vmem_need = (2 * (Hp + 4) * (W + 2) * Cpi * 2            # per-n input block (x2 buf)
                 + 2 * TH * W * Cpo * 4                      # output tile (x2 buf)
                 + 9 * Cpi * Cpm * 2 + 9 * Cpm * Cpo * 2     # weights
                 + (TH + 2) * (W + 2) * Cpm * 2              # h scratch
                 + (Cpi * Cpo * 2 if has_proj else 0))
    vmem_limit = int(min(max(2 * vmem_need + (8 << 20), 32 << 20), 64 << 20))

    out = pl.pallas_call(
        kernel,
        out_shape=jax.ShapeDtypeStruct((N, Hp, W, Cpo), jnp.float32),
        grid=(N, n_t),
        in_specs=in_specs,
        out_specs=pl.BlockSpec((None, TH, W, Cpo), lambda n, t: (n, t, 0, 0)),
        scratch_shapes=[pltpu.VMEM((TH + 2, W + 2, Cpm), jnp.bfloat16)],
        compiler_params=pltpu.CompilerParams(
            dimension_semantics=("parallel", "parallel"),
            vmem_limit_bytes=vmem_limit),
        cost_estimate=pl.CostEstimate(flops=int(flops), transcendentals=0,
                                      bytes_accessed=int(bytes_accessed)),
    )(*inputs)

    out = out[:, :H, :, :Cout]                     # drop channel / row padding
    return jnp.transpose(out, (0, 3, 1, 2)).astype(x_nchw.dtype)   # back to NCHW


# ---------------- pure-JAX reference (for correctness check) ----------------
def _ref_forward(x, p):
    def conv(x, w, pad):
        return jax.lax.conv_general_dilated(
            x, w, (1, 1), [(pad, pad), (pad, pad)],
            dimension_numbers=("NCHW", "OIHW", "NCHW"))

    def bn(x, g, b, m, v):
        g, b, m, v = (t[None, :, None, None] for t in (g, b, m, v))
        return g * (x - m) / jnp.sqrt(v + EPS) + b

    h = jnp.maximum(bn(conv(x, p["w1"], 1), p["g1"], p["b1"], p["m1"], p["v1"]), 0.0)
    y = bn(conv(h, p["w2"], 1), p["g2"], p["b2"], p["m2"], p["v2"])
    if p["w1"].shape[1] != p["w2"].shape[0]:
        r = bn(conv(x, p["wres"], 0), p["gr"], p["br"], p["mr"], p["vr"])
    else:
        r = x
    return jnp.maximum(y + r, 0.0)


def _make_params(key, inc, outc, mid=None):
    mid = outc if mid is None else mid
    ks = jax.random.split(key, 12)
    p = {
        "w1": 0.1 * jax.random.normal(ks[0], (mid, inc, 3, 3), jnp.float32),
        "g1": 1.0 + 0.1 * jax.random.normal(ks[1], (mid,), jnp.float32),
        "b1": 0.1 * jax.random.normal(ks[2], (mid,), jnp.float32),
        "m1": 0.1 * jax.random.normal(ks[3], (mid,), jnp.float32),
        "v1": 0.5 + jnp.abs(jax.random.normal(ks[4], (mid,), jnp.float32)),
        "w2": 0.1 * jax.random.normal(ks[5], (outc, mid, 3, 3), jnp.float32),
        "g2": 1.0 + 0.1 * jax.random.normal(ks[6], (outc,), jnp.float32),
        "b2": 0.1 * jax.random.normal(ks[7], (outc,), jnp.float32),
        "m2": 0.1 * jax.random.normal(ks[8], (outc,), jnp.float32),
        "v2": 0.5 + jnp.abs(jax.random.normal(ks[9], (outc,), jnp.float32)),
    }
    if inc != outc:
        kr = jax.random.split(ks[10], 5)
        p.update({
            "wres": 0.1 * jax.random.normal(kr[0], (outc, inc, 1, 1), jnp.float32),
            "gr": 1.0 + 0.1 * jax.random.normal(kr[1], (outc,), jnp.float32),
            "br": 0.1 * jax.random.normal(kr[2], (outc,), jnp.float32),
            "mr": 0.1 * jax.random.normal(kr[3], (outc,), jnp.float32),
            "vr": 0.5 + jnp.abs(jax.random.normal(kr[4], (outc,), jnp.float32)),
        })
    return p


if __name__ == "__main__":
    key = jax.random.PRNGKey(0)
    kx, kp, kp2 = jax.random.split(key, 3)

    # case 1: inc != outc  (1x1-conv + BN projection residual)
    N, Cin, Cout, H, W = 2, 4, 8, 16, 16
    x = jax.random.normal(kx, (N, Cin, H, W), jnp.float32)
    params = _make_params(kp, Cin, Cout)
    out = jax.block_until_ready(residual_double_conv(x, params, tile_h=8))
    ref = jax.block_until_ready(_ref_forward(x, params))
    assert out.shape == (N, Cout, H, W)
    err = np.max(np.abs(np.asarray(out) - np.asarray(ref)))
    assert np.allclose(np.asarray(out), np.asarray(ref), atol=3e-2, rtol=3e-2), \
        f"max abs diff {err}"

    # case 2: inc == outc  (identity residual; no projection matmul inside the kernel)
    x2 = jax.random.normal(kx, (N, Cout, H, W), jnp.float32)
    params2 = _make_params(kp2, Cout, Cout)
    out2 = jax.block_until_ready(residual_double_conv(x2, params2, tile_h=8))
    ref2 = jax.block_until_ready(_ref_forward(x2, params2))
    err2 = np.max(np.abs(np.asarray(out2) - np.asarray(ref2)))
    assert np.allclose(np.asarray(out2), np.asarray(ref2), atol=3e-2, rtol=3e-2), \
        f"max abs diff {err2}"

    print("KERNEL_OK")
</pallas_src>

<mosaic_0001>
module attributes {stable_mosaic.version = 11 : i64} {
  func.func @kernel(%arg0: i32, %arg1: i32, %arg2: memref<1x20x18x128xbf16, #tpu.memory_space<vmem>>, %arg3: memref<9x128x128xbf16, #tpu.memory_space<vmem>>, %arg4: memref<1x128xf32, #tpu.memory_space<vmem>>, %arg5: memref<1x128xf32, #tpu.memory_space<vmem>>, %arg6: memref<9x128x128xbf16, #tpu.memory_space<vmem>>, %arg7: memref<1x128xf32, #tpu.memory_space<vmem>>, %arg8: memref<1x128xf32, #tpu.memory_space<vmem>>, %arg9: memref<128x128xbf16, #tpu.memory_space<vmem>>, %arg10: memref<1x128xf32, #tpu.memory_space<vmem>>, %arg11: memref<1x128xf32, #tpu.memory_space<vmem>>, %arg12: memref<1x8x16x128xf32, #tpu.memory_space<vmem>>, %arg13: memref<10x18x128xbf16, #tpu.memory_space<vmem>>) attributes {dimension_semantics = [#tpu.dimension_semantics<parallel>, #tpu.dimension_semantics<parallel>], iteration_bounds = array<i64: 2, 2>, scalar_prefetch = 0 : i64, scratch_operands = 1 : i64, tpu.core_type = #tpu.core_type<tc>, window_params = [{transform_indices = @transform_0, window_bounds = array<i64: 1, 20, 18, 128>}, {pipeline_mode = #tpu.pipeline_mode<synchronous>, transform_indices = @transform_1, window_bounds = array<i64: 9, 128, 128>}, {pipeline_mode = #tpu.pipeline_mode<synchronous>, transform_indices = @transform_2, window_bounds = array<i64: 1, 128>}, {pipeline_mode = #tpu.pipeline_mode<synchronous>, transform_indices = @transform_3, window_bounds = array<i64: 1, 128>}, {pipeline_mode = #tpu.pipeline_mode<synchronous>, transform_indices = @transform_4, window_bounds = array<i64: 9, 128, 128>}, {pipeline_mode = #tpu.pipeline_mode<synchronous>, transform_indices = @transform_5, window_bounds = array<i64: 1, 128>}, {pipeline_mode = #tpu.pipeline_mode<synchronous>, transform_indices = @transform_6, window_bounds = array<i64: 1, 128>}, {pipeline_mode = #tpu.pipeline_mode<synchronous>, transform_indices = @transform_7, window_bounds = array<i64: 128, 128>}, {pipeline_mode = #tpu.pipeline_mode<synchronous>, transform_indices = @transform_8, window_bounds = array<i64: 1, 128>}, {pipeline_mode = #tpu.pipeline_mode<synchronous>, transform_indices = @transform_9, window_bounds = array<i64: 1, 128>}, {transform_indices = @transform_10, window_bounds = array<i64: 1, 8, 16, 128>}]} {
    %c8_i32 = arith.constant 8 : i32
    %0 = arith.muli %arg1, %c8_i32 : i32
    %1 = tpu.assume_multiple %0, 8 : i32
    %c0_i32 = arith.constant 0 : i32
    %2 = arith.addi %1, %c0_i32 : i32
    %c0 = arith.constant 0 : index
    %3 = arith.index_cast %2 : i32 to index
    %c0_0 = arith.constant 0 : index
    %c0_1 = arith.constant 0 : index
    %4 = vector.load %arg2[%c0, %3, %c0_0, %c0_1] : memref<1x20x18x128xbf16, #tpu.memory_space<vmem>>, vector<1x10x18x128xbf16>
    %5 = vector.shape_cast %4 : vector<1x10x18x128xbf16> to vector<10x18x128xbf16>
    %6 = vector.extract_strided_slice %5 {offsets = [0, 0, 0], sizes = [10, 16, 128], strides = [1, 1, 1]} : vector<10x18x128xbf16> to vector<10x16x128xbf16>
    %7 = vector.shape_cast %6 : vector<10x16x128xbf16> to vector<160x128xbf16>
    %c0_2 = arith.constant 0 : index
    %c0_3 = arith.constant 0 : index
    %c0_4 = arith.constant 0 : index
    %8 = vector.load %arg3[%c0_2, %c0_3, %c0_4] : memref<9x128x128xbf16, #tpu.memory_space<vmem>>, vector<1x128x128xbf16>
    %9 = vector.shape_cast %8 : vector<1x128x128xbf16> to vector<128x128xbf16>
    %cst = arith.constant dense<0.000000e+00> : vector<160x128xf32>
    %10 = tpu.matmul %7, %9, %cst {dimension_numbers = #tpu.dot_dimension_numbers<[1], [0], [0], [1], [0, 0, 1, 1], [], []>} : vector<160x128xbf16>, vector<128x128xbf16>, vector<160x128xf32> -> vector<160x128xf32>
    %11 = vector.extract_strided_slice %5 {offsets = [0, 1, 0], sizes = [10, 16, 128], strides = [1, 1, 1]} : vector<10x18x128xbf16> to vector<10x16x128xbf16>
    %12 = vector.shape_cast %11 : vector<10x16x128xbf16> to vector<160x128xbf16>
    %c1 = arith.constant 1 : index
    %c0_5 = arith.constant 0 : index
    %c0_6 = arith.constant 0 : index
    %13 = vector.load %arg3[%c1, %c0_5, %c0_6] : memref<9x128x128xbf16, #tpu.memory_space<vmem>>, vector<1x128x128xbf16>
    %14 = vector.shape_cast %13 : vector<1x128x128xbf16> to vector<128x128xbf16>
    %cst_7 = arith.constant dense<0.000000e+00> : vector<160x128xf32>
    %15 = tpu.matmul %12, %14, %cst_7 {dimension_numbers = #tpu.dot_dimension_numbers<[1], [0], [0], [1], [0, 0, 1, 1], [], []>} : vector<160x128xbf16>, vector<128x128xbf16>, vector<160x128xf32> -> vector<160x128xf32>
    %16 = arith.addf %10, %15 : vector<160x128xf32>
    %17 = vector.extract_strided_slice %5 {offsets = [0, 2, 0], sizes = [10, 16, 128], strides = [1, 1, 1]} : vector<10x18x128xbf16> to vector<10x16x128xbf16>
    %18 = vector.shape_cast %17 : vector<10x16x128xbf16> to vector<160x128xbf16>
    %c2 = arith.constant 2 : index
    %c0_8 = arith.constant 0 : index
    %c0_9 = arith.constant 0 : index
    %19 = vector.load %arg3[%c2, %c0_8, %c0_9] : memref<9x128x128xbf16, #tpu.memory_space<vmem>>, vector<1x128x128xbf16>
    %20 = vector.shape_cast %19 : vector<1x128x128xbf16> to vector<128x128xbf16>
    %cst_10 = arith.constant dense<0.000000e+00> : vector<160x128xf32>
    %21 = tpu.matmul %18, %20, %cst_10 {dimension_numbers = #tpu.dot_dimension_numbers<[1], [0], [0], [1], [0, 0, 1, 1], [], []>} : vector<160x128xbf16>, vector<128x128xbf16>, vector<160x128xf32> -> vector<160x128xf32>
    %22 = arith.addf %16, %21 : vector<160x128xf32>
    %c1_i32 = arith.constant 1 : i32
    %23 = arith.addi %1, %c1_i32 : i32
    %c0_11 = arith.constant 0 : index
    %24 = arith.index_cast %23 : i32 to index
    %c0_12 = arith.constant 0 : index
    %c0_13 = arith.constant 0 : index
    %25 = vector.load %arg2[%c0_11, %24, %c0_12, %c0_13] : memref<1x20x18x128xbf16, #tpu.memory_space<vmem>>, vector<1x10x18x128xbf16>
    %26 = vector.shape_cast %25 : vector<1x10x18x128xbf16> to vector<10x18x128xbf16>
    %27 = vector.extract_strided_slice %26 {offsets = [0, 0, 0], sizes = [10, 16, 128], strides = [1, 1, 1]} : vector<10x18x128xbf16> to vector<10x16x128xbf16>
    %28 = vector.shape_cast %27 : vector<10x16x128xbf16> to vector<160x128xbf16>
    %c3 = arith.constant 3 : index
    %c0_14 = arith.constant 0 : index
    %c0_15 = arith.constant 0 : index
    %29 = vector.load %arg3[%c3, %c0_14, %c0_15] : memref<9x128x128xbf16, #tpu.memory_space<vmem>>, vector<1x128x128xbf16>
    %30 = vector.shape_cast %29 : vector<1x128x128xbf16> to vector<128x128xbf16>
    %cst_16 = arith.constant dense<0.000000e+00> : vector<160x128xf32>
    %31 = tpu.matmul %28, %30, %cst_16 {dimension_numbers = #tpu.dot_dimension_numbers<[1], [0], [0], [1], [0, 0, 1, 1], [], []>} : vector<160x128xbf16>, vector<128x128xbf16>, vector<160x128xf32> -> vector<160x128xf32>
    %32 = arith.addf %22, %31 : vector<160x128xf32>
    %33 = vector.extract_strided_slice %26 {offsets = [0, 1, 0], sizes = [10, 16, 128], strides = [1, 1, 1]} : vector<10x18x128xbf16> to vector<10x16x128xbf16>
    %34 = vector.shape_cast %33 : vector<10x16x128xbf16> to vector<160x128xbf16>
    %c4 = arith.constant 4 : index
    %c0_17 = arith.constant 0 : index
    %c0_18 = arith.constant 0 : index
    %35 = vector.load %arg3[%c4, %c0_17, %c0_18] : memref<9x128x128xbf16, #tpu.memory_space<vmem>>, vector<1x128x128xbf16>
    %36 = vector.shape_cast %35 : vector<1x128x128xbf16> to vector<128x128xbf16>
    %cst_19 = arith.constant dense<0.000000e+00> : vector<160x128xf32>
    %37 = tpu.matmul %34, %36, %cst_19 {dimension_numbers = #tpu.dot_dimension_numbers<[1], [0], [0], [1], [0, 0, 1, 1], [], []>} : vector<160x128xbf16>, vector<128x128xbf16>, vector<160x128xf32> -> vector<160x128xf32>
    %38 = arith.addf %32, %37 : vector<160x128xf32>
    %39 = vector.extract_strided_slice %26 {offsets = [0, 2, 0], sizes = [10, 16, 128], strides = [1, 1, 1]} : vector<10x18x128xbf16> to vector<10x16x128xbf16>
    %40 = vector.shape_cast %39 : vector<10x16x128xbf16> to vector<160x128xbf16>
    %c5 = arith.constant 5 : index
    %c0_20 = arith.constant 0 : index
    %c0_21 = arith.constant 0 : index
    %41 = vector.load %arg3[%c5, %c0_20, %c0_21] : memref<9x128x128xbf16, #tpu.memory_space<vmem>>, vector<1x128x128xbf16>
    %42 = vector.shape_cast %41 : vector<1x128x128xbf16> to vector<128x128xbf16>
    %cst_22 = arith.constant dense<0.000000e+00> : vector<160x128xf32>
    %43 = tpu.matmul %40, %42, %cst_22 {dimension_numbers = #tpu.dot_dimension_numbers<[1], [0], [0], [1], [0, 0, 1, 1], [], []>} : vector<160x128xbf16>, vector<128x128xbf16>, vector<160x128xf32> -> vector<160x128xf32>
    %44 = arith.addf %38, %43 : vector<160x128xf32>
    %c2_i32 = arith.constant 2 : i32
    %45 = arith.addi %1, %c2_i32 : i32
    %c0_23 = arith.constant 0 : index
    %46 = arith.index_cast %45 : i32 to index
    %c0_24 = arith.constant 0 : index
    %c0_25 = arith.constant 0 : index
    %47 = vector.load %arg2[%c0_23, %46, %c0_24, %c0_25] : memref<1x20x18x128xbf16, #tpu.memory_space<vmem>>, vector<1x10x18x128xbf16>
    %48 = vector.shape_cast %47 : vector<1x10x18x128xbf16> to vector<10x18x128xbf16>
    %49 = vector.extract_strided_slice %48 {offsets = [0, 0, 0], sizes = [10, 16, 128], strides = [1, 1, 1]} : vector<10x18x128xbf16> to vector<10x16x128xbf16>
    %50 = vector.shape_cast %49 : vector<10x16x128xbf16> to vector<160x128xbf16>
    %c6 = arith.constant 6 : index
    %c0_26 = arith.constant 0 : index
    %c0_27 = arith.constant 0 : index
    %51 = vector.load %arg3[%c6, %c0_26, %c0_27] : memref<9x128x128xbf16, #tpu.memory_space<vmem>>, vector<1x128x128xbf16>
    %52 = vector.shape_cast %51 : vector<1x128x128xbf16> to vector<128x128xbf16>
    %cst_28 = arith.constant dense<0.000000e+00> : vector<160x128xf32>
    %53 = tpu.matmul %50, %52, %cst_28 {dimension_numbers = #tpu.dot_dimension_numbers<[1], [0], [0], [1], [0, 0, 1, 1], [], []>} : vector<160x128xbf16>, vector<128x128xbf16>, vector<160x128xf32> -> vector<160x128xf32>
    %54 = arith.addf %44, %53 : vector<160x128xf32>
    %55 = vector.extract_strided_slice %48 {offsets = [0, 1, 0], sizes = [10, 16, 128], strides = [1, 1, 1]} : vector<10x18x128xbf16> to vector<10x16x128xbf16>
    %56 = vector.shape_cast %55 : vector<10x16x128xbf16> to vector<160x128xbf16>
    %c7 = arith.constant 7 : index
    %c0_29 = arith.constant 0 : index
    %c0_30 = arith.constant 0 : index
    %57 = vector.load %arg3[%c7, %c0_29, %c0_30] : memref<9x128x128xbf16, #tpu.memory_space<vmem>>, vector<1x128x128xbf16>
    %58 = vector.shape_cast %57 : vector<1x128x128xbf16> to vector<128x128xbf16>
    %cst_31 = arith.constant dense<0.000000e+00> : vector<160x128xf32>
    %59 = tpu.matmul %56, %58, %cst_31 {dimension_numbers = #tpu.dot_dimension_numbers<[1], [0], [0], [1], [0, 0, 1, 1], [], []>} : vector<160x128xbf16>, vector<128x128xbf16>, vector<160x128xf32> -> vector<160x128xf32>
    %60 = arith.addf %54, %59 : vector<160x128xf32>
    %61 = vector.extract_strided_slice %48 {offsets = [0, 2, 0], sizes = [10, 16, 128], strides = [1, 1, 1]} : vector<10x18x128xbf16> to vector<10x16x128xbf16>
    %62 = vector.shape_cast %61 : vector<10x16x128xbf16> to vector<160x128xbf16>
    %c8 = arith.constant 8 : index
    %c0_32 = arith.constant 0 : index
    %c0_33 = arith.constant 0 : index
    %63 = vector.load %arg3[%c8, %c0_32, %c0_33] : memref<9x128x128xbf16, #tpu.memory_space<vmem>>, vector<1x128x128xbf16>
    %64 = vector.shape_cast %63 : vector<1x128x128xbf16> to vector<128x128xbf16>
    %cst_34 = arith.constant dense<0.000000e+00> : vector<160x128xf32>
    %65 = tpu.matmul %62, %64, %cst_34 {dimension_numbers = #tpu.dot_dimension_numbers<[1], [0], [0], [1], [0, 0, 1, 1], [], []>} : vector<160x128xbf16>, vector<128x128xbf16>, vector<160x128xf32> -> vector<160x128xf32>
    %66 = arith.addf %60, %65 : vector<160x128xf32>
    %c0_35 = arith.constant 0 : index
    %c0_36 = arith.constant 0 : index
    %67 = vector.load %arg4[%c0_35, %c0_36] : memref<1x128xf32, #tpu.memory_space<vmem>>, vector<1x128xf32>
    %68 = vector.broadcast %67 : vector<1x128xf32> to vector<160x128xf32>
    %69 = arith.mulf %66, %68 : vector<160x128xf32>
    %c0_37 = arith.constant 0 : index
    %c0_38 = arith.constant 0 : index
    %70 = vector.load %arg5[%c0_37, %c0_38] : memref<1x128xf32, #tpu.memory_space<vmem>>, vector<1x128xf32>
    %71 = vector.broadcast %70 : vector<1x128xf32> to vector<160x128xf32>
    %72 = arith.addf %69, %71 : vector<160x128xf32>
    %cst_39 = arith.constant 0.000000e+00 : f32
    %73 = vector.broadcast %cst_39 : f32 to vector<160x128xf32>
    %74 = arith.maximumf %72, %73 : vector<160x128xf32>
    %75 = vector.shape_cast %74 : vector<160x128xf32> to vector<10x16x128xf32>
    %c1_i32_40 = arith.constant 1 : i32
    %76 = arith.subi %1, %c1_i32_40 : i32
    %77 = tpu.iota {dimensions = array<i32: 0>} : vector<10x1x1xi32>
    %78 = vector.broadcast %76 : i32 to vector<10x1x1xi32>
    %79 = arith.addi %78, %77 : vector<10x1x1xi32>
    %c0_i32_41 = arith.constant 0 : i32
    %80 = vector.broadcast %c0_i32_41 : i32 to vector<10x1x1xi32>
    %81 = arith.cmpi sge, %79, %80 : vector<10x1x1xi32>
    %c16_i32 = arith.constant 16 : i32
    %82 = vector.broadcast %c16_i32 : i32 to vector<10x1x1xi32>
    %83 = arith.cmpi slt, %79, %82 : vector<10x1x1xi32>
    %84 = arith.andi %81, %83 : vector<10x1x1xi1>
    %cst_42 = arith.constant 0.000000e+00 : f32
    %85 = vector.shape_cast %84 : vector<10x1x1xi1> to vector<10x1x1xi1>
    %86 = vector.broadcast %85 : vector<10x1x1xi1> to vector<10x16x128xi1>
    %87 = vector.broadcast %cst_42 : f32 to vector<10x16x128xf32>
    %88 = arith.select %86, %75, %87 : vector<10x16x128xi1>, vector<10x16x128xf32>
    %cst_43 = arith.constant 0.000000e+00 : bf16
    %89 = vector.broadcast %cst_43 : bf16 to vector<10x1x128xbf16>
    %c0_44 = arith.constant 0 : index
    %c0_45 = arith.constant 0 : index
    %c0_46 = arith.constant 0 : index
    %90 = vector.load %arg13[%c0_44, %c0_45, %c0_46] : memref<10x18x128xbf16, #tpu.memory_space<vmem>>, vector<10x1x128xbf16>
    tpu.vector_store %arg13[%c0_44, %c0_45, %c0_46], %89 {strides = array<i32>} : memref<10x18x128xbf16, #tpu.memory_space<vmem>>, vector<10x1x128xbf16>,
    %c0_47 = arith.constant 0 : index
    %c17 = arith.constant 17 : index
    %c0_48 = arith.constant 0 : index
    %91 = vector.load %arg13[%c0_47, %c17, %c0_48] : memref<10x18x128xbf16, #tpu.memory_space<vmem>>, vector<10x1x128xbf16>
    tpu.vector_store %arg13[%c0_47, %c17, %c0_48], %89 {strides = array<i32>} : memref<10x18x128xbf16, #tpu.memory_space<vmem>>, vector<10x1x128xbf16>,
    %92 = arith.truncf %88 : vector<10x16x128xf32> to vector<10x16x128xbf16>
    %c0_49 = arith.constant 0 : index
    %c1_50 = arith.constant 1 : index
    %c0_51 = arith.constant 0 : index
    %93 = vector.load %arg13[%c0_49, %c1_50, %c0_51] : memref<10x18x128xbf16, #tpu.memory_space<vmem>>, vector<10x16x128xbf16>
    tpu.vector_store %arg13[%c0_49, %c1_50, %c0_51], %92 {strides = array<i32>} : memref<10x18x128xbf16, #tpu.memory_space<vmem>>, vector<10x16x128xbf16>,
    %c0_52 = arith.constant 0 : index
    %c0_53 = arith.constant 0 : index
    %c0_54 = arith.constant 0 : index
    %94 = vector.load %arg13[%c0_52, %c0_53, %c0_54] : memref<10x18x128xbf16, #tpu.memory_space<vmem>>, vector<8x16x128xbf16>
    %95 = vector.shape_cast %94 : vector<8x16x128xbf16> to vector<128x128xbf16>
    %c0_55 = arith.constant 0 : index
    %c0_56 = arith.constant 0 : index
    %c0_57 = arith.constant 0 : index
    %96 = vector.load %arg6[%c0_55, %c0_56, %c0_57] : memref<9x128x128xbf16, #tpu.memory_space<vmem>>, vector<1x128x128xbf16>
    %97 = vector.shape_cast %96 : vector<1x128x128xbf16> to vector<128x128xbf16>
    %cst_58 = arith.constant dense<0.000000e+00> : vector<128x128xf32>
    %98 = tpu.matmul %95, %97, %cst_58 {dimension_numbers = #tpu.dot_dimension_numbers<[1], [0], [0], [1], [0, 0, 1, 1], [], []>} : vector<128x128xbf16>, vector<128x128xbf16>, vector<128x128xf32> -> vector<128x128xf32>
    %c0_59 = arith.constant 0 : index
    %c1_60 = arith.constant 1 : index
    %c0_61 = arith.constant 0 : index
    %99 = vector.load %arg13[%c0_59, %c1_60, %c0_61] : memref<10x18x128xbf16, #tpu.memory_space<vmem>>, vector<8x16x128xbf16>
    %100 = vector.shape_cast %99 : vector<8x16x128xbf16> to vector<128x128xbf16>
    %c1_62 = arith.constant 1 : index
    %c0_63 = arith.constant 0 : index
    %c0_64 = arith.constant 0 : index
    %101 = vector.load %arg6[%c1_62, %c0_63, %c0_64] : memref<9x128x128xbf16, #tpu.memory_space<vmem>>, vector<1x128x128xbf16>
    %102 = vector.shape_cast %101 : vector<1x128x128xbf16> to vector<128x128xbf16>
    %cst_65 = arith.constant dense<0.000000e+00> : vector<128x128xf32>
    %103 = tpu.matmul %100, %102, %cst_65 {dimension_numbers = #tpu.dot_dimension_numbers<[1], [0], [0], [1], [0, 0, 1, 1], [], []>} : vector<128x128xbf16>, vector<128x128xbf16>, vector<128x128xf32> -> vector<128x128xf32>
    %104 = arith.addf %98, %103 : vector<128x128xf32>
    %c0_66 = arith.constant 0 : index
    %c2_67 = arith.constant 2 : index
    %c0_68 = arith.constant 0 : index
    %105 = vector.load %arg13[%c0_66, %c2_67, %c0_68] : memref<10x18x128xbf16, #tpu.memory_space<vmem>>, vector<8x16x128xbf16>
    %106 = vector.shape_cast %105 : vector<8x16x128xbf16> to vector<128x128xbf16>
    %c2_69 = arith.constant 2 : index
    %c0_70 = arith.constant 0 : index
    %c0_71 = arith.constant 0 : index
    %107 = vector.load %arg6[%c2_69, %c0_70, %c0_71] : memref<9x128x128xbf16, #tpu.memory_space<vmem>>, vector<1x128x128xbf16>
    %108 = vector.shape_cast %107 : vector<1x128x128xbf16> to vector<128x128xbf16>
    %cst_72 = arith.constant dense<0.000000e+00> : vector<128x128xf32>
    %109 = tpu.matmul %106, %108, %cst_72 {dimension_numbers = #tpu.dot_dimension_numbers<[1], [0], [0], [1], [0, 0, 1, 1], [], []>} : vector<128x128xbf16>, vector<128x128xbf16>, vector<128x128xf32> -> vector<128x128xf32>
    %110 = arith.addf %104, %109 : vector<128x128xf32>
    %c1_73 = arith.constant 1 : index
    %c0_74 = arith.constant 0 : index
    %c0_75 = arith.constant 0 : index
    %111 = vector.load %arg13[%c1_73, %c0_74, %c0_75] : memref<10x18x128xbf16, #tpu.memory_space<vmem>>, vector<8x16x128xbf16>
    %112 = vector.shape_cast %111 : vector<8x16x128xbf16> to vector<128x128xbf16>
    %c3_76 = arith.constant 3 : index
    %c0_77 = arith.constant 0 : index
    %c0_78 = arith.constant 0 : index
    %113 = vector.load %arg6[%c3_76, %c0_77, %c0_78] : memref<9x128x128xbf16, #tpu.memory_space<vmem>>, vector<1x128x128xbf16>
    %114 = vector.shape_cast %113 : vector<1x128x128xbf16> to vector<128x128xbf16>
    %cst_79 = arith.constant dense<0.000000e+00> : vector<128x128xf32>
    %115 = tpu.matmul %112, %114, %cst_79 {dimension_numbers = #tpu.dot_dimension_numbers<[1], [0], [0], [1], [0, 0, 1, 1], [], []>} : vector<128x128xbf16>, vector<128x128xbf16>, vector<128x128xf32> -> vector<128x128xf32>
    %116 = arith.addf %110, %115 : vector<128x128xf32>
    %c1_80 = arith.constant 1 : index
    %c1_81 = arith.constant 1 : index
    %c0_82 = arith.constant 0 : index
    %117 = vector.load %arg13[%c1_80, %c1_81, %c0_82] : memref<10x18x128xbf16, #tpu.memory_space<vmem>>, vector<8x16x128xbf16>
    %118 = vector.shape_cast %117 : vector<8x16x128xbf16> to vector<128x128xbf16>
    %c4_83 = arith.constant 4 : index
    %c0_84 = arith.constant 0 : index
    %c0_85 = arith.constant 0 : index
    %119 = vector.load %arg6[%c4_83, %c0_84, %c0_85] : memref<9x128x128xbf16, #tpu.memory_space<vmem>>, vector<1x128x128xbf16>
    %120 = vector.shape_cast %119 : vector<1x128x128xbf16> to vector<128x128xbf16>
    %cst_86 = arith.constant dense<0.000000e+00> : vector<128x128xf32>
    %121 = tpu.matmul %118, %120, %cst_86 {dimension_numbers = #tpu.dot_dimension_numbers<[1], [0], [0], [1], [0, 0, 1, 1], [], []>} : vector<128x128xbf16>, vector<128x128xbf16>, vector<128x128xf32> -> vector<128x128xf32>
    %122 = arith.addf %116, %121 : vector<128x128xf32>
    %c1_87 = arith.constant 1 : index
    %c2_88 = arith.constant 2 : index
    %c0_89 = arith.constant 0 : index
    %123 = vector.load %arg13[%c1_87, %c2_88, %c0_89] : memref<10x18x128xbf16, #tpu.memory_space<vmem>>, vector<8x16x128xbf16>
    %124 = vector.shape_cast %123 : vector<8x16x128xbf16> to vector<128x128xbf16>
    %c5_90 = arith.constant 5 : index
    %c0_91 = arith.constant 0 : index
    %c0_92 = arith.constant 0 : index
    %125 = vector.load %arg6[%c5_90, %c0_91, %c0_92] : memref<9x128x128xbf16, #tpu.memory_space<vmem>>, vector<1x128x128xbf16>
    %126 = vector.shape_cast %125 : vector<1x128x128xbf16> to vector<128x128xbf16>
    %cst_93 = arith.constant dense<0.000000e+00> : vector<128x128xf32>
    %127 = tpu.matmul %124, %126, %cst_93 {dimension_numbers = #tpu.dot_dimension_numbers<[1], [0], [0], [1], [0, 0, 1, 1], [], []>} : vector<128x128xbf16>, vector<128x128xbf16>, vector<128x128xf32> -> vector<128x128xf32>
    %128 = arith.addf %122, %127 : vector<128x128xf32>
    %c2_94 = arith.constant 2 : index
    %c0_95 = arith.constant 0 : index
    %c0_96 = arith.constant 0 : index
    %129 = vector.load %arg13[%c2_94, %c0_95, %c0_96] : memref<10x18x128xbf16, #tpu.memory_space<vmem>>, vector<8x16x128xbf16>
    %130 = vector.shape_cast %129 : vector<8x16x128xbf16> to vector<128x128xbf16>
    %c6_97 = arith.constant 6 : index
    %c0_98 = arith.constant 0 : index
    %c0_99 = arith.constant 0 : index
    %131 = vector.load %arg6[%c6_97, %c0_98, %c0_99] : memref<9x128x128xbf16, #tpu.memory_space<vmem>>, vector<1x128x128xbf16>
    %132 = vector.shape_cast %131 : vector<1x128x128xbf16> to vector<128x128xbf16>
    %cst_100 = arith.constant dense<0.000000e+00> : vector<128x128xf32>
    %133 = tpu.matmul %130, %132, %cst_100 {dimension_numbers = #tpu.dot_dimension_numbers<[1], [0], [0], [1], [0, 0, 1, 1], [], []>} : vector<128x128xbf16>, vector<128x128xbf16>, vector<128x128xf32> -> vector<128x128xf32>
    %134 = arith.addf %128, %133 : vector<128x128xf32>
    %c2_101 = arith.constant 2 : index
    %c1_102 = arith.constant 1 : index
    %c0_103 = arith.constant 0 : index
    %135 = vector.load %arg13[%c2_101, %c1_102, %c0_103] : memref<10x18x128xbf16, #tpu.memory_space<vmem>>, vector<8x16x128xbf16>
    %136 = vector.shape_cast %135 : vector<8x16x128xbf16> to vector<128x128xbf16>
    %c7_104 = arith.constant 7 : index
    %c0_105 = arith.constant 0 : index
    %c0_106 = arith.constant 0 : index
    %137 = vector.load %arg6[%c7_104, %c0_105, %c0_106] : memref<9x128x128xbf16, #tpu.memory_space<vmem>>, vector<1x128x128xbf16>
    %138 = vector.shape_cast %137 : vector<1x128x128xbf16> to vector<128x128xbf16>
    %cst_107 = arith.constant dense<0.000000e+00> : vector<128x128xf32>
    %139 = tpu.matmul %136, %138, %cst_107 {dimension_numbers = #tpu.dot_dimension_numbers<[1], [0], [0], [1], [0, 0, 1, 1], [], []>} : vector<128x128xbf16>, vector<128x128xbf16>, vector<128x128xf32> -> vector<128x128xf32>
    %140 = arith.addf %134, %139 : vector<128x128xf32>
    %c2_108 = arith.constant 2 : index
    %c2_109 = arith.constant 2 : index
    %c0_110 = arith.constant 0 : index
    %141 = vector.load %arg13[%c2_108, %c2_109, %c0_110] : memref<10x18x128xbf16, #tpu.memory_space<vmem>>, vector<8x16x128xbf16>
    %142 = vector.shape_cast %141 : vector<8x16x128xbf16> to vector<128x128xbf16>
    %c8_111 = arith.constant 8 : index
    %c0_112 = arith.constant 0 : index
    %c0_113 = arith.constant 0 : index
    %143 = vector.load %arg6[%c8_111, %c0_112, %c0_113] : memref<9x128x128xbf16, #tpu.memory_space<vmem>>, vector<1x128x128xbf16>
    %144 = vector.shape_cast %143 : vector<1x128x128xbf16> to vector<128x128xbf16>
    %cst_114 = arith.constant dense<0.000000e+00> : vector<128x128xf32>
    %145 = tpu.matmul %142, %144, %cst_114 {dimension_numbers = #tpu.dot_dimension_numbers<[1], [0], [0], [1], [0, 0, 1, 1], [], []>} : vector<128x128xbf16>, vector<128x128xbf16>, vector<128x128xf32> -> vector<128x128xf32>
    %146 = arith.addf %140, %145 : vector<128x128xf32>
    %c0_115 = arith.constant 0 : index
    %c0_116 = arith.constant 0 : index
    %147 = vector.load %arg7[%c0_115, %c0_116] : memref<1x128xf32, #tpu.memory_space<vmem>>, vector<1x128xf32>
    %148 = vector.broadcast %147 : vector<1x128xf32> to vector<128x128xf32>
    %149 = arith.mulf %146, %148 : vector<128x128xf32>
    %c0_117 = arith.constant 0 : index
    %c0_118 = arith.constant 0 : index
    %150 = vector.load %arg8[%c0_117, %c0_118] : memref<1x128xf32, #tpu.memory_space<vmem>>, vector<1x128xf32>
    %151 = vector.broadcast %150 : vector<1x128xf32> to vector<128x128xf32>
    %152 = arith.addf %149, %151 : vector<128x128xf32>
    %c2_i32_119 = arith.constant 2 : i32
    %153 = arith.addi %1, %c2_i32_119 : i32
    %c0_120 = arith.constant 0 : index
    %154 = arith.index_cast %153 : i32 to index
    %c0_121 = arith.constant 0 : index
    %c0_122 = arith.constant 0 : index
    %155 = vector.load %arg2[%c0_120, %154, %c0_121, %c0_122] : memref<1x20x18x128xbf16, #tpu.memory_space<vmem>>, vector<1x8x18x128xbf16>
    %156 = vector.shape_cast %155 : vector<1x8x18x128xbf16> to vector<8x18x128xbf16>
    %157 = vector.extract_strided_slice %156 {offsets = [0, 1, 0], sizes = [8, 16, 128], strides = [1, 1, 1]} : vector<8x18x128xbf16> to vector<8x16x128xbf16>
    %158 = vector.shape_cast %157 : vector<8x16x128xbf16> to vector<128x128xbf16>
    %c0_123 = arith.constant 0 : index
    %c0_124 = arith.constant 0 : index
    %159 = vector.load %arg9[%c0_123, %c0_124] : memref<128x128xbf16, #tpu.memory_space<vmem>>, vector<128x128xbf16>
    %cst_125 = arith.constant dense<0.000000e+00> : vector<128x128xf32>
    %160 = tpu.matmul %158, %159, %cst_125 {dimension_numbers = #tpu.dot_dimension_numbers<[1], [0], [0], [1], [0, 0, 1, 1], [], []>} : vector<128x128xbf16>, vector<128x128xbf16>, vector<128x128xf32> -> vector<128x128xf32>
    %c0_126 = arith.constant 0 : index
    %c0_127 = arith.constant 0 : index
    %161 = vector.load %arg10[%c0_126, %c0_127] : memref<1x128xf32, #tpu.memory_space<vmem>>, vector<1x128xf32>
    %162 = vector.broadcast %161 : vector<1x128xf32> to vector<128x128xf32>
    %163 = arith.mulf %160, %162 : vector<128x128xf32>
    %c0_128 = arith.constant 0 : index
    %c0_129 = arith.constant 0 : index
    %164 = vector.load %arg11[%c0_128, %c0_129] : memref<1x128xf32, #tpu.memory_space<vmem>>, vector<1x128xf32>
    %165 = vector.broadcast %164 : vector<1x128xf32> to vector<128x128xf32>
    %166 = arith.addf %163, %165 : vector<128x128xf32>
    %167 = arith.addf %152, %166 : vector<128x128xf32>
    %cst_130 = arith.constant 0.000000e+00 : f32
    %168 = vector.broadcast %cst_130 : f32 to vector<128x128xf32>
    %169 = arith.maximumf %167, %168 : vector<128x128xf32>
    %170 = vector.shape_cast %169 : vector<128x128xf32> to vector<8x16x128xf32>
    %c0_131 = arith.constant 0 : index
    %c0_132 = arith.constant 0 : index
    %c0_133 = arith.constant 0 : index
    %c0_134 = arith.constant 0 : index
    %171 = vector.load %arg12[%c0_131, %c0_132, %c0_133, %c0_134] : memref<1x8x16x128xf32, #tpu.memory_space<vmem>>, vector<1x8x16x128xf32>
    %172 = vector.shape_cast %171 : vector<1x8x16x128xf32> to vector<8x16x128xf32>
    %173 = vector.shape_cast %170 : vector<8x16x128xf32> to vector<1x8x16x128xf32>
    tpu.vector_store %arg12[%c0_131, %c0_132, %c0_133, %c0_134], %173 {strides = array<i32>} : memref<1x8x16x128xf32, #tpu.memory_space<vmem>>, vector<1x8x16x128xf32>,
    return
  }
  func.func @transform_0(%arg0: i32, %arg1: i32) -> (i32, i32, i32, i32) {
    %c0_i32 = arith.constant 0 : i32
    %c0_i32_0 = arith.constant 0 : i32
    %c0_i32_1 = arith.constant 0 : i32
    %c0_i32_2 = arith.constant 0 : i32
    return %arg0, %c0_i32, %c0_i32_0, %c0_i32_1 : i32, i32, i32, i32
  }
  func.func @transform_1(%arg0: i32, %arg1: i32) -> (i32, i32, i32) {
    %c0_i32 = arith.constant 0 : i32
    %c0_i32_0 = arith.constant 0 : i32
    %c0_i32_1 = arith.constant 0 : i32
    %c0_i32_2 = arith.constant 0 : i32
    return %c0_i32, %c0_i32_0, %c0_i32_1 : i32, i32, i32
  }
  func.func @transform_2(%arg0: i32, %arg1: i32) -> (i32, i32) {
    %c0_i32 = arith.constant 0 : i32
    %c0_i32_0 = arith.constant 0 : i32
    %c0_i32_1 = arith.constant 0 : i32
    return %c0_i32, %c0_i32_0 : i32, i32
  }
  func.func @transform_3(%arg0: i32, %arg1: i32) -> (i32, i32) {
    %c0_i32 = arith.constant 0 : i32
    %c0_i32_0 = arith.constant 0 : i32
    %c0_i32_1 = arith.constant 0 : i32
    return %c0_i32, %c0_i32_0 : i32, i32
  }
  func.func @transform_4(%arg0: i32, %arg1: i32) -> (i32, i32, i32) {
    %c0_i32 = arith.constant 0 : i32
    %c0_i32_0 = arith.constant 0 : i32
    %c0_i32_1 = arith.constant 0 : i32
    %c0_i32_2 = arith.constant 0 : i32
    return %c0_i32, %c0_i32_0, %c0_i32_1 : i32, i32, i32
  }
  func.func @transform_5(%arg0: i32, %arg1: i32) -> (i32, i32) {
    %c0_i32 = arith.constant 0 : i32
    %c0_i32_0 = arith.constant 0 : i32
    %c0_i32_1 = arith.constant 0 : i32
    return %c0_i32, %c0_i32_0 : i32, i32
  }
  func.func @transform_6(%arg0: i32, %arg1: i32) -> (i32, i32) {
    %c0_i32 = arith.constant 0 : i32
    %c0_i32_0 = arith.constant 0 : i32
    %c0_i32_1 = arith.constant 0 : i32
    return %c0_i32, %c0_i32_0 : i32, i32
  }
  func.func @transform_7(%arg0: i32, %arg1: i32) -> (i32, i32) {
    %c0_i32 = arith.constant 0 : i32
    %c0_i32_0 = arith.constant 0 : i32
    %c0_i32_1 = arith.constant 0 : i32
    return %c0_i32, %c0_i32_0 : i32, i32
  }
  func.func @transform_8(%arg0: i32, %arg1: i32) -> (i32, i32) {
    %c0_i32 = arith.constant 0 : i32
    %c0_i32_0 = arith.constant 0 : i32
    %c0_i32_1 = arith.constant 0 : i32
    return %c0_i32, %c0_i32_0 : i32, i32
  }
  func.func @transform_9(%arg0: i32, %arg1: i32) -> (i32, i32) {
    %c0_i32 = arith.constant 0 : i32
    %c0_i32_0 = arith.constant 0 : i32
    %c0_i32_1 = arith.constant 0 : i32
    return %c0_i32, %c0_i32_0 : i32, i32
  }
  func.func @transform_10(%arg0: i32, %arg1: i32) -> (i32, i32, i32, i32) {
    %c0_i32 = arith.constant 0 : i32
    %c0_i32_0 = arith.constant 0 : i32
    %c0_i32_1 = arith.constant 0 : i32
    return %arg0, %arg1, %c0_i32, %c0_i32_0 : i32, i32, i32, i32
  }
}

</mosaic_0001>

<bundles_post_ra>
// kernel: tpu_custom_call.1
= control target key start
LH: loop header
LB: loop body
LE: loop exit
PB: predicated region body
PF: predicated region fallthrough
CT: control target
= control target key end

     0   :  { %s13100_s0 = inlined_call_operand.vmem [shape: bf16[2,20,18,128], index: 0, kind: input, shape index: {}]   ;;  %s13101_s1 = inlined_call_operand.vmem [shape: bf16[9,128,128], index: 1, kind: input, shape index: {}]   ;;  %s13102_s2 = inlined_call_operand.vmem [shape: f32[1,128], index: 2, kind: input, shape index: {}]   ;;  %s13103_s3 = inlined_call_operand.vmem [shape: f32[1,128], index: 3, kind: input, shape index: {}]   ;;  %s13104_s4 = inlined_call_operand.hbm [shape: bf16[9,128,128], index: 4, kind: input, shape index: {}]   ;;  %s13105_s5 = inlined_call_operand.vmem [shape: f32[1,128], index: 5, kind: input, shape index: {}]   ;;  %s13106_s6 = inlined_call_operand.vmem [shape: f32[1,128], index: 6, kind: input, shape index: {}]   ;;  %s13107_s7 = inlined_call_operand.vmem [shape: bf16[128,128], index: 7, kind: input, shape index: {}]   ;;  %s13108_s8 = inlined_call_operand.vmem [shape: f32[1,128], index: 8, kind: input, shape index: {}]   ;;  %s13109_s9 = inlined_call_operand.vmem [shape: f32[1,128], index: 9, kind: input, shape index: {}]   ;;  %s13110_s10 = inlined_call_operand.hbm [shape: f32[2,16,16,128], index: 10, kind: output, shape index: {}]  }
   0x1   :  { %13136 = sst [smem:[#allocation43_spill]] %s13104_s4 }
   0x2   :  { %15 = vsyncpa [#allocation4], 0 }
   0x3   :  { %16 = vsyncpa [#allocation5], 0 }
   0x4   :  { %18 = vsyncpa [#allocation5 + $0x1], 0  ;;  %s9801_s13 = smov 0   ;;  %s9803_s14 = smov 0  }
   0x5   :  { %s9805_s15 = smov 0   ;;  %s9807_s16 = smov 0  }
   0x6   :  { %s9809_s17 = smov 0   ;;  %s9811_s18 = smov 0  }
   0x7   :  { %s9813_s19 = smov 0   ;;  %s9815_s20 = smov 0  }
   0x8 LB: > { %13137 = sst [smem:[#allocation9_spill]] %s9730_s18  ;;  %s7679_s21 = sadd.s32 4294967295, %s9738_s20   ;;  %s9738_s20 = sphi %s9815_s20, %s24_s20   ;;  %s9734_s19 = sphi %s9813_s19, %s13295_s19   ;;  %s9730_s18 = sphi %s9811_s18, %s13294_s18   ;;  %s9726_s17 = sphi %s9809_s17, %s13293_s17   ;;  %s9722_s16 = sphi %s9807_s16, %s13292_s16   ;;  %s9718_s15 = sphi %s9805_s15, %s13298_s15   ;;  %s9714_s14 = sphi %s9803_s14, %s13297_s14   ;;  %s9710_s13 = sphi %s9801_s13, %s13296_s13  }
   0x9   : > { %13138 = sst [smem:[#allocation10_spill]] %s9734_s19  ;;  %s7680_s22 = sadd.s32 4294967294, %s9738_s20  }
   0xa   : > { %s33_s23 = sadd.s32 1, %s9730_s18  ;;  %s36_s24 = sadd.s32 1, %s9734_s19 }
   0xb   : > { %p34_p0 = scmp.ge.s32.totalorder %s33_s23, 2  ;;  %s260_s25 = sadd.s32 1, %s9718_s15 }
   0xc   : > { %p270_p1 = scmp.ne.s32.totalorder %s9718_s15, %s9714_s14  ;;  %p271_p2 = scmp.eq.s32.totalorder %s7679_s21, 3 }
   0xd   : > { %s13300_s23 = smov (%p34_p0, %s33_s23), 0  ;;  %s13302_s24 = smov (!%p34_p0, %s36_s24), %s9734_s19 }
   0xe   : > { %13139 = sst [smem:[#allocation11_spill]] %s13300_s23  ;;  %s256_s26 = ssub.s32 %s9730_s18, %s13300_s23 }
   0xf   : > { %p9853_p3 = por %p271_p2, %p270_p1  ;;  %p38_p4 = scmp.ge.s32.totalorder %s13302_s24, 2 }
  0x10   : > { %p276_p5 = scmp.ne.s32.totalorder %s9714_s14, %s9710_s13  ;;  %p277_p6 = scmp.eq.s32.totalorder %s7680_s22, 3 }
  0x11   : > { %p7681_p7 = scmp.ge.s32.totalorder %s9738_s20, 1  ;;  %s13304_s24 = smov (%p38_p4, %s13302_s24), 0 }
  0x12   : > { %13141 = sst [smem:[#allocation12_spill]] %s13304_s24  ;;  %p9862_p8 = por %p277_p6, %p276_p5 }
  0x13   : > { %p284_p9 = scmp.lt.s32.totalorder %s9738_s20, 5  ;;  %s255_s29 = ssub.s32 %s9734_s19, %s13304_s24 }
  0x14   : > { %s257_s30 = sor.u32 %s256_s26, %s255_s29  ;;  %p9873_p12 = scmp.eq.s32.totalorder %s7679_s21, 0 }
  0x15   : > { %p9869_p10 = pnand %p7681_p7, %p284_p9  ;;  %p258_p11 = scmp.eq.s32.totalorder %s257_s30, 0 }
  0x16   : > { %s9740_s23 = smov [#allocation3]  }
  0x17   : > { %p9328_p13 = pneg %p9869_p10  ;;  %s305_s18 = sshll.u32 %s9740_s23, 4  ;;  %s306_s18 = int_to_ptr.vmem [resolvable:$true] %s305_s18 }
  0x18   : > { %s9880_s22 = scalar_select %p258_p11, %s9718_s15, %s260_s25  }
  0x19   : > { %p9884_p0 = pnand %p9873_p12, %p9328_p13  ;;  %s9627_s21 = scalar_lea.vmem %s306_s18, 9216 }
  0x1a   : > { %p9628_p2 = scmp.ne.s32.totalorder %s306_s18, %s9627_s21  ;;  %p9635_p6 = scmp.lt.s32.totalorder %s306_s18, %s306_s18 }
  0x1b   : > { %p9618_p1 = pneg %p9884_p0  ;;  %p9636_p7 = scmp.lt.s32.totalorder %s9627_s21, %s9627_s21 }
  0x1d   : > { %p9630_p4 = pnand %p9628_p2, %p9618_p1  ;;  %p9637_p9 = por %p9636_p7, %p9635_p6 }
  0x1f   : > { %p9631_p5 = pneg %p9630_p4 }
  0x21   : > { %p9638_p11 = pnand %p9637_p9, %p9631_p5 }
  0x23   : > { %9641 = shalt.err (!%p9638_p11)
}
  0x24   : > { %s9741_s25 = smov 64   ;;  %s9742_s23 = smov 4  }
  0x25   : > { %s13146_s4 = sld [smem:[#allocation43_spill]] }
  0x27   : > { %344 = sbr.rel (%p9869_p10) target bundleno = 942 (0x3ae), region = 60 }
  0x2b   : > { %9331 = dma.hbm_to_vmem [thread:$0]  (!%p9884_p0), %s13146_s4, 9216, %s306_s18, [#allocation4], %s9741_s25, %s9741_s25, %s9742_s23  }
  0x2c   : > { %9701 = dma.done.wait (%p9873_p12), [#allocation4], 9216  }
  0x2d   : > { %9703 = vsyncadd (%p9873_p12), [#allocation4], 4294958080  ;;  %p382_p13 = scmp.lt.s32.totalorder %s9726_s17, 1  ;;  %v9408_v0 = vld [vmem:[%s13101_s1 + $0x78] sm:$0xff]   ;;  %v9410_v2 = vld [vmem:[%s13101_s1 + $0x70] sm:$0xff]   ;;  %s8317_s23 = smul.u32 96, %s9722_s16 }
  0x2e   : > { %v9409_v1 = vld [vmem:[%s13101_s1 + $0x38] sm:$0xff]   ;;  %8661 = vmatprep.subr.bf16.mxu0 %v9408_v0  ;;  %v9411_v3 = vld [vmem:[%s13101_s1 + $0x30] sm:$0xff]   ;;  %v9412_v4 = vld [vmem:[%s13101_s1 + $0x68] sm:$0xff]   ;;  %vm439_vm0 = vsmask.f32 3328  ;;  %v13147_v39 = vmov 0 }
  0x2f   : > { %s383_s25 = scalar_select %p382_p13, %s9726_s17, 1  ;;  %8697 = vmatprep.subr.bf16.mxu1 %v9409_v1  ;;  %8662 = vmatpush3.bf16.msra.mxu0 %v9408_v0  ;;  %v9413_v5 = vld [vmem:[%s13101_s1 + $0x28] sm:$0xff]   ;;  %v9414_v6 = vld [vmem:[%s13101_s1 + $0x60] sm:$0xff]   ;;  %vm440_vm1 = vsmask.f32 7440  ;;  %v9416_v8 = vld [vmem:[%s13101_s1 + $0x58] sm:$0xff]  }
  0x30   : > { %8698 = vmatpush3.bf16.msra.mxu1 %v9409_v1  ;;  %8663 = vmatprep.subr.bf16.mxu0 %v9410_v2  ;;  %v9415_v7 = vld [vmem:[%s13101_s1 + $0x20] sm:$0xff]   ;;  %v9417_v9 = vld [vmem:[%s13101_s1 + $0x18] sm:$0xff]   ;;  %v9418_v10 = vld [vmem:[%s13101_s1 + $0x50] sm:$0xff]   ;;  %vm1131_vm3 = vcmask 1042432   ;;  %vm1132_vm4 = vcmask 1046532   ;;  %vm3773_vm6 = vcmask 1040384  }
  0x31   : > { %8699 = vmatprep.subr.bf16.mxu1 %v9411_v3  ;;  %s9321_s21 = smul.u32 240, %s383_s25  ;;  %v9419_v11 = vld [vmem:[%s13101_s1 + $0x10] sm:$0xff]   ;;  %v9420_v20 = vld [vmem:[%s13101_s1 + $0x48] sm:$0xff]   ;;  %v9422_v38 = vld [vmem:[%s13101_s1 + $0x40] sm:$0xff]   ;;  %vm3774_vm7 = vsmask.f32 256 }
  0x32   : > { %v9421_v33 = vld [vmem:[%s13101_s1 + $0x8] sm:$0xff]   ;;  %vm9986_vm2 = vmor %vm439_vm0, %vm440_vm1  ;;  %v9423_v53 = vld [vmem:[%s13101_s1] sm:$0xff]   ;;  %vm3806_vm8 = vsmask.f32 7938  ;;  %s7688_s24 = sshll.u32 %s9722_s16, 3  ;;  %vm4100_vm15 = vcmask 1043456  }
  0x33   : > { %8664 = vmatpush3.bf16.msra.mxu0 %v9410_v2  ;;  %s386_s4 = scalar_lea.vmem %s13100_s0, %s9321_s21  ;;  %v13148_v39 = vsel %vm9986_vm2, 4294967295, %v13147_v39  ;;  %vm10210_vm5 = vmor %vm1131_vm3, %vm1132_vm4  ;;  %s379_s19 = sand.u32 1, %s9714_s14  }
  0x34   : > { %8700 = vmatpush3.bf16.msra.mxu1 %v9411_v3  ;;  %8665 = vmatprep.subr.bf16.mxu0 %v9412_v4  ;;  %s9937_s18 = scalar_lea.vmem %s386_s4, %s8317_s23  ;;  %13149 = vst [vmem:[#allocation13_spill] sm:$0xff] %v13148_v39  ;;  %vm11173_vm9 = vmand %vm3773_vm6, %vm3774_vm7  ;;  %s8077_s4 = sadd.s32 4294967295, %s7688_s24 }
  0x35   : > { %8701 = vmatprep.subr.bf16.mxu1 %v9413_v5  ;;  %v9946_v12 = vld [vmem:[%s9937_s18] sm:$0xf]  ;;  %v9949_v13 = vld [vmem:[%s9937_s18 + $0x4] sm:$0xf]  ;;  %v9952_v14 = vld [vmem:[%s9937_s18 + $0x8] sm:$0x1] }
  0x36   : > { %v443_v15 = vshrl.u32 %v9946_v12, 16  ;;  %v446_v16 = vshll.u32 %v9946_v12, 16  ;;  %v452_v17 = vshll.u32 %v9949_v13, 16  ;;  %v456_v18 = vshrl.u32 %v9949_v13, 16  ;;  %v9959_v19 = vld [vmem:[%s9937_s18 + $0xc] sm:$0xf]  ;;  %vm11180_vm10 = vmand %vm3773_vm6, %vm3806_vm8 }
  0x37   : > { %8666 = vmatpush3.bf16.msra.mxu0 %v9412_v4  ;;  %v462_v21 = vshll.u32 %v9952_v14, 16  ;;  %v7725_v22 = vcombine.low %v9946_v12, %v9949_v13  ;;  %v9968_v23 = vld [vmem:[%s9937_s18 + $0x10] sm:$0xf]  ;;  %v9971_v24 = vld [vmem:[%s9937_s18 + $0x14] sm:$0x1]  ;;  %v467_v30 = vshrl.u32 %v9959_v19, 16 }
  0x38   : > { %8702 = vmatpush3.bf16.msra.mxu1 %v9413_v5  ;;  %8667 = vmatprep.subr.bf16.mxu0 %v9414_v6  ;;  %v445_v25 = vrot.slane %v443_v15, 4  ;;  %v448_v26 = vrot.slane %v446_v16, 5  ;;  %v454_v27 = vrot.slane %v452_v17, 5  ;;  %v458_v28 = vrot.slane %v456_v18, 4  ;;  %v9991_v47 = vld [vmem:[%s9937_s18 + $0x18] sm:$0xf] }
  0x39   : > { %8703 = vmatprep.subr.bf16.mxu1 %v9415_v7  ;;  %v464_v29 = vrot.slane %v462_v21, 5  ;;  %v470_v31 = vshll.u32 %v9959_v19, 16  ;;  %v476_v32 = vshll.u32 %v9968_v23, 16  ;;  %8713 = vmatprep.mubr.bf16.mxu1 %v7725_v22  ;;  %v480_v36 = vshrl.u32 %v9968_v23, 16  ;;  %v9994_v49 = vld [vmem:[%s9937_s18 + $0x1c] sm:$0xf] }
  0x3a   : > { %v449_v34 = vor.u32 %v448_v26, %v445_v25  ;;  %v459_v35 = vor.u32 %v458_v28, %v454_v27  ;;  %v486_v37 = vshll.u32 %v9971_v24, 16  ;;  %v469_v40 = vrot.slane %v467_v30, 4  ;;  %v9997_v50 = vld [vmem:[%s9937_s18 + $0x20] sm:$0x1]  ;;  %v10010_v58 = vld [vmem:[%s9937_s18 + $0x24] sm:$0xf] }
  0x3b   : > { %8668 = vmatpush3.bf16.msra.mxu0 %v9414_v6  ;;  %v472_v41 = vrot.slane %v470_v31, 5  ;;  %v478_v42 = vrot.slane %v476_v32, 5  ;;  %v482_v45 = vrot.slane %v480_v36, 4  ;;  %v491_v51 = vshrl.u32 %v9991_v47, 16  ;;  %v10013_v59 = vld [vmem:[%s9937_s18 + $0x28] sm:$0xf] }
  0x3c   : > { %8704 = vmatpush3.bf16.msra.mxu1 %v9415_v7  ;;  %8669 = vmatprep.subr.bf16.mxu0 %v9416_v8  ;;  %v450_v43 = vrot.slane %v449_v34, 4  ;;  %v460_v44 = vrot.slane %v459_v35, 4  ;;  %v488_v46 = vrot.slane %v486_v37, 5  ;;  %v494_v52 = vshll.u32 %v9991_v47, 16  ;;  %v10016_v0 = vld [vmem:[%s9937_s18 + $0x2c] sm:$0x1] }
  0x3d   : > { %8705 = vmatprep.subr.bf16.mxu1 %v9417_v9  ;;  %v473_v48 = vor.u32 %v472_v41, %v469_v40  ;;  %v483_v56 = vor.u32 %v482_v45, %v478_v42  ;;  %v500_v57 = vshll.u32 %v9994_v49, 16  ;;  %v493_v62 = vrot.slane %v491_v51, 4  ;;  %v9426_v7 = vld [vmem:[%s13101_s1 + $0xb8] sm:$0xff]   ;;  %v10047_v34 = vld [vmem:[%s9937_s18 + $0x30] sm:$0xf]  ;;  %s7686_s11 = sshll.u32 %s379_s19, 7 }
  0x3e   : > { %v455_v54 = vsel %vm9986_vm2, %v450_v43, %v454_v27  ;;  %v465_v55 = vsel %vm9986_vm2, %v460_v44, %v464_v29  ;;  %v496_v63 = vrot.slane %v494_v52, 5  ;;  %v504_v3 = vshrl.u32 %v9994_v49, 16  ;;  %v9431_v17 = vld [vmem:[%s13101_s1 + $0xf8] sm:$0xff]   ;;  %v9427_v29 = vld [vmem:[%s13101_s1 + $0xb0] sm:$0xff]   ;;  %s12946_s12 = scalar_lea.vmem [#allocation6], %s7686_s11  ;;  %s8338_s21 = sshll.u32 %s9722_s16, 4 }
  0x3f   : > { %8670 = vmatpush3.bf16.msra.mxu0 %v9416_v8  ;;  %v7707_v60 = vcombine.low %v455_v54, %v465_v55  ;;  %v474_v61 = vrot.slane %v473_v48, 4  ;;  %v484_v1 = vrot.slane %v483_v56, 4  ;;  %v502_v2 = vrot.slane %v500_v57, 5  ;;  %v10050_v35 = vld [vmem:[%s9937_s18 + $0x34] sm:$0xf]  ;;  %v9430_v56 = vld [vmem:[%s13101_s1 + $0xa8] sm:$0xff]  }
  0x40   : > { %8706 = vmatpush3.bf16.msra.mxu1 %v9417_v9  ;;  %8671 = vmatprep.subr.bf16.mxu0 %v9418_v10  ;;  %v510_v4 = vshll.u32 %v9997_v50, 16  ;;  %v7726_v6 = vcombine.low %v9959_v19, %v9968_v23  ;;  %v497_v8 = vor.u32 %v496_v63, %v493_v62  ;;  %v515_v9 = vshrl.u32 %v10010_v58, 16  ;;  %v9432_v41 = vld [vmem:[%s13101_s1 + $0xf0] sm:$0xff]   ;;  %v10066_v54 = vld [vmem:[%s9937_s18 + $0x3c] sm:$0xf]  ;;  %s7581_s24 = sshll.u32 %s12946_s12, 4  ;;  %s13043_s24 = int_to_ptr.vmem [resolvable:$true] %s7581_s24 }
  0x41   : > { %8707 = vmatprep.subr.bf16.mxu1 %v9419_v11  ;;  %v479_v5 = vsel %vm9986_vm2, %v474_v61, %v478_v42  ;;  %8677 = vmatprep.mubr.bf16.mxu0 %v7707_v60  ;;  %v518_v16 = vshll.u32 %v10010_v58, 16  ;;  %v524_v22 = vshll.u32 %v10013_v59, 16  ;;  %v528_v27 = vshrl.u32 %v10013_v59, 16  ;;  %v10056_v42 = vld [vmem:[%s9937_s18 + $0x38] sm:$0x1]  ;;  %s13049_s25 = scalar_lea.sflag [#allocation5], %s379_s19 }
  0x42   : > { %v512_v15 = vrot.slane %v510_v4, 5  ;;  %v517_v21 = vrot.slane %v515_v9, 4  ;;  %v534_v28 = vshll.u32 %v10016_v0, 16  ;;  %v7727_v31 = vcombine.low %v9991_v47, %v9994_v49  ;;  %v10072_v62 = vld [vmem:[%s9937_s18 + $0x40] sm:$0xf]  ;;  %s9642_s30 = scalar_lea.vmem %s13043_s24, 2048 }
  0x43   : > { %8672 = vmatpush3.bf16.msra.mxu0 %v9418_v10  ;;  %v489_v10 = vsel %vm9986_vm2, %v484_v1, %v488_v46  ;;  %v520_v26 = vrot.slane %v518_v16, 5  ;;  %v526_v32 = vrot.slane %v524_v22, 5  ;;  %v539_v43 = vshrl.u32 %v10047_v34, 16  ;;  %v10077_v4 = vld [vmem:[%s9937_s18 + $0x44] sm:$0x1]  ;;  %p9643_p10 = scmp.ne.s32.totalorder %s13043_s24, %s9642_s30  ;;  %s9743_s26 = smov [#allocation6]  }
  0x44   : > { %8708 = vmatpush3.bf16.msra.mxu1 %v9419_v11  ;;  %8673 = vmatprep.subr.bf16.mxu0 %v9420_v20  ;;  %v506_v11 = vrot.slane %v504_v3, 4  ;;  %v7708_v18 = vcombine.low %v479_v5, %v489_v10  ;;  %v536_v40 = vrot.slane %v534_v28, 5  ;;  %v542_v44 = vshll.u32 %v10047_v34, 16  ;;  %v9436_v5 = vld [vmem:[%s13101_s1 + $0xe8] sm:$0xff]   ;;  %s9646_s11 = sshll.u32 %s9743_s26, 4  ;;  %s9647_s11 = int_to_ptr.vmem [resolvable:$false] %s9646_s11 }
  0x45   : > { %8709 = vmatprep.subr.bf16.mxu1 %v9421_v33  ;;  %v521_v37 = vor.u32 %v520_v26, %v517_v21  ;;  %v548_v45 = vshll.u32 %v10050_v35, 16  ;;  %v552_v46 = vshrl.u32 %v10050_v35, 16  ;;  %v541_v57 = vrot.slane %v539_v43, 4  ;;  %p9644_p12 = pnand %p9643_p10, %p9853_p3  ;;  %p9649_p1 = scmp.lt.s32.totalorder %s13043_s24, %s9647_s11 }
  0x46   : > { %v507_v25 = vor.u32 %v506_v11, %v502_v2  ;;  %v544_v60 = vrot.slane %v542_v44, 5  ;;  %v563_v9 = vshrl.u32 %v10066_v54, 16  ;;  %v566_v10 = vshll.u32 %v10066_v54, 16 }
  0x47   : > { %8674 = vmatpush3.bf16.msra.mxu0 %v9420_v20  ;;  %v498_v20 = vrot.slane %v497_v8, 4  ;;  %v522_v51 = vrot.slane %v521_v37, 4  ;;  %v550_v61 = vrot.slane %v548_v45, 5  ;;  %v9434_v8 = vld [vmem:[%s13101_s1 + $0xa0] sm:$0xff]   ;;  %v572_v16 = vshll.u32 %v10072_v62, 16  ;;  %p9645_p0 = pneg %p9644_p12 }
  0x48   : > { %8710 = vmatpush3.bf16.msra.mxu1 %v9421_v33  ;;  %8675 = vmatprep.subr.bf16.mxu0 %v9422_v38  ;;  %v7728_v33 = vcombine.low %v10010_v58, %v10013_v59  ;;  %v508_v36 = vrot.slane %v507_v25, 4  ;;  %v565_v21 = vrot.slane %v563_v9, 4  ;;  %v568_v22 = vrot.slane %v566_v10, 5  ;;  %v9438_v25 = vld [vmem:[%s13101_s1 + $0xe0] sm:$0xff]   ;;  %v10105_v37 = vld [vmem:[%s9937_s18 + $0x48] sm:$0xf] }
  0x49   : > { %8711 = vmatprep.subr.bf16.mxu1 %v9423_v53  ;;  %v503_v30 = vsel %vm9986_vm2, %v498_v20, %v502_v2  ;;  %v527_v63 = vsel %vm9986_vm2, %v522_v51, %v526_v32  ;;  %v554_v2 = vrot.slane %v552_v46, 4  ;;  %v587_v45 = vshrl.u32 %v10105_v37, 16  ;;  %v10120_v46 = vld [vmem:[%s9937_s18 + $0x54] sm:$0xf] }
  0x4a   : > { %v513_v48 = vsel %vm9986_vm2, %v508_v36, %v512_v15  ;;  %v9437_v36 = vld [vmem:[%s13101_s1 + $0x98] sm:$0xff]   ;;  %v611_v10 = vshrl.u32 %v10120_v46, 16 }
  0x4b   : > { %8676 = vmatpush3.bf16.msra.mxu0 %v9422_v38  ;;  %v530_v38 = vrot.slane %v528_v27, 4  ;;  %v7709_v55 = vcombine.low %v503_v30, %v513_v48  ;;  %v555_v15 = vor.u32 %v554_v2, %v550_v61  ;;  %v574_v27 = vrot.slane %v572_v16, 5  ;;  %v10123_v48 = vld [vmem:[%s9937_s18 + $0x58] sm:$0xf] }
  0x4c   : > { %8712 = vmatpush3.bf16.msra.mxu1 %v9423_v53  ;;  %8733 = vmatprep.subr.bf16.mxu0 %v9426_v7  ;;  %v558_v53 = vshll.u32 %v10056_v42, 16 }
  0x4d   : > { %8769 = vmatprep.subr.bf16.mxu1 %v9431_v17  ;;  %v531_v52 = vor.u32 %v530_v38, %v526_v32  ;;  %v556_v26 = vrot.slane %v555_v15, 4  ;;  %v7730_v32 = vcombine.low %v10066_v54, %v10072_v62  ;;  %v10108_v38 = vld [vmem:[%s9937_s18 + $0x4c] sm:$0xf] }
  0x4e   : > { %8678 = vmatmul.mubr.bf16.vlgmr.msra.gmra.mxu0 %v7708_v18  ;;  %v560_v3 = vrot.slane %v558_v53, 5  ;;  %v590_v53 = vshll.u32 %v10105_v37, 16 }
  0x4f   : > { %8714 = vmatmul.mubr.bf16.vlgmr.msra.gmra.mxu1 %v7726_v6  ;;  %8734 = vmatpush3.bf16.msra.mxu0 %v9426_v7  ;;  %v532_v1 = vrot.slane %v531_v52, 4  ;;  %v545_v6 = vor.u32 %v544_v60, %v541_v57  ;;  %v7729_v7 = vcombine.low %v10047_v34, %v10050_v35  ;;  %v589_v60 = vrot.slane %v587_v45, 4 }
  0x50   : > { %8735 = vmatprep.subr.bf16.mxu0 %v9427_v29  ;;  %8717 = vmatprep.mubr.bf16.mxu1 %v7727_v31  ;;  %v569_v31 = vor.u32 %v568_v22, %v565_v21  ;;  %v592_v2 = vrot.slane %v590_v53, 5  ;;  %v613_v21 = vrot.slane %v611_v10, 4  ;;  %v7743_v45 = vrot.slane %v9946_v12, 9  ;;  %v10164_v53 = vld [vmem:[%s9937_s18 + $0x64] sm:$0xf] }
  0x51   : > { %8770 = vmatpush3.bf16.msra.mxu1 %v9431_v17  ;;  %8681 = vmatprep.mubr.bf16.mxu0 %v7709_v55  ;;  %v537_v11 = vsel %vm9986_vm2, %v532_v1, %v536_v40  ;;  %v576_v17 = vshrl.u32 %v10072_v62, 16  ;;  %v546_v20 = vrot.slane %v545_v6, 4  ;;  %v10111_v40 = vld [vmem:[%s9937_s18 + $0x50] sm:$0x1]  ;;  %v10128_v55 = vld [vmem:[%s9937_s18 + $0x5c] sm:$0x1]  ;;  %v7731_v6 = vcombine.low %v10105_v37, %v10108_v38 }
  0x52   : > { %8771 = vmatprep.subr.bf16.mxu1 %v9432_v41  ;;  %v7710_v18 = vcombine.low %v527_v63, %v537_v11  ;;  %v570_v52 = vrot.slane %v569_v31, 4  ;;  %v606_v63 = vshll.u32 %v10111_v40, 16  ;;  %v9441_v11 = vld [vmem:[%s13101_s1 + $0x90] sm:$0xff]   ;;  %v593_v16 = vor.u32 %v592_v2, %v589_v60 }
  0x53   : > { %8736 = vmatpush3.bf16.msra.mxu0 %v9427_v29  ;;  %v578_v28 = vrot.slane %v576_v17, 4  ;;  %v582_v29 = vshll.u32 %v10077_v4, 16  ;;  %v551_v30 = vsel %vm9986_vm2, %v546_v20, %v550_v61  ;;  %v600_v61 = vshrl.u32 %v10108_v38, 16  ;;  %v10179_v2 = vld [vmem:[%s9937_s18 + $0x70] sm:$0xf] }
  0x54   : > { %8737 = vmatprep.subr.bf16.mxu0 %v9430_v56  ;;  %v575_v1 = vsel %vm9986_vm2, %v570_v52, %v574_v27  ;;  %v608_v9 = vrot.slane %v606_v63, 5  ;;  %v614_v17 = vshll.u32 %v10120_v46, 16  ;;  %v630_v22 = vshll.u32 %v10128_v55, 16  ;;  %v10182_v10 = vld [vmem:[%s9937_s18 + $0x74] sm:$0x1] }
  0x55   : > { %8772 = vmatpush3.bf16.msra.mxu1 %v9432_v41  ;;  %v561_v41 = vsel %vm9986_vm2, %v556_v26, %v560_v3  ;;  %v579_v43 = vor.u32 %v578_v28, %v574_v27  ;;  %v584_v44 = vrot.slane %v582_v29, 5  ;;  %v594_v26 = vrot.slane %v593_v16, 4 }
  0x56   : > { %8682 = vmatmul.mubr.bf16.gmra.mxu0 %v7710_v18  ;;  %8773 = vmatprep.subr.bf16.mxu1 %v9436_v5  ;;  %v7711_v51 = vcombine.low %v551_v30, %v561_v41  ;;  %v620_v18 = vshll.u32 %v10123_v48, 16  ;;  %v616_v27 = vrot.slane %v614_v17, 5  ;;  %v7732_v29 = vcombine.low %v10120_v46, %v10123_v48  ;;  %v9444_v30 = vld [vmem:[%s13101_s1 + $0xd0] sm:$0xff]  }
  0x57   : > { %8718 = vmatmul.mubr.bf16.gmra.mxu1 %v7728_v33  ;;  %8738 = vmatpush3.bf16.msra.mxu0 %v9430_v56  ;;  %v596_v33 = vshll.u32 %v10108_v38, 16  ;;  %v9442_v56 = vld [vmem:[%s13101_s1 + $0xd8] sm:$0xff]   ;;  %v580_v57 = vrot.slane %v579_v43, 4  ;;  %v632_v43 = vrot.slane %v630_v22, 5  ;;  %v648_v63 = vshrl.u32 %v10164_v53, 16  ;;  %v9448_v22 = vld [vmem:[%s13101_s1 + $0x80] sm:$0xff]  }
  0x58   : > { %8721 = vmatprep.mubr.bf16.mxu1 %v7729_v7  ;;  %8739 = vmatprep.subr.bf16.mxu0 %v9434_v8  ;;  %v622_v28 = vrot.slane %v620_v18, 5  ;;  %v617_v52 = vor.u32 %v616_v27, %v613_v21 }
  0x59   : > { %8774 = vmatpush3.bf16.msra.mxu1 %v9436_v5  ;;  %8685 = vmatprep.mubr.bf16.mxu0 %v7711_v51  ;;  %v598_v3 = vrot.slane %v596_v33, 5  ;;  %v585_v7 = vsel %vm9986_vm2, %v580_v57, %v584_v44  ;;  %v602_v5 = vrot.slane %v600_v61, 4  ;;  %v10158_v44 = vld [vmem:[%s9937_s18 + $0x60] sm:$0xf]  ;;  %v644_v61 = vshll.u32 %v10164_v53, 16 }
  0x5a   : > { %8775 = vmatprep.subr.bf16.mxu1 %v9438_v25  ;;  %v7712_v15 = vcombine.low %v575_v1, %v585_v7  ;;  %v638_v33 = vshll.u32 %v10158_v44, 16  ;;  %v10176_v1 = vld [vmem:[%s9937_s18 + $0x6c] sm:$0xf]  ;;  %v650_v16 = vrot.slane %v648_v63, 4  ;;  %v7733_v21 = vcombine.low %v10158_v44, %v10164_v53 }
  0x5b   : > { %8740 = vmatpush3.bf16.msra.mxu0 %v9434_v8  ;;  %v603_v20 = vor.u32 %v602_v5, %v598_v3  ;;  %v624_v8 = vshrl.u32 %v10123_v48, 16  ;;  %v599_v51 = vsel %vm9986_vm2, %v594_v26, %v598_v3 }
  0x5c   : > { %8741 = vmatprep.subr.bf16.mxu0 %v9437_v36  ;;  %v640_v5 = vrot.slane %v638_v33, 5 }
  0x5d   : > { %8776 = vmatpush3.bf16.msra.mxu1 %v9438_v25  ;;  %v9443_v25 = vld [vmem:[%s13101_s1 + $0x88] sm:$0xff]   ;;  %v604_v31 = vrot.slane %v603_v20, 4  ;;  %v626_v41 = vrot.slane %v624_v8, 4  ;;  %v659_v8 = vshrl.u32 %v10176_v1, 16 }
  0x5e   : > { %8686 = vmatmul.mubr.bf16.gmra.mxu0 %v7712_v15  ;;  %8777 = vmatprep.subr.bf16.mxu1 %v9442_v56  ;;  %v646_v15 = vrot.slane %v644_v61, 5 }
  0x5f   : > { %8722 = vmatmul.mubr.bf16.gmra.mxu1 %v7730_v32  ;;  %8742 = vmatpush3.bf16.msra.mxu0 %v9437_v36  ;;  %v10167_v32 = vld [vmem:[%s9937_s18 + $0x68] sm:$0x1]  ;;  %v635_v36 = vshrl.u32 %v10158_v44, 16  ;;  %v609_v57 = vsel %vm9986_vm2, %v604_v31, %v608_v9  ;;  %v627_v60 = vor.u32 %v626_v41, %v622_v28  ;;  %v662_v31 = vshll.u32 %v10176_v1, 16 }
  0x60   : > { %8725 = vmatprep.mubr.bf16.mxu1 %v7731_v6  ;;  %8743 = vmatprep.subr.bf16.mxu0 %v9441_v11  ;;  %v7713_v3 = vcombine.low %v599_v51, %v609_v57  ;;  %v618_v6 = vrot.slane %v617_v52, 4  ;;  %v9447_v9 = vld [vmem:[%s13101_s1 + $0xc8] sm:$0xff]   ;;  %v654_v17 = vshll.u32 %v10167_v32, 16  ;;  %v651_v26 = vor.u32 %v650_v16, %v646_v15 }
  0x61   : > { %8778 = vmatpush3.bf16.msra.mxu1 %v9442_v56  ;;  %v637_v7 = vrot.slane %v635_v36, 4  ;;  %v628_v56 = vrot.slane %v627_v60, 4  ;;  %v661_v51 = vrot.slane %v659_v8, 4  ;;  %v668_v52 = vshll.u32 %v10179_v2, 16  ;;  %v9449_v36 = vld [vmem:[%s13101_s1 + $0xc0] sm:$0xff]  }
  0x62   : > { %8779 = vmatprep.subr.bf16.mxu1 %v9444_v30  ;;  %8689 = vmatprep.mubr.bf16.mxu0 %v7713_v3  ;;  %v623_v18 = vsel %vm9986_vm2, %v618_v6, %v622_v28  ;;  %v656_v27 = vrot.slane %v654_v17, 5  ;;  %v652_v33 = vrot.slane %v651_v26, 4  ;;  %v664_v57 = vrot.slane %v662_v31, 5  ;;  %v10218_v3 = vld [vmem:[%s13101_s1 + $0x138] sm:$0xff]  }
  0x63   : > { %8744 = vmatpush3.bf16.msra.mxu0 %v9441_v11  ;;  %v641_v20 = vor.u32 %v640_v5, %v637_v7  ;;  %v633_v11 = vsel %vm9986_vm2, %v628_v56, %v632_v43  ;;  %v672_v43 = vshrl.u32 %v10179_v2, 16  ;;  %v1139_v60 = vrot.slane %v9952_v14, 5  ;;  %v10225_v56 = vld [vmem:[%s9937_s18 + $0xc] sm:$0xf]  ;;  %v10253_v31 = vld [vmem:[%s9937_s18 + $0x18] sm:$0xf] }
  0x64   : > { %8745 = vmatprep.subr.bf16.mxu0 %v9443_v25  ;;  %v7714_v28 = vcombine.low %v623_v18, %v633_v11  ;;  %v670_v63 = vrot.slane %v668_v52, 5  ;;  %v657_v14 = vsel %vm9986_vm2, %v652_v33, %v656_v27  ;;  %v665_v6 = vor.u32 %v664_v57, %v661_v51  ;;  %v10260_v52 = vld [vmem:[%s9937_s18 + $0x1c] sm:$0xf] }
  0x65   : > { %8780 = vmatpush3.bf16.msra.mxu1 %v9444_v30  ;;  %v642_v41 = vrot.slane %v641_v20, 4  ;;  %v678_v30 = vshll.u32 %v10182_v10, 16  ;;  %v674_v7 = vrot.slane %v672_v43, 4  ;;  %v7734_v5 = vcombine.low %v10176_v1, %v10179_v2  ;;  %v10234_v20 = vld [vmem:[%s13101_s1 + $0x178] sm:$0xff]  }
  0x66   : > { %8781 = vmatprep.subr.bf16.mxu1 %v9447_v9  ;;  %8690 = vmatmul.mubr.bf16.gmra.mxu0 %v7714_v28  ;;  %v7744_v18 = vrot.slane %v9959_v19, 9  ;;  %v1143_v11 = vrot.slane %v9968_v23, 5  ;;  %v1146_v26 = vrot.slane %v9971_v24, 5  ;;  %v1738_v23 = vshll.u32 %v10225_v56, 16 }
  0x67   : > { %8726 = vmatmul.mubr.bf16.gmra.mxu1 %v7732_v29  ;;  %8746 = vmatpush3.bf16.msra.mxu0 %v9443_v25  ;;  %v647_v61 = vsel %vm9986_vm2, %v642_v41, %v646_v15  ;;  %v13150_v29 = vmov 0  ;;  %v1136_v25 = vrot.slane %v9949_v13, 5  ;;  %v10228_v15 = vld [vmem:[%s9937_s18 + $0x10] sm:$0xf]  ;;  %v680_v16 = vrot.slane %v678_v30, 5 }
  0x68   : > { %8729 = vmatprep.mubr.bf16.mxu1 %v7733_v21  ;;  %v13151_v29 = vsel %vm10210_vm5, 4294967295, %v13150_v29  ;;  %8747 = vmatprep.subr.bf16.mxu0 %v9448_v22  ;;  %v7715_v13 = vcombine.low %v647_v61, %v657_v14  ;;  %v666_v21 = vrot.slane %v665_v6, 4  ;;  %v675_v8 = vor.u32 %v674_v7, %v670_v63  ;;  %v10273_v61 = vld [vmem:[%s9937_s18 + $0x28] sm:$0xf] }
  0x69   : > { %13152 = vst [vmem:[#allocation14_spill] sm:$0xff] %v13151_v29  ;;  %8782 = vmatpush3.bf16.msra.mxu1 %v9447_v9  ;;  %v1138_v17 = vrot.slane %v1136_v25, 4  ;;  %v1137_v9 = vsel %vm10210_vm5, %v7743_v45, %v1136_v25  ;;  %v7835_v27 = vcombine.low %v10225_v56, %v10228_v15  ;;  %v1748_v24 = vshrl.u32 %v10228_v15, 16 }
  0x6a   : > { %8783 = vmatprep.subr.bf16.mxu1 %v9449_v36  ;;  %8693 = vmatprep.mubr.bf16.mxu0 %v7715_v13  ;;  %v671_v12 = vsel %vm9986_vm2, %v666_v21, %v670_v63  ;;  %v676_v45 = vrot.slane %v675_v8, 4  ;;  %v10257_v41 = vsel %vm10210_vm5, %v7744_v18, %v1143_v11  ;;  %v1145_v51 = vrot.slane %v1143_v11, 4 }
  0x6b   : > { %8748 = vmatpush3.bf16.msra.mxu0 %v9448_v22  ;;  %v1140_v19 = vsel %vm10210_vm5, %v1138_v17, %v1139_v60  ;;  %v1735_v22 = vshrl.u32 %v10225_v56, 16  ;;  %v1759_v33 = vshrl.u32 %v10253_v31, 16  ;;  %v1762_v57 = vshll.u32 %v10253_v31, 16  ;;  %v10270_v60 = vld [vmem:[%s9937_s18 + $0x24] sm:$0xf] }
  0x6c   : > { %8805 = vmatprep.subr.bf16.mxu0 %v10218_v3  ;;  %v7769_v28 = vcombine.low %v1137_v9, %v1140_v19  ;;  %v7745_v43 = vrot.slane %v9991_v47, 9  ;;  %v1150_v30 = vrot.slane %v9994_v49, 5  ;;  %v1147_v25 = vsel %vm10210_vm5, %v1145_v51, %v1146_v26  ;;  %v10291_v17 = vld [vmem:[%s9937_s18 + $0x34] sm:$0xf] }
  0x6d   : > { %8784 = vmatpush3.bf16.msra.mxu1 %v9449_v36  ;;  %v681_v36 = vsel %vm9986_vm2, %v676_v45, %v680_v16  ;;  %v1153_v14 = vrot.slane %v9997_v50, 5  ;;  %v7746_v6 = vrot.slane %v10010_v58, 9  ;;  %v7836_v7 = vcombine.low %v10253_v31, %v10260_v52  ;;  %v9458_v9 = vld [vmem:[%s13101_s1 + $0x170] sm:$0xff]  }
  0x6e   : > { %8841 = vmatprep.subr.bf16.mxu1 %v10234_v20  ;;  %v7716_v63 = vcombine.low %v671_v12, %v681_v36  ;;  %v1152_v47 = vrot.slane %v1150_v30, 4  ;;  %v1157_v49 = vrot.slane %v10013_v59, 5  ;;  %v7770_v13 = vcombine.low %v10257_v41, %v1147_v25  ;;  %v10312_v12 = vld [vmem:[%s9937_s18 + $0x40] sm:$0xf]  ;;  %v10321_v36 = vld [vmem:[%s9937_s18 + $0x48] sm:$0xf] }
  0x6f   : > { %8730 = vmatmul.mubr.bf16.gmra.mxu1 %v7734_v5  ;;  %v10283_v5 = vld [vmem:[%s9937_s18 + $0x30] sm:$0xf]  ;;  %v1772_v16 = vshrl.u32 %v10260_v52, 16  ;;  %v1151_v50 = vsel %vm10210_vm5, %v7745_v43, %v1150_v30  ;;  %v1160_v58 = vrot.slane %v10016_v0, 5  ;;  %v1783_v21 = vshrl.u32 %v10270_v60, 16 }
  0x70   : > { %8785 = vmatprep.mubr.bf16.mxu1 %v7835_v27  ;;  %8694 = vmatmul.mubr.bf16.gmra.mxu0 %v7716_v63  ;;  %v1154_v59 = vsel %vm10210_vm5, %v1152_v47, %v1153_v14  ;;  %v1159_v18 = vrot.slane %v1157_v49, 4  ;;  %v1786_v8 = vshll.u32 %v10270_v60, 16  ;;  %v10302_v0 = vsel %vm10210_vm5, %v7746_v6, %v1157_v49  ;;  %v10309_v27 = vld [vmem:[%s9937_s18 + $0x3c] sm:$0xf]  ;;  %v10324_v43 = vld [vmem:[%s9937_s18 + $0x4c] sm:$0xf] }
  0x71   : > { %8749 = vmatprep.mubr.bf16.mxu0 %v7769_v28  ;;  %v7837_v11 = vcombine.low %v10270_v60, %v10273_v61  ;;  %v1796_v26 = vshrl.u32 %v10273_v61, 16  ;;  %v1807_v19 = vshrl.u32 %v10283_v5, 16  ;;  %v7771_v45 = vcombine.low %v1151_v50, %v1154_v59  ;;  %v9453_v49 = vld [vmem:[%s13101_s1 + $0x130] sm:$0xff]   ;;  %v9462_v50 = vld [vmem:[%s13101_s1 + $0x168] sm:$0xff]  }
  0x72   : > { %v10316_v28 = vsel %vm10210_vm5, %v1159_v18, %v1160_v58  ;;  %v7747_v41 = vrot.slane %v10047_v34, 9  ;;  %v1164_v51 = vrot.slane %v10050_v35, 5  ;;  %v1167_v63 = vrot.slane %v10056_v42, 5  ;;  %v9456_v18 = vld [vmem:[%s13101_s1 + $0x128] sm:$0xff]  }
  0x73   : > { %v7748_v25 = vrot.slane %v10066_v54, 9  ;;  %v1171_v14 = vrot.slane %v10072_v62, 5  ;;  %v7772_v6 = vcombine.low %v10302_v0, %v10316_v28  ;;  %v7838_v34 = vcombine.low %v10283_v5, %v10291_v17  ;;  %v10445_v28 = vld [vmem:[%s9937_s18 + $0x6c] sm:$0xf] }
  0x74   : > { %v1166_v47 = vrot.slane %v1164_v51, 4  ;;  %v10341_v42 = vsel %vm10210_vm5, %v7747_v41, %v1164_v51  ;;  %v1174_v62 = vrot.slane %v10077_v4, 5  ;;  %v7840_v41 = vcombine.low %v10321_v36, %v10324_v43  ;;  %v10404_v4 = vld [vmem:[%s9937_s18 + $0x64] sm:$0xf] }
  0x75   : > { %v1173_v54 = vrot.slane %v1171_v14, 4  ;;  %v1195_v59 = vrot.slane %v10167_v32, 5  ;;  %v1199_v32 = vrot.slane %v10179_v2, 5  ;;  %v1202_v0 = vrot.slane %v10182_v10, 5  ;;  %v9470_v2 = vld [vmem:[%s13101_s1 + $0x150] sm:$0xff]  }
  0x76   : > { %v10351_v58 = vsel %vm10210_vm5, %v1166_v47, %v1167_v63  ;;  %v1178_v47 = vrot.slane %v10108_v38, 5  ;;  %v9464_v38 = vld [vmem:[%s13101_s1 + $0x160] sm:$0xff]   ;;  %v1774_v35 = vrot.slane %v1772_v16, 4  ;;  %v7887_v30 = vrot.slane %v10225_v56, 9 }
  0x77   : > { %8786 = vmatmul.mubr.bf16.vlgmr.msra.gmra.mxu1 %v7836_v7  ;;  %v7839_v7 = vcombine.low %v10309_v27, %v10312_v12  ;;  %v7773_v51 = vcombine.low %v10341_v42, %v10351_v58  ;;  %v10379_v63 = vsel %vm10210_vm5, %v1173_v54, %v1174_v62  ;;  %v1188_v42 = vrot.slane %v10128_v55, 5  ;;  %v10396_v62 = vld [vmem:[%s9937_s18 + $0x60] sm:$0xf]  ;;  %v10470_v54 = vld [vmem:[%s9937_s18 + $0x7c] sm:$0xf] }
  0x78   : > { %8789 = vmatprep.mubr.bf16.mxu1 %v7837_v11  ;;  %8842 = vmatpush3.bf16.msra.mxu1 %v10234_v20  ;;  %v10355_v20 = vsel %vm10210_vm5, %v7748_v25, %v1171_v14  ;;  %v10368_v25 = vld [vmem:[%s9937_s18 + $0x54] sm:$0xf]  ;;  %v7749_v14 = vrot.slane %v10105_v37, 9  ;;  %v1181_v11 = vrot.slane %v10111_v40, 5  ;;  %v10384_v37 = vld [vmem:[%s9937_s18 + $0x58] sm:$0xf] }
  0x79   : > { %8843 = vmatprep.subr.bf16.mxu1 %v9458_v9  ;;  %8750 = vmatmul.mubr.bf16.vlgmr.msra.gmra.mxu0 %v7770_v13  ;;  %v7774_v55 = vcombine.low %v10355_v20, %v10379_v63  ;;  %v7794_v58 = vld [vmem:[%s9937_s18 + $0x20] sm:$0x1]  ;;  %v2224_v16 = vrot.slane %v10228_v15, 5  ;;  %v9469_v20 = vld [vmem:[%s13101_s1 + $0x108] sm:$0xff]  }
  0x7a   : > { %8806 = vmatpush3.bf16.msra.mxu0 %v10218_v3  ;;  %8753 = vmatprep.mubr.bf16.mxu0 %v7771_v45  ;;  %v7750_v3 = vrot.slane %v10120_v46, 9  ;;  %v1185_v45 = vrot.slane %v10123_v48, 5  ;;  %v10391_v40 = vsel %vm10210_vm5, %v7749_v14, %v1178_v47  ;;  %v9459_v46 = vld [vmem:[%s13101_s1 + $0x120] sm:$0xff]  }
  0x7b   : > { %8807 = vmatprep.subr.bf16.mxu0 %v9453_v49  ;;  %v9475_v63 = vld [vmem:[%s13101_s1 + $0x140] sm:$0xff]  }
  0x7c   : > { %8844 = vmatpush3.bf16.msra.mxu1 %v9458_v9  ;;  %v1180_v9 = vrot.slane %v1178_v47, 4  ;;  %v1187_v48 = vrot.slane %v1185_v45, 4  ;;  %v10417_v13 = vsel %vm10210_vm5, %v7750_v3, %v1185_v45  ;;  %v9463_v3 = vld [vmem:[%s13101_s1 + $0x118] sm:$0xff]   ;;  %v10448_v45 = vld [vmem:[%s9937_s18 + $0x70] sm:$0xf] }
  0x7d   : > { %8845 = vmatprep.subr.bf16.mxu1 %v9462_v50 }
  0x7e   : > { %8808 = vmatpush3.bf16.msra.mxu0 %v9453_v49  ;;  %v10411_v47 = vsel %vm10210_vm5, %v1180_v9, %v1181_v11  ;;  %v7842_v49 = vcombine.low %v10396_v62, %v10404_v4  ;;  %v7751_v9 = vrot.slane %v10158_v44, 9  ;;  %v9468_v44 = vld [vmem:[%s13101_s1 + $0x158] sm:$0xff]  }
  0x7f   : > { %8790 = vmatmul.mubr.bf16.gmra.mxu1 %v7838_v34  ;;  %8809 = vmatprep.subr.bf16.mxu0 %v9456_v18  ;;  %v7841_v34 = vcombine.low %v10368_v25, %v10384_v37  ;;  %v7775_v11 = vcombine.low %v10391_v40, %v10411_v47 }
  0x80   : > { %8793 = vmatprep.mubr.bf16.mxu1 %v7839_v7  ;;  %8846 = vmatpush3.bf16.msra.mxu1 %v9462_v50  ;;  %v1192_v7 = vrot.slane %v10164_v53, 5  ;;  %v10436_v50 = vsel %vm10210_vm5, %v1187_v48, %v1188_v42  ;;  %v7752_v53 = vrot.slane %v10176_v1, 9  ;;  %v1737_v1 = vrot.slane %v1735_v22, 4  ;;  %v10467_v48 = vld [vmem:[%s9937_s18 + $0x78] sm:$0xf] }
  0x81   : > { %8754 = vmatmul.mubr.bf16.gmra.mxu0 %v7772_v6  ;;  %8847 = vmatprep.subr.bf16.mxu1 %v9464_v38  ;;  %v7776_v22 = vcombine.low %v10417_v13, %v10436_v50  ;;  %v7843_v42 = vcombine.low %v10445_v28, %v10448_v45  ;;  %v10589_v13 = vld [vmem:[%s13101_s1 + $0x1b8] sm:$0xff]  }
  0x82   : > { %8810 = vmatpush3.bf16.msra.mxu0 %v9456_v18  ;;  %8757 = vmatprep.mubr.bf16.mxu0 %v7773_v51  ;;  %v1194_v6 = vrot.slane %v1192_v7, 4  ;;  %v10459_v10 = vsel %vm10210_vm5, %v7751_v9, %v1192_v7  ;;  %v10463_v18 = vsel %vm10210_vm5, %v7752_v53, %v1199_v32  ;;  %v1201_v51 = vrot.slane %v1199_v32, 4  ;;  %v9466_v32 = vld [vmem:[%s13101_s1 + $0x110] sm:$0xff]  }
  0x83   : > { %8811 = vmatprep.subr.bf16.mxu0 %v9459_v46  ;;  %v7791_v7 = vld [vmem:[%s9937_s18 + $0x14] sm:$0x1] }
  0x84   : > { %8848 = vmatpush3.bf16.msra.mxu1 %v9464_v38  ;;  %v10476_v9 = vsel %vm10210_vm5, %v1194_v6, %v1195_v59  ;;  %v10485_v38 = vsel %vm10210_vm5, %v1201_v51, %v1202_v0  ;;  %v1740_v6 = vrot.slane %v1738_v23, 5  ;;  %v9473_v23 = vld [vmem:[%s13101_s1 + $0x148] sm:$0xff]   ;;  %v1744_v59 = vshll.u32 %v10228_v15, 16 }
  0x85   : > { %8849 = vmatprep.subr.bf16.mxu1 %v9468_v44  ;;  %v7777_v53 = vcombine.low %v10459_v10, %v10476_v9  ;;  %v1754_v14 = vshll.u32 %v7791_v7, 16  ;;  %v1761_v0 = vrot.slane %v1759_v33, 4  ;;  %v1764_v51 = vrot.slane %v1762_v57, 5 }
  0x86   : > { %8812 = vmatpush3.bf16.msra.mxu0 %v9459_v46  ;;  %v1741_v46 = vor.u32 %v1740_v6, %v1737_v1  ;;  %v1746_v1 = vrot.slane %v1744_v59, 5  ;;  %v2227_v47 = vrot.slane %v7791_v7, 5  ;;  %v10534_v15 = vsel %vm10210_vm5, %v7887_v30, %v2224_v16  ;;  %v10537_v59 = vld [vmem:[%s9937_s18 + $0x2c] sm:$0x1] }
  0x87   : > { %8794 = vmatmul.mubr.bf16.gmra.mxu1 %v7840_v41  ;;  %8813 = vmatprep.subr.bf16.mxu0 %v9463_v3  ;;  %v1750_v41 = vrot.slane %v1748_v24, 4  ;;  %v1756_v6 = vrot.slane %v1754_v14, 5  ;;  %v1765_v33 = vor.u32 %v1764_v51, %v1761_v0  ;;  %v7888_v51 = vrot.slane %v10253_v31, 9  ;;  %v9474_v31 = vld [vmem:[%s13101_s1 + $0x100] sm:$0xff]  }
  0x88   : > { %8797 = vmatprep.mubr.bf16.mxu1 %v7841_v34  ;;  %8850 = vmatpush3.bf16.msra.mxu1 %v9468_v44  ;;  %v1768_v34 = vshll.u32 %v10260_v52, 16  ;;  %v1742_v24 = vrot.slane %v1741_v46, 4  ;;  %v1778_v44 = vshll.u32 %v7794_v58, 16  ;;  %v2231_v46 = vrot.slane %v10260_v52, 5 }
  0x89   : > { %8758 = vmatmul.mubr.bf16.gmra.mxu0 %v7774_v55  ;;  %8851 = vmatprep.subr.bf16.mxu1 %v9470_v2  ;;  %v1751_v14 = vor.u32 %v1750_v41, %v1746_v1  ;;  %v1785_v7 = vrot.slane %v1783_v21, 4  ;;  %v1816_v9 = vshll.u32 %v10291_v17, 16 }
  0x8a   : > { %8814 = vmatpush3.bf16.msra.mxu0 %v9463_v3  ;;  %8761 = vmatprep.mubr.bf16.mxu0 %v7775_v11  ;;  %v1770_v57 = vrot.slane %v1768_v34, 5  ;;  %v1747_v40 = vsel %vm9986_vm2, %v1742_v24, %v1746_v1  ;;  %v1780_v55 = vrot.slane %v1778_v44, 5  ;;  %v1766_v11 = vrot.slane %v1765_v33, 4  ;;  %v10568_v1 = vld [vmem:[%s13101_s1 + $0x1f8] sm:$0xff]  }
  0x8b   : > { %8815 = vmatprep.subr.bf16.mxu0 %v9466_v32  ;;  %v2226_v3 = vrot.slane %v2224_v16, 4  ;;  %v1752_v0 = vrot.slane %v1751_v14, 4  ;;  %v2234_v34 = vrot.slane %v7794_v58, 5  ;;  %v1792_v24 = vshll.u32 %v10273_v61, 16  ;;  %v7800_v33 = vld [vmem:[%s9937_s18 + $0x38] sm:$0x1] }
  0x8c   : > { %8852 = vmatpush3.bf16.msra.mxu1 %v9470_v2  ;;  %v1775_v56 = vor.u32 %v1774_v35, %v1770_v57  ;;  %v1771_v35 = vsel %vm9986_vm2, %v1766_v11, %v1770_v57  ;;  %v1802_v44 = vshll.u32 %v10537_v59, 16  ;;  %v7889_v11 = vrot.slane %v10270_v60, 9 }
  0x8d   : > { %8853 = vmatprep.subr.bf16.mxu1 %v9473_v23  ;;  %v2228_v2 = vsel %vm10210_vm5, %v2226_v3, %v2227_v47  ;;  %v1757_v52 = vsel %vm9986_vm2, %v1752_v0, %v1756_v6  ;;  %v1794_v57 = vrot.slane %v1792_v24, 5  ;;  %v1826_v47 = vshll.u32 %v7800_v33, 16  ;;  %v10629_v24 = vld [vmem:[%s9937_s18 + $0x50] sm:$0x1] }
  0x8e   : > { %8816 = vmatpush3.bf16.msra.mxu0 %v9466_v32  ;;  %v1776_v30 = vrot.slane %v1775_v56, 4  ;;  %v7913_v58 = vcombine.low %v10534_v15, %v2228_v2  ;;  %v2233_v32 = vrot.slane %v2231_v46, 4  ;;  %v7869_v41 = vcombine.low %v1747_v40, %v1757_v52 }
  0x8f   : > { %8798 = vmatmul.mubr.bf16.gmra.mxu1 %v7842_v49  ;;  %8817 = vmatprep.subr.bf16.mxu0 %v9469_v20  ;;  %v10558_v49 = vsel %vm10210_vm5, %v7888_v51, %v2231_v46  ;;  %v1804_v16 = vrot.slane %v1802_v44, 5  ;;  %v13153_v40 = vshll.u32 %v10283_v5, 16  ;;  %v1818_v15 = vrot.slane %v1816_v9, 5 }
  0x90   : > { %8801 = vmatprep.mubr.bf16.mxu1 %v7843_v42  ;;  %8854 = vmatpush3.bf16.msra.mxu1 %v9473_v23  ;;  %v1781_v21 = vsel %vm9986_vm2, %v1776_v30, %v1780_v55  ;;  %v1788_v42 = vrot.slane %v1786_v8, 5  ;;  %v10577_v6 = vsel %vm10210_vm5, %v2233_v32, %v2234_v34  ;;  %v1798_v8 = vrot.slane %v1796_v26, 4 }
  0x91   : > { %8762 = vmatmul.mubr.bf16.gmra.mxu0 %v7776_v22  ;;  %8855 = vmatprep.subr.bf16.mxu1 %v9475_v63  ;;  %v10573_v23 = vcombine.low %v1771_v35, %v1781_v21  ;;  %v7914_v50 = vcombine.low %v10558_v49, %v10577_v6  ;;  %v1809_v26 = vrot.slane %v1807_v19, 4  ;;  %v1812_v10 = vrot.slane %v13153_v40, 5  ;;  %v9480_v40 = vld [vmem:[%s13101_s1 + $0x1f0] sm:$0xff]  }
  0x92   : > { %8765 = vmatprep.mubr.bf16.mxu0 %v7777_v53  ;;  %8818 = vmatpush3.bf16.msra.mxu0 %v9469_v20  ;;  %v1789_v22 = vor.u32 %v1788_v42, %v1785_v7  ;;  %v13154_v53 = vshrl.u32 %v10291_v17, 16  ;;  %v1799_v55 = vor.u32 %v1798_v8, %v1794_v57  ;;  %v2238_v19 = vrot.slane %v10273_v61, 5 }
  0x93   : > { %8819 = vmatprep.subr.bf16.mxu0 %v9474_v31  ;;  %v1813_v56 = vor.u32 %v1812_v10, %v1809_v26  ;;  %v2241_v3 = vrot.slane %v10537_v59, 5  ;;  %v13155_v0 = vcombine.low %v10467_v48, %v10470_v54  ;;  %v1828_v46 = vrot.slane %v1826_v47, 5 }
  0x94   : > { %v1822_v20 = vrot.slane %v13154_v53, 4  ;;  %8856 = vmatpush3.bf16.msra.mxu1 %v9475_v63  ;;  %v1790_v14 = vrot.slane %v1789_v22, 4  ;;  %v1800_v51 = vrot.slane %v1799_v55, 4  ;;  %v7890_v60 = vrot.slane %v10283_v5, 9 }
  0x95   : > { %8913 = vmatprep.subr.bf16.mxu1 %v10568_v1  ;;  %v1814_v61 = vrot.slane %v1813_v56, 4  ;;  %v2239_v34 = vsel %vm10210_vm5, %v7889_v11, %v2238_v19  ;;  %v2240_v35 = vrot.slane %v2238_v19, 4  ;;  %v2245_v2 = vrot.slane %v10291_v17, 5 }
  0x96   : > { %8820 = vmatpush3.bf16.msra.mxu0 %v9474_v31  ;;  %v1795_v63 = vsel %vm9986_vm2, %v1790_v14, %v1794_v57  ;;  %v1823_v59 = vor.u32 %v1822_v20, %v1818_v15  ;;  %v1805_v30 = vsel %vm9986_vm2, %v1800_v51, %v1804_v16  ;;  %v2248_v7 = vrot.slane %v7800_v33, 5  ;;  %v10617_v31 = vld [vmem:[%s9937_s18 + $0x44] sm:$0x1] }
  0x97   : > { %8802 = vmatmul.mubr.bf16.gmra.mxu1 %v13155_v0  ;;  %8877 = vmatprep.subr.bf16.mxu0 %v10589_v13  ;;  %v13156_v5 = vshrl.u32 %v10309_v27, 16  ;;  %v7871_v49 = vcombine.low %v1795_v63, %v1805_v30  ;;  %v1819_v32 = vsel %vm9986_vm2, %v1814_v61, %v1818_v15  ;;  %v2242_v42 = vsel %vm10210_vm5, %v2240_v35, %v2241_v3  ;;  %v9477_v63 = vld [vmem:[%s13101_s1 + $0x1b0] sm:$0xff]   ;;  %v9482_v30 = vld [vmem:[%s13101_s1 + $0x1e8] sm:$0xff]  }
  0x98   : > { %8857 = vmatprep.mubr.bf16.mxu1 %v7913_v58  ;;  %v13157_v58 = vcombine.low %v10463_v18, %v10485_v38  ;;  %v1824_v21 = vrot.slane %v1823_v59, 4  ;;  %v7915_v17 = vcombine.low %v2239_v34, %v2242_v42  ;;  %v10633_v6 = vsel %vm10210_vm5, %v7890_v60, %v2245_v2 }
  0x99   : > { %v1833_v52 = vrot.slane %v13156_v5, 4  ;;  %v2247_v8 = vrot.slane %v2245_v2, 4  ;;  %v13158_v18 = vshll.u32 %v10309_v27, 16  ;;  %v1840_v33 = vshll.u32 %v10312_v12, 16 }
  0x9a   : > { %8766 = vmatmul.mubr.bf16.gmra.mxu0 %v13157_v58  ;;  %v1829_v44 = vsel %vm9986_vm2, %v1824_v21, %v1828_v46  ;;  %v13159_v22 = vshrl.u32 %v10312_v12, 16  ;;  %v1850_v26 = vshll.u32 %v10617_v31, 16  ;;  %v13160_v9 = vshrl.u32 %v10321_v36, 16 }
  0x9b   : > { %8821 = vmatprep.mubr.bf16.mxu0 %v7869_v41  ;;  %v1836_v38 = vrot.slane %v13158_v18, 5  ;;  %v10643_v41 = vcombine.low %v1819_v32, %v1829_v44  ;;  %v2249_v16 = vsel %vm10210_vm5, %v2247_v8, %v2248_v7  ;;  %v1842_v14 = vrot.slane %v1840_v33, 5  ;;  %v10675_v7 = vld [vmem:[%s9937_s18 + $0x5c] sm:$0x1]  ;;  %v9484_v8 = vld [vmem:[%s13101_s1 + $0x1e0] sm:$0xff]  }
  0x9c   : > { %v1846_v57 = vrot.slane %v13159_v22, 4  ;;  %v1857_v53 = vrot.slane %v13160_v9, 4  ;;  %v7916_v20 = vcombine.low %v10633_v6, %v2249_v16  ;;  %v1852_v55 = vrot.slane %v1850_v26, 5  ;;  %v10706_v16 = vld [vmem:[%s9937_s18 + $0x68] sm:$0x1] }
  0x9d   : > { %v1837_v10 = vor.u32 %v1836_v38, %v1833_v52  ;;  %v13161_v47 = vshll.u32 %v10321_v36, 16  ;;  %v1864_v15 = vshll.u32 %v10324_v43, 16  ;;  %v13162_v19 = vshrl.u32 %v10324_v43, 16 }
  0x9e   : > { %v1874_v0 = vshll.u32 %v10629_v24, 16  ;;  %v1847_v51 = vor.u32 %v1846_v57, %v1842_v14  ;;  %v2252_v60 = vrot.slane %v10312_v12, 5  ;;  %v2255_v35 = vrot.slane %v10617_v31, 5 }
  0x9f   : > { %v1860_v11 = vrot.slane %v13161_v47, 5  ;;  %8858 = vmatmul.mubr.bf16.vlgmr.msra.gmra.mxu1 %v7914_v50  ;;  %v1838_v56 = vrot.slane %v1837_v10, 4  ;;  %v1870_v3 = vrot.slane %v13162_v19, 4  ;;  %v7891_v50 = vrot.slane %v10309_v27, 9 }
  0xa0   : > { %8861 = vmatprep.mubr.bf16.mxu1 %v7915_v17  ;;  %8914 = vmatpush3.bf16.msra.mxu1 %v10568_v1  ;;  %v1866_v59 = vrot.slane %v1864_v15, 5  ;;  %v1876_v34 = vrot.slane %v1874_v0, 5  ;;  %v1848_v1 = vrot.slane %v1847_v51, 4  ;;  %v2254_v12 = vrot.slane %v2252_v60, 4 }
  0xa1   : > { %v1861_v46 = vor.u32 %v1860_v11, %v1857_v53  ;;  %8915 = vmatprep.subr.bf16.mxu1 %v9480_v40  ;;  %v1843_v61 = vsel %vm9986_vm2, %v1838_v56, %v1842_v14  ;;  %v2253_v27 = vsel %vm10210_vm5, %v7891_v50, %v2252_v60  ;;  %v7892_v31 = vrot.slane %v10321_v36, 9  ;;  %v9481_v14 = vld [vmem:[%s13101_s1 + $0x1a0] sm:$0xff]   ;;  %v9486_v60 = vld [vmem:[%s13101_s1 + $0x1d8] sm:$0xff]  }
  0xa2   : > { %8822 = vmatmul.mubr.bf16.vlgmr.msra.gmra.mxu0 %v10573_v23  ;;  %v1871_v5 = vor.u32 %v1870_v3, %v1866_v59  ;;  %v2259_v52 = vrot.slane %v10324_v43, 5  ;;  %v2262_v58 = vrot.slane %v10629_v24, 5  ;;  %v9478_v23 = vld [vmem:[%s13101_s1 + $0x1a8] sm:$0xff]   ;;  %v1853_v32 = vsel %vm9986_vm2, %v1848_v1, %v1852_v55 }
  0xa3   : > { %v1862_v2 = vrot.slane %v1861_v46, 4  ;;  %8878 = vmatpush3.bf16.msra.mxu0 %v10589_v13  ;;  %8825 = vmatprep.mubr.bf16.mxu0 %v7871_v49  ;;  %v2256_v49 = vsel %vm10210_vm5, %v2254_v12, %v2255_v35  ;;  %v13163_v36 = vshrl.u32 %v10368_v25, 16  ;;  %v7873_v21 = vcombine.low %v1843_v61, %v1853_v32  ;;  %v9483_v35 = vld [vmem:[%s13101_s1 + $0x198] sm:$0xff]  }
  0xa4   : > { %8879 = vmatprep.subr.bf16.mxu0 %v9477_v63  ;;  %8916 = vmatpush3.bf16.msra.mxu1 %v9480_v40  ;;  %v1872_v42 = vrot.slane %v1871_v5, 4  ;;  %v7917_v24 = vcombine.low %v2253_v27, %v2256_v49  ;;  %v2260_v17 = vsel %vm10210_vm5, %v7892_v31, %v2259_v52  ;;  %v2261_v6 = vrot.slane %v2259_v52, 4 }
  0xa5   : > { %v1867_v13 = vsel %vm9986_vm2, %v1862_v2, %v1866_v59  ;;  %v1881_v43 = vrot.slane %v13163_v36, 4  ;;  %8917 = vmatprep.subr.bf16.mxu1 %v9482_v30  ;;  %v13164_v18 = vshll.u32 %v10368_v25, 16  ;;  %v1888_v44 = vshll.u32 %v10384_v37, 16  ;;  %v9485_v36 = vld [vmem:[%s13101_s1 + $0x190] sm:$0xff]  }
  0xa6   : > { %v13165_v33 = vshrl.u32 %v10384_v37, 16  ;;  %v1877_v57 = vsel %vm9986_vm2, %v1872_v42, %v1876_v34  ;;  %v1898_v26 = vshll.u32 %v10675_v7, 16  ;;  %v13166_v40 = vshrl.u32 %v10396_v62, 16 }
  0xa7   : > { %v1884_v38 = vrot.slane %v13164_v18, 5  ;;  %8880 = vmatpush3.bf16.msra.mxu0 %v9477_v63  ;;  %8862 = vmatmul.mubr.bf16.gmra.mxu1 %v7916_v20  ;;  %v13167_v9 = vshll.u32 %v10396_v62, 16  ;;  %v7874_v55 = vcombine.low %v1867_v13, %v1877_v57  ;;  %v2263_v20 = vsel %vm10210_vm5, %v2261_v6, %v2262_v58 }
  0xa8   : > { %v1894_v22 = vrot.slane %v13165_v33, 4  ;;  %v1905_v10 = vrot.slane %v13166_v40, 4  ;;  %8881 = vmatprep.subr.bf16.mxu0 %v9478_v23  ;;  %8865 = vmatprep.mubr.bf16.mxu1 %v7917_v24  ;;  %v1890_v11 = vrot.slane %v1888_v44, 5  ;;  %v7918_v56 = vcombine.low %v2260_v17, %v2263_v20 }
  0xa9   : > { %v1908_v53 = vrot.slane %v13167_v9, 5  ;;  %v1885_v47 = vor.u32 %v1884_v38, %v1881_v43  ;;  %8918 = vmatpush3.bf16.msra.mxu1 %v9482_v30  ;;  %v1900_v15 = vrot.slane %v1898_v26, 5  ;;  %v1912_v3 = vshll.u32 %v10404_v4, 16  ;;  %v9489_v9 = vld [vmem:[%s13101_s1 + $0x1c8] sm:$0xff]  }
  0xaa   : > { %8826 = vmatmul.mubr.bf16.gmra.mxu0 %v10643_v41  ;;  %8919 = vmatprep.subr.bf16.mxu1 %v9484_v8  ;;  %v1895_v63 = vor.u32 %v1894_v22, %v1890_v11  ;;  %v13168_v51 = vshrl.u32 %v10404_v4, 16  ;;  %v1922_v50 = vshll.u32 %v10706_v16, 16  ;;  %v7893_v34 = vrot.slane %v10368_v25, 9  ;;  %v10766_v22 = vld [vmem:[%s9937_s18 + $0x80] sm:$0x1] }
  0xab   : > { %v1909_v19 = vor.u32 %v1908_v53, %v1905_v10  ;;  %v1886_v0 = vrot.slane %v1885_v47, 4  ;;  %8882 = vmatpush3.bf16.msra.mxu0 %v9478_v23  ;;  %8829 = vmatprep.mubr.bf16.mxu0 %v7873_v21  ;;  %v1914_v59 = vrot.slane %v1912_v3, 5  ;;  %v2266_v41 = vrot.slane %v10384_v37, 5 }
  0xac   : > { %v1918_v46 = vrot.slane %v13168_v51, 4  ;;  %8883 = vmatprep.subr.bf16.mxu0 %v9481_v14  ;;  %v1896_v1 = vrot.slane %v1895_v63, 4  ;;  %v1924_v2 = vrot.slane %v1922_v50, 5  ;;  %v2269_v27 = vrot.slane %v10675_v7, 5  ;;  %v10743_v7 = vld [vmem:[%s9937_s18 + $0x74] sm:$0x1] }
  0xad   : > { %v1910_v61 = vrot.slane %v1909_v19, 4  ;;  %v1891_v30 = vsel %vm9986_vm2, %v1886_v0, %v1890_v11  ;;  %8920 = vmatpush3.bf16.msra.mxu1 %v9484_v8  ;;  %v2267_v37 = vsel %vm10210_vm5, %v7893_v34, %v2266_v41  ;;  %v2268_v5 = vrot.slane %v2266_v41, 4  ;;  %v9487_v11 = vld [vmem:[%s13101_s1 + $0x188] sm:$0xff]   ;;  %v9491_v41 = vld [vmem:[%s13101_s1 + $0x1c0] sm:$0xff]  }
  0xae   : > { %v1919_v25 = vor.u32 %v1918_v46, %v1914_v59  ;;  %v1901_v31 = vsel %vm9986_vm2, %v1896_v1, %v1900_v15  ;;  %v7894_v52 = vrot.slane %v10396_v62, 9  ;;  %v2273_v58 = vrot.slane %v10404_v4, 5  ;;  %8921 = vmatprep.subr.bf16.mxu1 %v9486_v60  ;;  %v9488_v4 = vld [vmem:[%s13101_s1 + $0x1d0] sm:$0xff]  }
  0xaf   : > { %v1915_v12 = vsel %vm9986_vm2, %v1910_v61, %v1914_v59  ;;  %v2276_v23 = vrot.slane %v10706_v16, 5  ;;  %8884 = vmatpush3.bf16.msra.mxu0 %v9481_v14  ;;  %8866 = vmatmul.mubr.bf16.gmra.mxu1 %v7918_v56  ;;  %v7875_v32 = vcombine.low %v1891_v30, %v1901_v31  ;;  %v2270_v49 = vsel %vm10210_vm5, %v2268_v5, %v2269_v27  ;;  %v10796_v30 = vld [vmem:[%s9937_s18 + $0x1c] sm:$0xf] }
  0xb0   : > { %v1920_v13 = vrot.slane %v1919_v25, 4  ;;  %v13169_v62 = vshrl.u32 %v10445_v28, 16  ;;  %8885 = vmatprep.subr.bf16.mxu0 %v9483_v35  ;;  %v7919_v21 = vcombine.low %v2267_v37, %v2270_v49  ;;  %v2274_v42 = vsel %vm10210_vm5, %v7894_v52, %v2273_v58  ;;  %v10820_v49 = vld [vmem:[%s9937_s18 + $0x28] sm:$0xf] }
  0xb1   : > { %v2275_v24 = vrot.slane %v2273_v58, 4  ;;  %v13170_v17 = vshll.u32 %v10445_v28, 16  ;;  %8922 = vmatpush3.bf16.msra.mxu1 %v9486_v60  ;;  %v1936_v18 = vshll.u32 %v10448_v45, 16  ;;  %v13171_v38 = vshrl.u32 %v10448_v45, 16  ;;  %v9490_v58 = vld [vmem:[%s13101_s1 + $0x180] sm:$0xff]  }
  0xb2   : > { %v1929_v43 = vrot.slane %v13169_v62, 4  ;;  %v1925_v8 = vsel %vm9986_vm2, %v1920_v13, %v1924_v2  ;;  %v1946_v33 = vshll.u32 %v10743_v7, 16  ;;  %8830 = vmatmul.mubr.bf16.gmra.mxu0 %v7874_v55  ;;  %8869 = vmatprep.mubr.bf16.mxu1 %v7919_v21  ;;  %v13172_v40 = vshrl.u32 %v10467_v48, 16 }
  0xb3   : > { %v1932_v6 = vrot.slane %v13170_v17, 5  ;;  %v1942_v44 = vrot.slane %v13171_v38, 4  ;;  %v7876_v57 = vcombine.low %v1915_v12, %v1925_v8  ;;  %v2277_v26 = vsel %vm10210_vm5, %v2275_v24, %v2276_v23  ;;  %8886 = vmatpush3.bf16.msra.mxu0 %v9483_v35  ;;  %8833 = vmatprep.mubr.bf16.mxu0 %v7875_v32  ;;  %v10793_v35 = vld [vmem:[%s9937_s18 + $0x18] sm:$0xf] }
  0xb4   : > { %v1953_v10 = vrot.slane %v13172_v40, 4  ;;  %v7920_v53 = vcombine.low %v2274_v42, %v2277_v26  ;;  %v1938_v14 = vrot.slane %v1936_v18, 5  ;;  %v1948_v20 = vrot.slane %v1946_v33, 5  ;;  %8887 = vmatprep.subr.bf16.mxu0 %v9485_v36  ;;  %8923 = vmatprep.subr.bf16.mxu1 %v9488_v4  ;;  %v10840_v18 = vld [vmem:[%s9937_s18 + $0x2c] sm:$0x1] }
  0xb5   : > { %v1933_v16 = vor.u32 %v1932_v6, %v1929_v43  ;;  %v13173_v55 = vshll.u32 %v10467_v48, 16  ;;  %v1960_v15 = vshll.u32 %v10470_v54, 16  ;;  %v13174_v19 = vshrl.u32 %v10470_v54, 16  ;;  %8924 = vmatpush3.bf16.msra.mxu1 %v9488_v4  ;;  %v10828_v4 = vld [vmem:[%s9937_s18 + $0x20] sm:$0x1] }
  0xb6   : > { %v1970_v0 = vshll.u32 %v10766_v22, 16  ;;  %v1943_v63 = vor.u32 %v1942_v44, %v1938_v14  ;;  %v7895_v46 = vrot.slane %v10445_v28, 9  ;;  %v2280_v50 = vrot.slane %v10448_v45, 5  ;;  %8925 = vmatprep.subr.bf16.mxu1 %v9489_v9 }
  0xb7   : > { %v1956_v47 = vrot.slane %v13173_v55, 5  ;;  %v1934_v56 = vrot.slane %v1933_v16, 4  ;;  %v1966_v3 = vrot.slane %v13174_v19, 4  ;;  %v1962_v61 = vrot.slane %v1960_v15, 5  ;;  %8870 = vmatmul.mubr.bf16.gmra.mxu1 %v7920_v53  ;;  %8888 = vmatpush3.bf16.msra.mxu0 %v9485_v36  ;;  %v10825_v36 = vld [vmem:[%s13101_s1 + $0x238] sm:$0xff]  }
  0xb8   : > { %v1972_v59 = vrot.slane %v1970_v0, 5  ;;  %v2283_v34 = vrot.slane %v10743_v7, 5  ;;  %v1944_v28 = vrot.slane %v1943_v63, 4  ;;  %v2281_v1 = vsel %vm10210_vm5, %v7895_v46, %v2280_v50  ;;  %8889 = vmatprep.subr.bf16.mxu0 %v9487_v11  ;;  %v10854_v15 = vld [vmem:[%s9937_s18 + $0x34] sm:$0xf] }
  0xb9   : > { %v1957_v51 = vor.u32 %v1956_v47, %v1953_v10  ;;  %v1939_v60 = vsel %vm9986_vm2, %v1934_v56, %v1938_v14  ;;  %v2282_v2 = vrot.slane %v2280_v50, 4  ;;  %v1967_v27 = vor.u32 %v1966_v3, %v1962_v61  ;;  %8926 = vmatpush3.bf16.msra.mxu1 %v9489_v9  ;;  %v10862_v46 = vld [vmem:[%s9937_s18 + $0x40] sm:$0xf] }
  0xba   : > { %v7896_v12 = vrot.slane %v10467_v48, 9  ;;  %v2287_v25 = vrot.slane %v10470_v54, 5  ;;  %v2290_v37 = vrot.slane %v10766_v22, 5  ;;  %v1949_v5 = vsel %vm9986_vm2, %v1944_v28, %v1948_v20  ;;  %v10815_v48 = vld [vmem:[%s9937_s18 + $0x24] sm:$0xf]  ;;  %8834 = vmatmul.mubr.bf16.gmra.mxu0 %v7876_v57  ;;  %8927 = vmatprep.subr.bf16.mxu1 %v9491_v41 }
  0xbb   : > { %v1958_v45 = vrot.slane %v1957_v51, 4  ;;  %v2284_v52 = vsel %vm10210_vm5, %v2282_v2, %v2283_v34  ;;  %v7979_v54 = vcombine.low %v10793_v35, %v10796_v30  ;;  %v7877_v23 = vcombine.low %v1939_v60, %v1949_v5  ;;  %8890 = vmatpush3.bf16.msra.mxu0 %v9487_v11  ;;  %v10849_v20 = vld [vmem:[%s9937_s18 + $0x30] sm:$0xf]  ;;  %v10859_v51 = vld [vmem:[%s9937_s18 + $0x3c] sm:$0xf] }
  0xbc   : > { %v1968_v7 = vrot.slane %v1967_v27, 4  ;;  %v7921_v32 = vcombine.low %v2281_v1, %v2284_v52  ;;  %v2288_v13 = vsel %vm10210_vm5, %v7896_v12, %v2287_v25  ;;  %v2289_v62 = vrot.slane %v2287_v25, 4  ;;  %8891 = vmatprep.subr.bf16.mxu0 %v9490_v58  ;;  %v10866_v34 = vld [vmem:[%s9937_s18 + $0x38] sm:$0x1] }
  0xbd   : > { %v1963_v31 = vsel %vm9986_vm2, %v1958_v45, %v1962_v61  ;;  %v2823_v43 = vshrl.u32 %v10793_v35, 16  ;;  %v2826_v21 = vshll.u32 %v10793_v35, 16  ;;  %v2836_v42 = vshrl.u32 %v10796_v30, 16  ;;  %8837 = vmatprep.mubr.bf16.mxu0 %v7877_v23  ;;  %8928 = vmatpush3.bf16.msra.mxu1 %v9491_v41  ;;  %v9495_v23 = vld [vmem:[%s13101_s1 + $0x230] sm:$0xff]  }
  0xbe   : > { %v1973_v24 = vsel %vm9986_vm2, %v1968_v7, %v1972_v59  ;;  %8873 = vmatprep.mubr.bf16.mxu1 %v7921_v32  ;;  %v7980_v17 = vcombine.low %v10815_v48, %v10820_v49  ;;  %v2847_v6 = vshrl.u32 %v10815_v48, 16  ;;  %v2850_v8 = vshll.u32 %v10815_v48, 16 }
  0xbf   : > { %v7878_v38 = vcombine.low %v1963_v31, %v1973_v24  ;;  %v2291_v44 = vsel %vm10210_vm5, %v2289_v62, %v2290_v37  ;;  %v2860_v33 = vshrl.u32 %v10820_v49, 16  ;;  %v2825_v22 = vrot.slane %v2823_v43, 4  ;;  %8892 = vmatpush3.bf16.msra.mxu0 %v9490_v58  ;;  %v10880_v58 = vld [vmem:[%s9937_s18 + $0x44] sm:$0x1]  ;;  %v10889_v62 = vld [vmem:[%s9937_s18 + $0x48] sm:$0xf] }
  0xc0   : > { %v7922_v57 = vcombine.low %v2288_v13, %v2291_v44  ;;  %v2828_v26 = vrot.slane %v2826_v21, 5  ;;  %v2832_v16 = vshll.u32 %v10796_v30, 16  ;;  %v2838_v40 = vrot.slane %v2836_v42, 4  ;;  %8949 = vmatprep.subr.bf16.mxu0 %v10825_v36 }
  0xc1   : > { %v2842_v10 = vshll.u32 %v10828_v4, 16  ;;  %v2849_v9 = vrot.slane %v2847_v6, 4  ;;  %v2852_v53 = vrot.slane %v2850_v8, 5  ;;  %v2856_v14 = vshll.u32 %v10820_v49, 16  ;;  %v10895_v6 = vld [vmem:[%s9937_s18 + $0x4c] sm:$0xf] }
  0xc2   : > { %8874 = vmatmul.mubr.bf16.gmra.mxu1 %v7922_v57  ;;  %v2829_v55 = vor.u32 %v2828_v26, %v2825_v22  ;;  %v2834_v47 = vrot.slane %v2832_v16, 5  ;;  %v2862_v11 = vrot.slane %v2860_v33, 4  ;;  %v2866_v56 = vshll.u32 %v10840_v18, 16  ;;  %8838 = vmatmul.mubr.bf16.gmra.mxu0 %v7878_v38  ;;  %v10898_v22 = vld [vmem:[%s9937_s18 + $0x54] sm:$0xf] }
  0xc3   : > { %v2844_v19 = vrot.slane %v2842_v10, 5  ;;  %v2853_v3 = vor.u32 %v2852_v53, %v2849_v9  ;;  %v2858_v0 = vrot.slane %v2856_v14, 5  ;;  %v7981_v63 = vcombine.low %v10849_v20, %v10854_v15  ;;  %8893 = vmatprep.mubr.bf16.mxu0 %v7979_v54  ;;  %v10902_v10 = vld [vmem:[%s9937_s18 + $0x58] sm:$0xf] }
  0xc4   : > { %v2830_v50 = vrot.slane %v2829_v55, 4  ;;  %v2839_v60 = vor.u32 %v2838_v40, %v2834_v47  ;;  %v2868_v61 = vrot.slane %v2866_v56, 5  ;;  %v2871_v59 = vshrl.u32 %v10849_v20, 16 }
  0xc5   : > { %v2854_v41 = vrot.slane %v2853_v3, 4  ;;  %v2863_v28 = vor.u32 %v2862_v11, %v2858_v0  ;;  %v2874_v45 = vshll.u32 %v10849_v20, 16  ;;  %v2884_v1 = vshrl.u32 %v10854_v15, 16  ;;  %v10914_v3 = vld [vmem:[%s9937_s18 + $0x50] sm:$0x1] }
  0xc6   : > { %v2835_v2 = vsel %vm9986_vm2, %v2830_v50, %v2834_v47  ;;  %v2840_v27 = vrot.slane %v2839_v60, 4  ;;  %v7982_v12 = vcombine.low %v10859_v51, %v10862_v46  ;;  %v2895_v25 = vshrl.u32 %v10859_v51, 16 }
  0xc7   : > { %v2859_v37 = vsel %vm9986_vm2, %v2854_v41, %v2858_v0  ;;  %v2864_v5 = vrot.slane %v2863_v28, 4  ;;  %v2898_v31 = vshll.u32 %v10859_v51, 16  ;;  %v2908_v52 = vshrl.u32 %v10862_v46, 16 }
  0xc8   : > { %v2845_v54 = vsel %vm9986_vm2, %v2840_v27, %v2844_v19  ;;  %v2873_v7 = vrot.slane %v2871_v59, 4  ;;  %v2876_v32 = vrot.slane %v2874_v45, 5  ;;  %v2880_v13 = vshll.u32 %v10854_v15, 16  ;;  %v9500_v45 = vld [vmem:[%s13101_s1 + $0x220] sm:$0xff]  }
  0xc9   : > { %v8013_v43 = vcombine.low %v2835_v2, %v2845_v54  ;;  %v2869_v21 = vsel %vm9986_vm2, %v2864_v5, %v2868_v61  ;;  %v2886_v42 = vrot.slane %v2884_v1, 4  ;;  %v2890_v24 = vshll.u32 %v10866_v34, 16  ;;  %v10938_v54 = vld [vmem:[%s9937_s18 + $0x60] sm:$0xf] }
  0xca   : > { %v8014_v8 = vcombine.low %v2859_v37, %v2869_v21  ;;  %v2877_v38 = vor.u32 %v2876_v32, %v2873_v7  ;;  %v2882_v44 = vrot.slane %v2880_v13, 5  ;;  %v2897_v33 = vrot.slane %v2895_v25, 4  ;;  %8894 = vmatmul.mubr.bf16.vlgmr.msra.gmra.mxu0 %v7980_v17  ;;  %v10933_v25 = vld [vmem:[%s9937_s18 + $0x5c] sm:$0x1] }
  0xcb   : > { %8929 = vmatprep.mubr.bf16.mxu1 %v8013_v43  ;;  %v2892_v57 = vrot.slane %v2890_v24, 5  ;;  %v2900_v26 = vrot.slane %v2898_v31, 5  ;;  %v2904_v16 = vshll.u32 %v10862_v46, 16  ;;  %v2910_v40 = vrot.slane %v2908_v52, 4  ;;  %8950 = vmatpush3.bf16.msra.mxu0 %v10825_v36  ;;  %v9498_v36 = vld [vmem:[%s13101_s1 + $0x228] sm:$0xff]  }
  0xcc   : > { %8930 = vmatmul.mubr.bf16.vlgmr.msra.gmra.mxu1 %v8014_v8  ;;  %v2878_v9 = vrot.slane %v2877_v38, 4  ;;  %v2887_v53 = vor.u32 %v2886_v42, %v2882_v44  ;;  %v2914_v14 = vshll.u32 %v10880_v58, 16  ;;  %v7983_v55 = vcombine.low %v10889_v62, %v10895_v6  ;;  %8897 = vmatprep.mubr.bf16.mxu0 %v7981_v63  ;;  %v10946_v8 = vld [vmem:[%s9937_s18 + $0x64] sm:$0xf]  ;;  %v10949_v38 = vld [vmem:[%s9937_s18 + $0x6c] sm:$0xf] }
  0xcd   : > { %v2901_v47 = vor.u32 %v2900_v26, %v2897_v33  ;;  %v2906_v11 = vrot.slane %v2904_v16, 5  ;;  %v2919_v56 = vshrl.u32 %v10889_v62, 16  ;;  %v2922_v19 = vshll.u32 %v10889_v62, 16  ;;  %8951 = vmatprep.subr.bf16.mxu0 %v9495_v23  ;;  %v10955_v16 = vld [vmem:[%s9937_s18 + $0x70] sm:$0xf] }
  0xce   : > { %v2883_v17 = vsel %vm9986_vm2, %v2878_v9, %v2882_v44  ;;  %v2888_v0 = vrot.slane %v2887_v53, 4  ;;  %v2916_v50 = vrot.slane %v2914_v14, 5  ;;  %v2932_v63 = vshrl.u32 %v10895_v6, 16 }
  0xcf   : > { %v2902_v60 = vrot.slane %v2901_v47, 4  ;;  %v2911_v61 = vor.u32 %v2910_v40, %v2906_v11  ;;  %v7984_v59 = vcombine.low %v10898_v22, %v10902_v10  ;;  %v2943_v41 = vshrl.u32 %v10898_v22, 16  ;;  %8952 = vmatpush3.bf16.msra.mxu0 %v9495_v23  ;;  %v9502_v47 = vld [vmem:[%s13101_s1 + $0x218] sm:$0xff]  }
  0xd0   : > { %v2893_v28 = vsel %vm9986_vm2, %v2888_v0, %v2892_v57  ;;  %v2946_v1 = vshll.u32 %v10898_v22, 16  ;;  %v2956_v2 = vshrl.u32 %v10902_v10, 16  ;;  %v2921_v27 = vrot.slane %v2919_v56, 4  ;;  %8953 = vmatprep.subr.bf16.mxu0 %v9498_v36 }
  0xd1   : > { %v8015_v37 = vcombine.low %v2883_v17, %v2893_v28  ;;  %v2907_v5 = vsel %vm9986_vm2, %v2902_v60, %v2906_v11  ;;  %v2912_v31 = vrot.slane %v2911_v61, 4  ;;  %v2924_v52 = vrot.slane %v2922_v19, 5  ;;  %v10966_v19 = vld [vmem:[%s9937_s18 + $0x68] sm:$0x1] }
  0xd2   : > { %v2928_v7 = vshll.u32 %v10895_v6, 16  ;;  %v2934_v32 = vrot.slane %v2932_v63, 4  ;;  %v2938_v13 = vshll.u32 %v10914_v3, 16  ;;  %v2945_v43 = vrot.slane %v2943_v41, 4  ;;  %8898 = vmatmul.mubr.bf16.gmra.mxu0 %v7982_v12 }
  0xd3   : > { %8933 = vmatprep.mubr.bf16.mxu1 %v8015_v37  ;;  %v2917_v23 = vsel %vm9986_vm2, %v2912_v31, %v2916_v50  ;;  %v2925_v21 = vor.u32 %v2924_v52, %v2921_v27  ;;  %v2948_v42 = vrot.slane %v2946_v1, 5  ;;  %v2952_v24 = vshll.u32 %v10902_v10, 16  ;;  %8954 = vmatpush3.bf16.msra.mxu0 %v9498_v36  ;;  %v10979_v37 = vld [vmem:[%s9937_s18 + $0x74] sm:$0x1] }
  0xd4   : > { %v8016_v44 = vcombine.low %v2907_v5, %v2917_v23  ;;  %v2930_v33 = vrot.slane %v2928_v7, 5  ;;  %v2940_v57 = vrot.slane %v2938_v13, 5  ;;  %v2958_v26 = vrot.slane %v2956_v2, 4  ;;  %8901 = vmatprep.mubr.bf16.mxu0 %v7983_v55  ;;  %8955 = vmatprep.subr.bf16.mxu0 %v9500_v45  ;;  %v9505_v7 = vld [vmem:[%s13101_s1 + $0x210] sm:$0xff]  }
  0xd5   : > { %v2926_v40 = vrot.slane %v2925_v21, 4  ;;  %v2949_v9 = vor.u32 %v2948_v42, %v2945_v43  ;;  %v2954_v53 = vrot.slane %v2952_v24, 5  ;;  %v2962_v14 = vshll.u32 %v10933_v25, 16  ;;  %v10994_v42 = vld [vmem:[%s9937_s18 + $0x7c] sm:$0xf] }
  0xd6   : > { %8934 = vmatmul.mubr.bf16.gmra.mxu1 %v8016_v44  ;;  %v2935_v12 = vor.u32 %v2934_v32, %v2930_v33  ;;  %v7985_v11 = vcombine.low %v10938_v54, %v10946_v8  ;;  %v2967_v56 = vshrl.u32 %v10938_v54, 16  ;;  %v2970_v55 = vshll.u32 %v10938_v54, 16  ;;  %v10988_v32 = vld [vmem:[%s9937_s18 + $0x78] sm:$0xf] }
  0xd7   : > { %v2931_v17 = vsel %vm9986_vm2, %v2926_v40, %v2930_v33  ;;  %v2950_v0 = vrot.slane %v2949_v9, 4  ;;  %v2959_v50 = vor.u32 %v2958_v26, %v2954_v53  ;;  %v2964_v36 = vrot.slane %v2962_v14, 5  ;;  %8956 = vmatpush3.bf16.msra.mxu0 %v9500_v45  ;;  %v9506_v26 = vld [vmem:[%s13101_s1 + $0x208] sm:$0xff]   ;;  %v11003_v40 = vld [vmem:[%s9937_s18 + $0x84] sm:$0xf] }
  0xd8   : > { %v2936_v63 = vrot.slane %v2935_v12, 4  ;;  %v2980_v60 = vshrl.u32 %v10946_v8, 16  ;;  %v7986_v61 = vcombine.low %v10949_v38, %v10955_v16  ;;  %v2991_v41 = vshrl.u32 %v10949_v38, 16  ;;  %8957 = vmatprep.subr.bf16.mxu0 %v9502_v47 }
  0xd9   : > { %v2955_v28 = vsel %vm9986_vm2, %v2950_v0, %v2954_v53  ;;  %v2960_v1 = vrot.slane %v2959_v50, 4  ;;  %v2994_v2 = vshll.u32 %v10949_v38, 16  ;;  %v3004_v27 = vshrl.u32 %v10955_v16, 16 }
  0xda   : > { %v2941_v5 = vsel %vm9986_vm2, %v2936_v63, %v2940_v57  ;;  %v2969_v31 = vrot.slane %v2967_v56, 4  ;;  %v2972_v52 = vrot.slane %v2970_v55, 5  ;;  %v2976_v45 = vshll.u32 %v10946_v8, 16  ;;  %8902 = vmatmul.mubr.bf16.gmra.mxu0 %v7984_v59  ;;  %v11007_v56 = vld [vmem:[%s9937_s18 + $0x88] sm:$0xf] }
  0xdb   : > { %v8017_v13 = vcombine.low %v2931_v17, %v2941_v5  ;;  %v2965_v43 = vsel %vm9986_vm2, %v2960_v1, %v2964_v36  ;;  %v2982_v23 = vrot.slane %v2980_v60, 4  ;;  %v2986_v21 = vshll.u32 %v10966_v19, 16  ;;  %8958 = vmatpush3.bf16.msra.mxu0 %v9502_v47  ;;  %8905 = vmatprep.mubr.bf16.mxu0 %v7985_v11  ;;  %v11015_v60 = vld [vmem:[%s9937_s18 + $0x80] sm:$0x1] }
  0xdc   : > { %v8018_v24 = vcombine.low %v2955_v28, %v2965_v43  ;;  %v2973_v44 = vor.u32 %v2972_v52, %v2969_v31  ;;  %v2978_v33 = vrot.slane %v2976_v45, 5  ;;  %v2993_v57 = vrot.slane %v2991_v41, 4  ;;  %8959 = vmatprep.subr.bf16.mxu0 %v9505_v7 }
  0xdd   : > { %8937 = vmatprep.mubr.bf16.mxu1 %v8017_v13  ;;  %v2988_v9 = vrot.slane %v2986_v21, 5  ;;  %v2996_v53 = vrot.slane %v2994_v2, 5  ;;  %v3000_v14 = vshll.u32 %v10955_v16, 16  ;;  %v3006_v12 = vrot.slane %v3004_v27, 4 }
  0xde   : > { %8938 = vmatmul.mubr.bf16.gmra.mxu1 %v8018_v24  ;;  %v2974_v59 = vrot.slane %v2973_v44, 4  ;;  %v2983_v55 = vor.u32 %v2982_v23, %v2978_v33  ;;  %v3010_v17 = vshll.u32 %v10979_v37, 16  ;;  %v7987_v0 = vcombine.low %v10988_v32, %v10994_v42  ;;  %v11028_v23 = vld [vmem:[%s9937_s18 + $0x8c] sm:$0x1] }
  0xdf   : > { %v2997_v50 = vor.u32 %v2996_v53, %v2993_v57  ;;  %v3002_v47 = vrot.slane %v3000_v14, 5  ;;  %v3015_v36 = vshrl.u32 %v10988_v32, 16  ;;  %v3018_v63 = vshll.u32 %v10988_v32, 16  ;;  %8960 = vmatpush3.bf16.msra.mxu0 %v9505_v7  ;;  %v9509_v7 = vld [vmem:[%s13101_s1 + $0x200] sm:$0xff]  }
  0xe0   : > { %v2979_v11 = vsel %vm9986_vm2, %v2974_v59, %v2978_v33  ;;  %v2984_v41 = vrot.slane %v2983_v55, 4  ;;  %v3012_v28 = vrot.slane %v3010_v17, 5  ;;  %v3028_v1 = vshrl.u32 %v10994_v42, 16  ;;  %8961 = vmatprep.subr.bf16.mxu0 %v9506_v26 }
  0xe1   : > { %v2998_v2 = vrot.slane %v2997_v50, 4  ;;  %v3007_v27 = vor.u32 %v3006_v12, %v3002_v47  ;;  %v7988_v5 = vcombine.low %v11003_v40, %v11007_v56  ;;  %v3039_v31 = vshrl.u32 %v11003_v40, 16 }
  0xe2   : > { %v2989_v52 = vsel %vm9986_vm2, %v2984_v41, %v2988_v9  ;;  %v3042_v45 = vshll.u32 %v11003_v40, 16  ;;  %v3052_v13 = vshrl.u32 %v11007_v56, 16  ;;  %v3017_v43 = vrot.slane %v3015_v36, 4  ;;  %8906 = vmatmul.mubr.bf16.gmra.mxu0 %v7986_v61 }
  0xe3   : > { %v8019_v21 = vcombine.low %v2979_v11, %v2989_v52  ;;  %v3003_v24 = vsel %vm9986_vm2, %v2998_v2, %v3002_v47  ;;  %v3008_v44 = vrot.slane %v3007_v27, 4  ;;  %v3020_v33 = vrot.slane %v3018_v63, 5  ;;  %8909 = vmatprep.mubr.bf16.mxu0 %v7987_v0  ;;  %8962 = vmatpush3.bf16.msra.mxu0 %v9506_v26 }
  0xe4   : > { %v3024_v57 = vshll.u32 %v10994_v42, 16  ;;  %v3030_v9 = vrot.slane %v3028_v1, 4  ;;  %v3034_v53 = vshll.u32 %v11015_v60, 16  ;;  %v3041_v14 = vrot.slane %v3039_v31, 4  ;;  %8963 = vmatprep.subr.bf16.mxu0 %v9509_v7 }
  0xe5   : > { %8941 = vmatprep.mubr.bf16.mxu1 %v8019_v21  ;;  %v3013_v12 = vsel %vm9986_vm2, %v3008_v44, %v3012_v28  ;;  %v3021_v59 = vor.u32 %v3020_v33, %v3017_v43  ;;  %v3044_v55 = vrot.slane %v3042_v45, 5  ;;  %v3048_v17 = vshll.u32 %v11007_v56, 16 }
  0xe6   : > { %v8020_v50 = vcombine.low %v3003_v24, %v3013_v12  ;;  %v3026_v47 = vrot.slane %v3024_v57, 5  ;;  %v3036_v36 = vrot.slane %v3034_v53, 5  ;;  %v3054_v61 = vrot.slane %v3052_v13, 4 }
  0xe7   : > { %v3022_v63 = vrot.slane %v3021_v59, 4  ;;  %v3045_v11 = vor.u32 %v3044_v55, %v3041_v14  ;;  %v3050_v41 = vrot.slane %v3048_v17, 5  ;;  %v3058_v1 = vshll.u32 %v11028_v23, 16  ;;  %8964 = vmatpush3.bf16.msra.mxu0 %v9509_v7 }
  0xe8   : > { %8942 = vmatmul.mubr.bf16.gmra.mxu1 %v8020_v50  ;;  %v3031_v2 = vor.u32 %v3030_v9, %v3026_v47  ;;  %v8031_v28 = vrot.slane %v10793_v35, 9  ;;  %v3312_v0 = vrot.slane %v10796_v30, 5  ;;  %v3315_v27 = vrot.slane %v10828_v4, 5 }
  0xe9   : > { %v3027_v26 = vsel %vm9986_vm2, %v3022_v63, %v3026_v47  ;;  %v3046_v31 = vrot.slane %v3045_v11, 4  ;;  %v3055_v52 = vor.u32 %v3054_v61, %v3050_v41  ;;  %v3060_v45 = vrot.slane %v3058_v1, 5 }
  0xea   : > { %v3032_v13 = vrot.slane %v3031_v2, 4  ;;  %v3313_v43 = vsel %vm10210_vm5, %v8031_v28, %v3312_v0  ;;  %v3314_v21 = vrot.slane %v3312_v0, 4  ;;  %v8032_v24 = vrot.slane %v10815_v48, 9  ;;  %8910 = vmatmul.mubr.bf16.gmra.mxu0 %v7988_v5 }
  0xeb   : > { %v3051_v35 = vsel %vm9986_vm2, %v3046_v31, %v3050_v41  ;;  %v3056_v30 = vrot.slane %v3055_v52, 4  ;;  %v3319_v4 = vrot.slane %v10820_v49, 5  ;;  %v3322_v44 = vrot.slane %v10840_v18, 5 }
  0xec   : > { %v3037_v33 = vsel %vm9986_vm2, %v3032_v13, %v3036_v36  ;;  %v3316_v7 = vsel %vm10210_vm5, %v3314_v21, %v3315_v27  ;;  %v8033_v57 = vrot.slane %v10849_v20, 9  ;;  %v3326_v9 = vrot.slane %v10854_v15, 5 }
  0xed   : > { %v8021_v48 = vcombine.low %v3027_v26, %v3037_v33  ;;  %v3061_v53 = vsel %vm9986_vm2, %v3056_v30, %v3060_v45  ;;  %v8057_v14 = vcombine.low %v3313_v43, %v3316_v7  ;;  %v3320_v49 = vsel %vm10210_vm5, %v8032_v24, %v3319_v4 }
  0xee   : > { %v8022_v12 = vcombine.low %v3051_v35, %v3061_v53  ;;  %v3321_v18 = vrot.slane %v3319_v4, 4  ;;  %v3328_v5 = vrot.slane %v3326_v9, 4  ;;  %v3327_v59 = vsel %vm10210_vm5, %v8033_v57, %v3326_v9 }
  0xef   : > { %8945 = vmatprep.mubr.bf16.mxu1 %v8021_v48  ;;  %8965 = vmatprep.mubr.bf16.mxu0 %v8057_v14  ;;  %v3329_v20 = vrot.slane %v10866_v34, 5  ;;  %v3333_v15 = vrot.slane %v10862_v46, 5  ;;  %v8034_v17 = vrot.slane %v10859_v51, 9  ;;  %v3336_v50 = vrot.slane %v10880_v58, 5 }
  0xf0   : > { %8946 = vmatmul.mubr.bf16.gmra.mxu1 %v8022_v12  ;;  %v3323_v55 = vsel %vm10210_vm5, %v3321_v18, %v3322_v44  ;;  %v3340_v47 = vrot.slane %v10895_v6, 5  ;;  %v8035_v11 = vrot.slane %v10889_v62, 9  ;;  %v3343_v46 = vrot.slane %v10914_v3, 5 }
  0xf1   : > { %v8058_v36 = vcombine.low %v3320_v49, %v3323_v55  ;;  %v3330_v61 = vsel %vm10210_vm5, %v3328_v5, %v3329_v20  ;;  %v3335_v63 = vrot.slane %v3333_v15, 4  ;;  %v3347_v1 = vrot.slane %v10902_v10, 5 }
  0xf2   : > { %v8059_v34 = vcombine.low %v3327_v59, %v3330_v61  ;;  %v3342_v41 = vrot.slane %v3340_v47, 4  ;;  %v3334_v51 = vsel %vm10210_vm5, %v8034_v17, %v3333_v15  ;;  %v8036_v58 = vrot.slane %v10898_v22, 9 }
  0xf3   : > { %8966 = vmatmul.mubr.bf16.vlgmr.msra.gmra.mxu0 %v8058_v36  ;;  %v3354_v6 = vrot.slane %v10946_v8, 5  ;;  %v3337_v2 = vsel %vm10210_vm5, %v3335_v63, %v3336_v50  ;;  %v3341_v62 = vsel %vm10210_vm5, %v8035_v11, %v3340_v47  ;;  %v3350_v28 = vrot.slane %v10933_v25, 5 }
  0xf4   : > { %8969 = vmatprep.mubr.bf16.mxu0 %v8059_v34  ;;  %v8037_v3 = vrot.slane %v10938_v54, 9  ;;  %v3344_v10 = vsel %vm10210_vm5, %v3342_v41, %v3343_v46  ;;  %v3349_v0 = vrot.slane %v3347_v1, 4  ;;  %v3357_v27 = vrot.slane %v10966_v19, 5 }
  0xf5   : > { %v3361_v22 = vrot.slane %v10955_v16, 5  ;;  %v3356_v8 = vrot.slane %v3354_v6, 4  ;;  %v8038_v26 = vrot.slane %v10949_v38, 9  ;;  %v3364_v31 = vrot.slane %v10979_v37, 5 }
  0xf6   : > { %v3368_v52 = vrot.slane %v10994_v42, 5  ;;  %v8060_v45 = vcombine.low %v3334_v51, %v3337_v2  ;;  %v8039_v25 = vrot.slane %v10988_v32, 9  ;;  %v3371_v54 = vrot.slane %v11015_v60, 5 }
  0xf7   : > { %v8061_v13 = vcombine.low %v3341_v62, %v3344_v10  ;;  %v3363_v43 = vrot.slane %v3361_v22, 4  ;;  %v8040_v24 = vrot.slane %v11003_v40, 9  ;;  %v3375_v19 = vrot.slane %v11007_v56, 5 }
  0xf8   : > { %v3370_v21 = vrot.slane %v3368_v52, 4  ;;  %v3378_v38 = vrot.slane %v11028_v23, 5  ;;  %v3348_v37 = vsel %vm10210_vm5, %v8036_v58, %v3347_v1  ;;  %v3351_v32 = vsel %vm10210_vm5, %v3349_v0, %v3350_v28 }
  0xf9   : > { %v3377_v16 = vrot.slane %v3375_v19, 4  ;;  %v3355_v42 = vsel %vm10210_vm5, %v8037_v3, %v3354_v6  ;;  %v3358_v60 = vsel %vm10210_vm5, %v3356_v8, %v3357_v27  ;;  %v8062_v40 = vcombine.low %v3348_v37, %v3351_v32 }
  0xfa   : > { %v8063_v35 = vcombine.low %v3355_v42, %v3358_v60  ;;  %v3362_v56 = vsel %vm10210_vm5, %v8038_v26, %v3361_v22  ;;  %v3365_v23 = vsel %vm10210_vm5, %v3363_v43, %v3364_v31  ;;  %v3369_v30 = vsel %vm10210_vm5, %v8039_v25, %v3368_v52 }
  0xfb   : > { %8970 = vmatmul.mubr.bf16.gmra.mxu0 %v8060_v45  ;;  %v3372_v4 = vsel %vm10210_vm5, %v3370_v21, %v3371_v54  ;;  %v8064_v44 = vcombine.low %v3362_v56, %v3365_v23  ;;  %v3376_v7 = vsel %vm10210_vm5, %v8040_v24, %v3375_v19  ;;  %v3379_v57 = vsel %vm10210_vm5, %v3377_v16, %v3378_v38 }
  0xfc   : > { %8973 = vmatprep.mubr.bf16.mxu0 %v8061_v13  ;;  %v8065_v33 = vcombine.low %v3369_v30, %v3372_v4  ;;  %v8066_v48 = vcombine.low %v3376_v7, %v3379_v57  ;;  %v3779_v57 = vld [vmem:[#allocation2 + $0xc] sm:$0x1] }
 0x103   : > { %8974 = vmatmul.mubr.bf16.gmra.mxu0 %v8062_v40 }
 0x104   : > { %8977 = vmatprep.mubr.bf16.mxu0 %v8063_v35 }
 0x10b   : > { %8978 = vmatmul.mubr.bf16.gmra.mxu0 %v8064_v44 }
 0x10c   : > { %8981 = vmatprep.mubr.bf16.mxu0 %v8065_v33 }
 0x10e   : > { %v8679_v9 = vpop.f32.mrf.mxu0 }
 0x10f   : > { %v8715_v53 = vpop.f32.mrf.mxu1 }
 0x110   : > { %v1051_v14 = vadd.f32 %v8715_v53, %v8679_v9  ;;  %v821_v12 = vpop.f32.mrf.mxu0  ;;  %v9511_v9 = vld [vmem:[#allocation3 + $0xb8] sm:$0xff]  }
 0x111   : > { %v1042_v49 = vpop.f32.mrf.mxu1  ;;  %9049 = vmatprep.subr.bf16.mxu0 %v9511_v9 }
 0x112   : > { %v1043_v18 = vadd.f32 %v1042_v49, %v821_v12  ;;  %v8680_v5 = vpop.f32.mrf.mxu0  ;;  %9050 = vmatpush3.bf16.msra.mxu0 %v9511_v9 }
 0x113   : > { %8982 = vmatmul.mubr.bf16.gmra.mxu0 %v8066_v48  ;;  %v8716_v59 = vpop.f32.mrf.mxu1 }
 0x114   : > { %v11122_v20 = vadd.f32 %v8716_v59, %v8680_v5  ;;  %v11124_v15 = vpop.f32.mrf.mxu0  ;;  %v13175_v5 = vmov 0 }
 0x115   : > { %v11126_v55 = vpop.f32.mrf.mxu1  ;;  %v13176_v5 = vsel %vm11173_vm9, 4294967295, %v13175_v5 }
 0x116   : > { %v8683_v17 = vpop.f32.mrf.mxu0  ;;  %13177 = vst [vmem:[#allocation15_spill] sm:$0xff] %v13176_v5 }
 0x117   : > { %v8719_v50 = vpop.f32.mrf.mxu1 }
 0x118   : > { %v11128_v47 = vadd.f32 %v8719_v50, %v8683_v17  ;;  %v837_v36 = vpop.f32.mrf.mxu0 }
 0x119   : > { %v1058_v61 = vpop.f32.mrf.mxu1 }
 0x11a   : > { %v11130_v63 = vadd.f32 %v1058_v61, %v837_v36  ;;  %v8684_v11 = vpop.f32.mrf.mxu0 }
 0x11b   : > { %v8720_v34 = vpop.f32.mrf.mxu1 }
 0x11c   : > { %v11132_v41 = vadd.f32 %v8720_v34, %v8684_v11  ;;  %v11134_v46 = vpop.f32.mrf.mxu0  ;;  %v9510_v34 = vld [vmem:[#allocation3 + $0x78] sm:$0xff]  }
 0x11d   : > { %v11136_v1 = vpop.f32.mrf.mxu1  ;;  %8985 = vmatprep.subr.bf16.mxu1 %v9510_v34 }
 0x11e   : > { %v8687_v51 = vpop.f32.mrf.mxu0  ;;  %8986 = vmatpush3.bf16.msra.mxu1 %v9510_v34 }
 0x11f   : > { %v8723_v58 = vpop.f32.mrf.mxu1 }
 0x120   : > { %v11138_v6 = vadd.f32 %v8723_v58, %v8687_v51  ;;  %v853_v2 = vpop.f32.mrf.mxu0  ;;  %v3811_v58 = vld [vmem:[#allocation2 + $0x14] sm:$0x1] }
 0x121   : > { %v1074_v62 = vpop.f32.mrf.mxu1 }
 0x122   : > { %v11140_v28 = vadd.f32 %v1074_v62, %v853_v2  ;;  %v8688_v3 = vpop.f32.mrf.mxu0 }
 0x123   : > { %v8724_v10 = vpop.f32.mrf.mxu1 }
 0x124   : > { %v11142_v0 = vadd.f32 %v8724_v10, %v8688_v3  ;;  %v11144_v27 = vpop.f32.mrf.mxu0  ;;  %v3812_v3 = vsel %vm11180_vm10, 0, %v3811_v58  ;;  %v3808_v10 = vld [vmem:[#allocation2 + $0x8] sm:$0x1] }
 0x125   : > { %v11146_v22 = vpop.f32.mrf.mxu1  ;;  %3813 = vst [vmem:[#allocation2 + $0x14] sm:$0x1] %v3812_v3 }
 0x126   : > { %v8691_v26 = vpop.f32.mrf.mxu0 }
 0x127   : > { %v8727_v8 = vpop.f32.mrf.mxu1 }
 0x128   : > { %v11148_v31 = vadd.f32 %v8727_v8, %v8691_v26  ;;  %v869_v45 = vpop.f32.mrf.mxu0  ;;  %v9513_v8 = vld [vmem:[#allocation3 + $0xb0] sm:$0xff]  }
 0x129   : > { %v1090_v52 = vpop.f32.mrf.mxu1  ;;  %9051 = vmatprep.subr.bf16.mxu0 %v9513_v8 }
 0x12a   : > { %v11150_v25 = vadd.f32 %v1090_v52, %v869_v45  ;;  %v8692_v13 = vpop.f32.mrf.mxu0  ;;  %v3809_v45 = vsel %vm11180_vm10, 0, %v3808_v10  ;;  %9052 = vmatpush3.bf16.msra.mxu0 %v9513_v8  ;;  %v3814_v10 = vld [vmem:[#allocation2 + $0x20] sm:$0x1] }
 0x12b   : > { %v8728_v54 = vpop.f32.mrf.mxu1  ;;  %3810 = vst [vmem:[#allocation2 + $0x8] sm:$0x1] %v3809_v45 }
 0x12c   : > { %v11152_v43 = vadd.f32 %v8728_v54, %v8692_v13  ;;  %v11156_v24 = vpop.f32.mrf.mxu0  ;;  %v9512_v54 = vld [vmem:[#allocation3 + $0x70] sm:$0xff]  }
 0x12d   : > { %v11154_v21 = vpop.f32.mrf.mxu1  ;;  %8987 = vmatprep.subr.bf16.mxu1 %v9512_v54 }
 0x12e   : > { %8988 = vmatpush3.bf16.msra.mxu1 %v9512_v54  ;;  %v9516_v54 = vld [vmem:[#allocation3 + $0x60] sm:$0xff]  }
 0x12f   : > { %v8731_v19 = vpop.f32.mrf.mxu1 }
 0x130   : > { %v8695_v38 = vpop.f32.mrf.mxu0 }
 0x131   : > { %v1106_v16 = vpop.f32.mrf.mxu1  ;;  %v11158_v37 = vadd.f32 %v8731_v19, %v8695_v38  ;;  %v3785_v19 = vld [vmem:[#allocation2 + $0x24] sm:$0x1] }
 0x132   : > { %v885_v42 = vpop.f32.mrf.mxu0 }
 0x133   : > { %v8732_v32 = vpop.f32.mrf.mxu1  ;;  %v11160_v60 = vadd.f32 %v1106_v16, %v885_v42  ;;  %v3786_v42 = vsel %vm11173_vm9, 0, %v3785_v19  ;;  %v3791_v19 = vld [vmem:[#allocation2 + $0x3c] sm:$0x1] }
 0x134   : > { %v8696_v35 = vpop.f32.mrf.mxu0  ;;  %3787 = vst [vmem:[#allocation2 + $0x24] sm:$0x1] %v3786_v42  ;;  %v3792_v42 = vsel %vm11173_vm9, 0, %v3791_v19 }
 0x135   : > { %v11162_v40 = vpop.f32.mrf.mxu1  ;;  %v11164_v56 = vadd.f32 %v8732_v32, %v8696_v35  ;;  %v3782_v35 = vld [vmem:[#allocation2 + $0x18] sm:$0x1]  ;;  %3793 = vst [vmem:[#allocation2 + $0x3c] sm:$0x1] %v3792_v42 }
 0x136   : > { %v11166_v30 = vpop.f32.mrf.mxu0 }
 0x137   : > { %v8787_v23 = vpop.f32.mrf.mxu1 }
 0x139   : > { %v1635_v4 = vpop.f32.mrf.mxu1  ;;  %v8751_v44 = vpop.f32.mrf.mxu0 }
 0x13a   : > { %v1424_v33 = vadd.f32 %v8751_v44, %v1051_v14  ;;  %v3780_v14 = vsel %vm11173_vm9, 0, %v3779_v57 }
 0x13b   : > { %v8788_v7 = vpop.f32.mrf.mxu1  ;;  %v1343_v48 = vpop.f32.mrf.mxu0  ;;  %3781 = vst [vmem:[#allocation2 + $0xc] sm:$0x1] %v3780_v14  ;;  %v3817_v14 = vld [vmem:[#allocation2 + $0x2c] sm:$0x1] }
 0x13c   : > { %v1422_v53 = vadd.f32 %v1343_v48, %v1043_v18  ;;  %v11168_v12 = vadd.f32 %v8787_v23, %v1424_v33  ;;  %v3776_v18 = vld [vmem:[#allocation2] sm:$0x1] }
 0x13d   : > { %v11170_v49 = vpop.f32.mrf.mxu1  ;;  %v8752_v59 = vpop.f32.mrf.mxu0  ;;  %v3777_v11 = vsel %vm11173_vm9, 0, %v3776_v18  ;;  %v9515_v48 = vld [vmem:[#allocation3 + $0xa8] sm:$0xff]  }
 0x13e   : > { %v1425_v50 = vadd.f32 %v8752_v59, %v11122_v20  ;;  %v11185_v36 = vadd.f32 %v1635_v4, %v1422_v53  ;;  %3778 = vst [vmem:[#allocation2] sm:$0x1] %v3777_v11  ;;  %9053 = vmatprep.subr.bf16.mxu0 %v9515_v48 }
 0x13f   : > { %v8791_v61 = vpop.f32.mrf.mxu1  ;;  %v11189_v51 = vpop.f32.mrf.mxu0  ;;  %9054 = vmatpush3.bf16.msra.mxu0 %v9515_v48 }
 0x140   : > { %v11191_v2 = vadd.f32 %v8788_v7, %v1425_v50  ;;  %v9514_v50 = vld [vmem:[#allocation3 + $0x68] sm:$0xff]  }
 0x141   : > { %v1651_v62 = vpop.f32.mrf.mxu1  ;;  %v8755_v20 = vpop.f32.mrf.mxu0  ;;  %8989 = vmatprep.subr.bf16.mxu1 %v9514_v50 }
 0x142   : > { %v1428_v26 = vadd.f32 %v8755_v20, %v11128_v47  ;;  %8990 = vmatpush3.bf16.msra.mxu1 %v9514_v50 }
 0x143   : > { %v8792_v52 = vpop.f32.mrf.mxu1  ;;  %v1359_v13 = vpop.f32.mrf.mxu0  ;;  %8991 = vmatprep.subr.bf16.mxu1 %v9516_v54 }
 0x144   : > { %v1426_v16 = vadd.f32 %v1359_v13, %v11130_v63  ;;  %v11199_v38 = vadd.f32 %v8791_v61, %v1428_v26  ;;  %v3783_v63 = vsel %vm11173_vm9, 0, %v3782_v35 }
 0x145   : > { %v11201_v32 = vpop.f32.mrf.mxu1  ;;  %v8756_v47 = vpop.f32.mrf.mxu0  ;;  %3784 = vst [vmem:[#allocation2 + $0x18] sm:$0x1] %v3783_v63  ;;  %v3788_v63 = vld [vmem:[#allocation2 + $0x30] sm:$0x1] }
 0x146   : > { %v1429_v23 = vadd.f32 %v8756_v47, %v11132_v41  ;;  %v11206_v4 = vadd.f32 %v1651_v62, %v1426_v16  ;;  %v3818_v41 = vsel %vm11180_vm10, 0, %v3817_v14  ;;  %v9517_v62 = vld [vmem:[#allocation3 + $0xa0] sm:$0xff]   ;;  %v9519_v47 = vld [vmem:[#allocation3 + $0x98] sm:$0xff]   ;;  %8992 = vmatpush3.bf16.msra.mxu1 %v9516_v54 }
 0x147   : > { %v8795_v44 = vpop.f32.mrf.mxu1  ;;  %v11210_v33 = vpop.f32.mrf.mxu0  ;;  %3819 = vst [vmem:[#allocation2 + $0x2c] sm:$0x1] %v3818_v41  ;;  %9055 = vmatprep.subr.bf16.mxu0 %v9517_v62  ;;  %v3797_v54 = vld [vmem:[#allocation2 + $0x54] sm:$0x1] }
 0x148   : > { %v11212_v7 = vadd.f32 %v8792_v52, %v1429_v23  ;;  %9056 = vmatpush3.bf16.msra.mxu0 %v9517_v62 }
 0x149   : > { %v1667_v57 = vpop.f32.mrf.mxu1  ;;  %v8759_v9 = vpop.f32.mrf.mxu0  ;;  %9057 = vmatprep.subr.bf16.mxu0 %v9519_v47 }
 0x14a   : > { %v1432_v53 = vadd.f32 %v8759_v9, %v11138_v6 }
 0x14b   : > { %v8796_v59 = vpop.f32.mrf.mxu1  ;;  %v1375_v18 = vpop.f32.mrf.mxu0 }
 0x14c   : > { %v1430_v61 = vadd.f32 %v1375_v18, %v11140_v28  ;;  %v11218_v11 = vadd.f32 %v8795_v44, %v1432_v53  ;;  %v3815_v28 = vsel %vm11180_vm10, 0, %v3814_v10  ;;  %9058 = vmatpush3.bf16.msra.mxu0 %v9519_v47  ;;  %v9518_v18 = vld [vmem:[#allocation3 + $0x58] sm:$0xff]   ;;  %v9520_v10 = vld [vmem:[#allocation3 + $0x90] sm:$0xff]  }
 0x14d   : > { %v11220_v34 = vpop.f32.mrf.mxu1  ;;  %v8760_v58 = vpop.f32.mrf.mxu0  ;;  %3816 = vst [vmem:[#allocation2 + $0x20] sm:$0x1] %v3815_v28  ;;  %8993 = vmatprep.subr.bf16.mxu1 %v9518_v18  ;;  %9059 = vmatprep.subr.bf16.mxu0 %v9520_v10 }
 0x14e   : > { %v1433_v6 = vadd.f32 %v8760_v58, %v11142_v0  ;;  %v11223_v3 = vadd.f32 %v1667_v57, %v1430_v61  ;;  %v3820_v61 = vld [vmem:[#allocation2 + $0x38] sm:$0x1]  ;;  %8994 = vmatpush3.bf16.msra.mxu1 %v9518_v18 }
 0x14f   : > { %v8799_v20 = vpop.f32.mrf.mxu1  ;;  %v11225_v8 = vpop.f32.mrf.mxu0 }
 0x150   : > { %v11229_v26 = vadd.f32 %v8796_v59, %v1433_v6  ;;  %v3823_v59 = vld [vmem:[#allocation2 + $0x44] sm:$0x1]  ;;  %9060 = vmatpush3.bf16.msra.mxu0 %v9520_v10 }
 0x151   : > { %v1683_v52 = vpop.f32.mrf.mxu1  ;;  %v8763_v45 = vpop.f32.mrf.mxu0  ;;  %v3824_v14 = vsel %vm11180_vm10, 0, %v3823_v59 }
 0x152   : > { %v1436_v0 = vadd.f32 %v8763_v45, %v11148_v31  ;;  %v3789_v31 = vsel %vm11173_vm9, 0, %v3788_v63  ;;  %3825 = vst [vmem:[#allocation2 + $0x44] sm:$0x1] %v3824_v14  ;;  %v9522_v63 = vld [vmem:[#allocation3 + $0x88] sm:$0xff]  }
 0x153   : > { %v8800_v13 = vpop.f32.mrf.mxu1  ;;  %v1391_v16 = vpop.f32.mrf.mxu0  ;;  %3790 = vst [vmem:[#allocation2 + $0x30] sm:$0x1] %v3789_v31  ;;  %9061 = vmatprep.subr.bf16.mxu0 %v9522_v63 }
 0x154   : > { %v1434_v35 = vadd.f32 %v1391_v16, %v11150_v25  ;;  %v11235_v23 = vadd.f32 %v8799_v20, %v1436_v0  ;;  %9062 = vmatpush3.bf16.msra.mxu0 %v9522_v63  ;;  %v3800_v63 = vld [vmem:[#allocation2 + $0x60] sm:$0x1] }
 0x155   : > { %v11237_v44 = vpop.f32.mrf.mxu1  ;;  %v8764_v57 = vpop.f32.mrf.mxu0 }
 0x156   : > { %v1437_v9 = vadd.f32 %v8764_v57, %v11152_v43  ;;  %v11242_v48 = vadd.f32 %v1683_v52, %v1434_v35  ;;  %v3821_v43 = vsel %vm11180_vm10, 0, %v3820_v61  ;;  %v9521_v35 = vld [vmem:[#allocation3 + $0x50] sm:$0xff]   ;;  %v9524_v61 = vld [vmem:[#allocation3 + $0x80] sm:$0xff]  }
 0x157   : > { %v8803_v53 = vpop.f32.mrf.mxu1  ;;  %v11244_v25 = vpop.f32.mrf.mxu0  ;;  %3822 = vst [vmem:[#allocation2 + $0x38] sm:$0x1] %v3821_v43  ;;  %8995 = vmatprep.subr.bf16.mxu1 %v9521_v35  ;;  %9063 = vmatprep.subr.bf16.mxu0 %v9524_v61 }
 0x158   : > { %v11248_v41 = vadd.f32 %v8800_v13, %v1437_v9  ;;  %v3798_v13 = vsel %vm11173_vm9, 0, %v3797_v54  ;;  %8996 = vmatpush3.bf16.msra.mxu1 %v9521_v35  ;;  %9064 = vmatpush3.bf16.msra.mxu0 %v9524_v61 }
 0x159   : > { %v1699_v50 = vpop.f32.mrf.mxu1  ;;  %3799 = vst [vmem:[#allocation2 + $0x54] sm:$0x1] %v3798_v13 }
 0x15a   : > { %v8767_v58 = vpop.f32.mrf.mxu0 }
 0x15b   : > { %v1440_v62 = vadd.f32 %v8767_v58, %v11158_v37  ;;  %v8804_v6 = vpop.f32.mrf.mxu1 }
 0x15c   : > { %v1407_v20 = vpop.f32.mrf.mxu0 }
 0x15d   : > { %v1438_v28 = vadd.f32 %v1407_v20, %v11160_v60  ;;  %v11254_v52 = vadd.f32 %v8803_v53, %v1440_v62  ;;  %v11256_v45 = vpop.f32.mrf.mxu1  ;;  %v3826_v20 = vld [vmem:[#allocation2 + $0x50] sm:$0x1] }
 0x15e   : > { %v8768_v0 = vpop.f32.mrf.mxu0  ;;  %v3827_v10 = vsel %vm11180_vm10, 0, %v3826_v20 }
 0x15f   : > { %v1441_v19 = vadd.f32 %v8768_v0, %v11164_v56  ;;  %v11261_v37 = vadd.f32 %v1699_v50, %v1438_v28  ;;  %v11263_v16 = vpop.f32.mrf.mxu1  ;;  %v3794_v56 = vld [vmem:[#allocation2 + $0x48] sm:$0x1]  ;;  %v3829_v50 = vld [vmem:[#allocation2 + $0x5c] sm:$0x1]  ;;  %3828 = vst [vmem:[#allocation2 + $0x50] sm:$0x1] %v3827_v10 }
 0x160   : > { %v11265_v42 = vpop.f32.mrf.mxu0  ;;  %v3795_v59 = vsel %vm11173_vm9, 0, %v3794_v56  ;;  %v3830_v43 = vsel %vm11180_vm10, 0, %v3829_v50  ;;  %v3803_v0 = vld [vmem:[#allocation2 + $0x6c] sm:$0x1] }
 0x161   : > { %v11267_v60 = vadd.f32 %v8804_v6, %v1441_v19  ;;  %v11269_v47 = vpop.f32.mrf.mxu1  ;;  %3796 = vst [vmem:[#allocation2 + $0x48] sm:$0x1] %v3795_v59  ;;  %3831 = vst [vmem:[#allocation2 + $0x5c] sm:$0x1] %v3830_v43  ;;  %v3804_v19 = vsel %vm11173_vm9, 0, %v3803_v0  ;;  %v9525_v59 = vld [vmem:[#allocation3 + $0x40] sm:$0xff]  }
 0x162   : > { %v8823_v57 = vpop.f32.mrf.mxu0  ;;  %3805 = vst [vmem:[#allocation2 + $0x6c] sm:$0x1] %v3804_v19  ;;  %v3832_v0 = vld [vmem:[#allocation2 + $0x68] sm:$0x1] }
 0x163   : > { %v11272_v31 = vadd.f32 %v8823_v57, %v11168_v12  ;;  %v11274_v9 = vpop.f32.mrf.mxu1  ;;  %v9523_v12 = vld [vmem:[#allocation3 + $0x48] sm:$0xff]  }
 0x164   : > { %v2113_v53 = vpop.f32.mrf.mxu0  ;;  %8997 = vmatprep.subr.bf16.mxu1 %v9523_v12 }
 0x165   : > { %v11279_v14 = vadd.f32 %v2113_v53, %v11185_v36  ;;  %v11281_v18 = vpop.f32.mrf.mxu1  ;;  %8998 = vmatpush3.bf16.msra.mxu1 %v9523_v12  ;;  %v3801_v53 = vsel %vm11173_vm9, 0, %v3800_v63  ;;  %v3833_v63 = vsel %vm11180_vm10, 0, %v3832_v0 }
 0x166   : > { %v8824_v58 = vpop.f32.mrf.mxu0  ;;  %3802 = vst [vmem:[#allocation2 + $0x60] sm:$0x1] %v3801_v53  ;;  %8999 = vmatprep.subr.bf16.mxu1 %v9525_v59  ;;  %3834 = vst [vmem:[#allocation2 + $0x68] sm:$0x1] %v3833_v63 }
 0x167   : > { %v11286_v62 = vadd.f32 %v8824_v58, %v11191_v2  ;;  %v11288_v6 = vpop.f32.mrf.mxu1 }
 0x168   : > { %v11290_v36 = vpop.f32.mrf.mxu0 }
 0x169   : > { %v11294_v28 = vpop.f32.mrf.mxu1  ;;  %9000 = vmatpush3.bf16.msra.mxu1 %v9525_v59 }
 0x16a   : > { %v8827_v54 = vpop.f32.mrf.mxu0 }
 0x16b   : > { %v11297_v2 = vadd.f32 %v8827_v54, %v11199_v38  ;;  %v11299_v13 = vpop.f32.mrf.mxu1  ;;  %v3835_v38 = vld [vmem:[#allocation2 + $0x74] sm:$0x1] }
 0x16c   : > { %v2129_v35 = vpop.f32.mrf.mxu0  ;;  %v3836_v58 = vsel %vm11180_vm10, 0, %v3835_v38 }
 0x16d   : > { %v11304_v57 = vadd.f32 %v2129_v35, %v11206_v4  ;;  %v11306_v56 = vpop.f32.mrf.mxu1  ;;  %3837 = vst [vmem:[#allocation2 + $0x74] sm:$0x1] %v3836_v58 }
 0x16e   : > { %v8828_v50 = vpop.f32.mrf.mxu0 }
 0x16f   : > { %v11311_v12 = vadd.f32 %v8828_v50, %v11212_v7  ;;  %v11313_v61 = vpop.f32.mrf.mxu1 }
 0x170   : > { %v11317_v4 = vpop.f32.mrf.mxu0 }
 0x171   : > { %v11319_v43 = vpop.f32.mrf.mxu1 }
 0x172   : > { %v8831_v20 = vpop.f32.mrf.mxu0 }
 0x173   : > { %v11322_v10 = vadd.f32 %v8831_v20, %v11218_v11  ;;  %v11324_v54 = vpop.f32.mrf.mxu1 }
 0x174   : > { %v2145_v7 = vpop.f32.mrf.mxu0 }
 0x175   : > { %v11327_v19 = vadd.f32 %v2145_v7, %v11223_v3  ;;  %v11329_v35 = vpop.f32.mrf.mxu1 }
 0x176   : > { %v8832_v53 = vpop.f32.mrf.mxu0 }
 0x177   : > { %v11334_v59 = vadd.f32 %v8832_v53, %v11229_v26  ;;  %v11336_v50 = vpop.f32.mrf.mxu1  ;;  %v9526_v53 = vld [vmem:[#allocation3 + $0x138] sm:$0xff]  }
 0x178   : > { %v11338_v11 = vpop.f32.mrf.mxu0  ;;  %9113 = vmatprep.subr.bf16.mxu0 %v9526_v53 }
 0x179   : > { %v11340_v38 = vpop.f32.mrf.mxu1 }
 0x17a   : > { %v8835_v58 = vpop.f32.mrf.mxu0 }
 0x17b   : > { %v11343_v3 = vadd.f32 %v8835_v58, %v11235_v23  ;;  %v11345_v20 = vpop.f32.mrf.mxu1 }
 0x17c   : > { %13180 = vst [vmem:[#allocation16_spill] sm:$0xff] %v11345_v20  ;;  %v2161_v7 = vpop.f32.mrf.mxu0 }
 0x17d   : > { %v11348_v17 = vadd.f32 %v2161_v7, %v11242_v48  ;;  %v11350_v0 = vpop.f32.mrf.mxu1 }
 0x17e   : > { %13181 = vst [vmem:[#allocation17_spill] sm:$0xff] %v11350_v0  ;;  %v8836_v26 = vpop.f32.mrf.mxu0 }
 0x17f   : > { %v11353_v63 = vadd.f32 %v8836_v26, %v11248_v41 }
 0x180   : > { %v11355_v39 = vpop.f32.mrf.mxu0 }
 0x182   : > { %v11357_v29 = vpop.f32.mrf.mxu1  ;;  %v8839_v23 = vpop.f32.mrf.mxu0 }
 0x183   : > { %13182 = vst [vmem:[#allocation18_spill] sm:$0xff] %v11357_v29  ;;  %v11362_v5 = vadd.f32 %v8839_v23, %v11254_v52  ;;  %v9527_v52 = vld [vmem:[#allocation3 + $0x38] sm:$0xff]  }
 0x184   : > { %v11359_v58 = vpop.f32.mrf.mxu1  ;;  %v2177_v48 = vpop.f32.mrf.mxu0  ;;  %9017 = vmatprep.subr.bf16.mxu1 %v9527_v52 }
 0x185   : > { %13183 = vst [vmem:[#allocation19_spill] sm:$0xff] %v11359_v58  ;;  %13184 = vst [vmem:[#allocation20_spill] sm:$0xff] %v11362_v5  ;;  %v11367_v0 = vadd.f32 %v2177_v48, %v11261_v37 }
 0x186   : > { %v11364_v7 = vpop.f32.mrf.mxu1  ;;  %v8840_v41 = vpop.f32.mrf.mxu0 }
 0x187   : > { %13185 = vst [vmem:[#allocation21_spill] sm:$0xff] %v11364_v7  ;;  %13186 = vst [vmem:[#allocation22_spill] sm:$0xff] %v11367_v0  ;;  %v11372_v20 = vadd.f32 %v8840_v41, %v11267_v60 }
 0x188   : > { %v11369_v26 = vpop.f32.mrf.mxu1  ;;  %v11374_v29 = vpop.f32.mrf.mxu0 }
 0x189   : > { %13187 = vst [vmem:[#allocation23_spill] sm:$0xff] %v11369_v26  ;;  %13188 = vst [vmem:[#allocation24_spill] sm:$0xff] %v11372_v20 }
 0x18a   : > { %v11376_v53 = vpop.f32.mrf.mxu0 }
 0x18c   : > { %v11378_v58 = vpop.f32.mrf.mxu1  ;;  %v11380_v23 = vpop.f32.mrf.mxu0 }
 0x18d   : > { %13189 = vst [vmem:[#allocation25_spill] sm:$0xff] %v11378_v58 }
 0x18e   : > { %v11382_v5 = vpop.f32.mrf.mxu1  ;;  %v11384_v37 = vpop.f32.mrf.mxu0 }
 0x18f   : > { %13190 = vst [vmem:[#allocation26_spill] sm:$0xff] %v11382_v5  ;;  %13191 = vst [vmem:[#allocation27_spill] sm:$0xff] %v11384_v37 }
 0x190   : > { %v11386_v48 = vpop.f32.mrf.mxu1  ;;  %v11388_v26 = vpop.f32.mrf.mxu0 }
 0x191   : > { %13192 = vst [vmem:[#allocation28_spill] sm:$0xff] %v11386_v48  ;;  %13193 = vst [vmem:[#allocation29_spill] sm:$0xff] %v11388_v26 }
 0x192   : > { %v11390_v60 = vpop.f32.mrf.mxu1  ;;  %v11392_v41 = vpop.f32.mrf.mxu0 }
 0x193   : > { %13194 = vst [vmem:[#allocation30_spill] sm:$0xff] %v11390_v60 }
 0x194   : > { %v11394_v7 = vpop.f32.mrf.mxu0 }
 0x195   : > { %13195 = vst [vmem:[#allocation31_spill] sm:$0xff] %v11394_v7 }
 0x196   : > { %v11396_v58 = vpop.f32.mrf.mxu1  ;;  %v11398_v20 = vpop.f32.mrf.mxu0 }
 0x197   : > { %13196 = vst [vmem:[#allocation32_spill] sm:$0xff] %v11396_v58  ;;  %13197 = vst [vmem:[#allocation33_spill] sm:$0xff] %v11398_v20  ;;  %v1046_v58 = vadd.f32 %v11126_v55, %v11124_v15  ;;  %v1094_v15 = vadd.f32 %v11154_v21, %v11156_v24  ;;  %v1110_v55 = vadd.f32 %v11162_v40, %v11166_v30 }
 0x198   : > { %v11400_v0 = vpop.f32.mrf.mxu1  ;;  %v11402_v52 = vpop.f32.mrf.mxu0 }
 0x199   : > { %13198 = vst [vmem:[#allocation34_spill] sm:$0xff] %v11400_v0  ;;  %v1062_v0 = vadd.f32 %v11136_v1, %v11134_v46 }
 0x19a   : > { %v11404_v5 = vpop.f32.mrf.mxu1  ;;  %v11406_v37 = vpop.f32.mrf.mxu0 }
 0x19b   : > { %13199 = vst [vmem:[#allocation35_spill] sm:$0xff] %v11404_v5  ;;  %13200 = vst [vmem:[#allocation36_spill] sm:$0xff] %v11406_v37  ;;  %v1078_v5 = vadd.f32 %v11146_v22, %v11144_v27  ;;  %v1427_v37 = vadd.f32 %v11210_v33, %v1062_v0  ;;  %v11440_v27 = vstv %s8077_s4  ;;  %v1439_v33 = vadd.f32 %v11265_v42, %v1110_v55 }
 0x19c   : > { %v11408_v48 = vpop.f32.mrf.mxu1  ;;  %v11410_v26 = vpop.f32.mrf.mxu0  ;;  %v11449_v24 = vadd.s32 1, %v11440_v27  ;;  %vm3703_vm13 = vcmp.ge.s32.totalorder %v11440_v27, 0  ;;  %vm3713_vm14 = vcmp.lt.s32.totalorder %v11440_v27, 16 }
 0x19d   : > { %13201 = vst [vmem:[#allocation37_spill] sm:$0xff] %v11408_v48  ;;  %13202 = vst [vmem:[#allocation38_spill] sm:$0xff] %v11410_v26  ;;  %v1423_v48 = vadd.f32 %v11189_v51, %v1046_v58  ;;  %v1431_v46 = vadd.f32 %v11225_v8, %v1078_v5  ;;  %v1435_v51 = vadd.f32 %v11244_v25, %v1094_v15  ;;  %v11461_v25 = vadd.s32 2, %v11440_v27 }
 0x19e   : > { %v11412_v60 = vpop.f32.mrf.mxu1  ;;  %v11417_v7 = vpop.f32.mrf.mxu0  ;;  %v1719_v21 = vadd.f32 %v11201_v32, %v1427_v37  ;;  %v11465_v32 = vadd.s32 5, %v11440_v27  ;;  %v11468_v58 = vadd.s32 4, %v11440_v27  ;;  %v1731_v37 = vadd.f32 %v11256_v45, %v1439_v33  ;;  %vm11627_vm10 = vmand %vm3703_vm13, %vm3713_vm14 }
 0x19f   : > { %13203 = vst [vmem:[#allocation39_spill] sm:$0xff] %v11412_v60  ;;  %v1715_v22 = vadd.f32 %v11170_v49, %v1423_v48  ;;  %v1723_v40 = vadd.f32 %v11220_v34, %v1431_v46  ;;  %v11458_v49 = vadd.s32 3, %v11440_v27  ;;  %v11471_v34 = vadd.s32 7, %v11440_v27 }
 0x1a0   : > { %v11419_v20 = vpop.f32.mrf.mxu1  ;;  %v11426_v26 = vpop.f32.mrf.mxu0  ;;  %v2197_v42 = vadd.f32 %v11317_v4, %v1719_v21  ;;  %v11481_v4 = vadd.s32 6, %v11440_v27  ;;  %v2512_v46 = vadd.f32 %v11263_v16, %v11272_v31  ;;  %v11490_v45 = vadd.s32 9, %v11440_v27 }
 0x1a1   : > { %13204 = vst [vmem:[#allocation40_spill] sm:$0xff] %v11419_v20  ;;  %v2193_v30 = vadd.f32 %v11290_v36, %v1715_v22  ;;  %v1727_v36 = vadd.f32 %v11237_v44, %v1435_v51  ;;  %v2201_v48 = vadd.f32 %v11338_v11, %v1723_v40  ;;  %v2510_v22 = vadd.f32 %v11269_v47, %v11279_v14  ;;  %v13212_v40 = vld [vmem:[#allocation18_spill] sm:$0xff] }
 0x1a2   : > { %v11428_v60 = vpop.f32.mrf.mxu1  ;;  %v11436_v1 = vpop.f32.mrf.mxu0  ;;  %v2513_v44 = vadd.f32 %v11274_v9, %v11286_v62  ;;  %13205 = vst [vmem:[#allocation41_spill] sm:$0xff] %v11490_v45  ;;  %v2516_v51 = vadd.f32 %v11288_v6, %v11297_v2  ;;  %v2514_v33 = vadd.f32 %v11294_v28, %v11304_v57  ;;  %v11502_v47 = vadd.s32 8, %v11440_v27  ;;  %v13225_v45 = vld [vmem:[#allocation30_spill] sm:$0xff] }
 0x1a3   : > { %v2511_v11 = vadd.f32 %v11281_v18, %v2193_v30  ;;  %v2517_v31 = vadd.f32 %v11299_v13, %v11311_v12  ;;  %v2515_v9 = vadd.f32 %v11306_v56, %v2197_v42  ;;  %v2520_v14 = vadd.f32 %v11313_v61, %v11322_v10  ;;  %v13207_v12 = vld [vmem:[#allocation16_spill] sm:$0xff]  ;;  %v13213_v30 = vld [vmem:[#allocation31_spill] sm:$0xff] }
 0x1a4   : > { %v11438_v20 = vpop.f32.mrf.mxu1  ;;  %v11445_v0 = vpop.f32.mrf.mxu0  ;;  %13206 = vst [vmem:[#allocation42_spill] sm:$0xff] %v11502_v47  ;;  %v2205_v18 = vadd.f32 %v11355_v39, %v1727_v36  ;;  %v2518_v62 = vadd.f32 %v11319_v43, %v11327_v19  ;;  %v2521_v6 = vadd.f32 %v11324_v54, %v11334_v59  ;;  %v2519_v28 = vadd.f32 %v11329_v35, %v2201_v48  ;;  %v13208_v54 = vld [vmem:[#allocation27_spill] sm:$0xff]  ;;  %v13209_v35 = vld [vmem:[#allocation29_spill] sm:$0xff] }
 0x1a5   : > { %v2524_v2 = vadd.f32 %v11336_v50, %v11343_v3  ;;  %v2522_v56 = vadd.f32 %v11340_v38, %v11348_v17  ;;  %v2525_v39 = vadd.f32 %v13207_v12, %v11353_v63  ;;  %v2209_v61 = vadd.f32 %v11374_v29, %v1731_v37  ;;  %v13210_v17 = vld [vmem:[#allocation17_spill] sm:$0xff]  ;;  %v13211_v29 = vld [vmem:[#allocation20_spill] sm:$0xff]  ;;  %v13216_v48 = vld [vmem:[#allocation19_spill] sm:$0xff] }
 0x1a6   : > { %v11455_v8 = vpop.f32.mrf.mxu0  ;;  %v2804_v43 = vadd.f32 %v11376_v53, %v2512_v46  ;;  %vm3704_vm11 = vcmp.ge.s32.totalorder %v11449_v24, 0  ;;  %vm3714_vm12 = vcmp.lt.s32.totalorder %v11449_v24, 16  ;;  %v2802_v10 = vadd.f32 %v11380_v23, %v2510_v22  ;;  %v13214_v36 = vld [vmem:[#allocation33_spill] sm:$0xff]  ;;  %v13215_v23 = vld [vmem:[#allocation22_spill] sm:$0xff] }
 0x1a7   : > { %v2805_v19 = vadd.f32 %v13208_v54, %v2513_v44  ;;  %v2803_v59 = vadd.f32 %v13209_v35, %v2511_v11  ;;  %v2808_v50 = vadd.f32 %v11392_v41, %v2516_v51  ;;  %v2523_v63 = vadd.f32 %v13210_v17, %v2205_v18  ;;  %v13217_v41 = vld [vmem:[#allocation24_spill] sm:$0xff]  ;;  %v13218_v22 = vld [vmem:[#allocation21_spill] sm:$0xff]  ;;  %v13220_v54 = vld [vmem:[#allocation23_spill] sm:$0xff] }
 0x1a8   : > { %v11453_v5 = vpop.f32.mrf.mxu1  ;;  %v11478_v55 = vpop.f32.mrf.mxu0  ;;  %v2528_v53 = vadd.f32 %v13212_v40, %v13211_v29  ;;  %v2806_v42 = vadd.f32 %v13213_v30, %v2514_v33  ;;  %v2809_v37 = vadd.f32 %v13214_v36, %v2517_v31  ;;  %v2526_v46 = vadd.f32 %v13216_v48, %v13215_v23  ;;  %v13219_v51 = vld [vmem:[#allocation36_spill] sm:$0xff]  ;;  %v13221_v33 = vld [vmem:[#allocation25_spill] sm:$0xff]  ;;  %v13222_v31 = vld [vmem:[#allocation38_spill] sm:$0xff] }
 0x1a9   : > { %v2529_v44 = vadd.f32 %v13218_v22, %v13217_v41  ;;  %v2807_v11 = vadd.f32 %v11402_v52, %v2515_v9  ;;  %v2812_v18 = vadd.f32 %v13219_v51, %v2520_v14  ;;  %v2527_v35 = vadd.f32 %v13220_v54, %v2209_v61  ;;  %v13223_v36 = vld [vmem:[#allocation26_spill] sm:$0xff]  ;;  %v13224_v23 = vld [vmem:[#allocation28_spill] sm:$0xff]  ;;  %vm11606_vm6 = vmand %vm3704_vm11, %vm3714_vm12 }
 0x1aa   : > { %v11476_v15 = vpop.f32.mrf.mxu1  ;;  %v11499_v16 = vpop.f32.mrf.mxu0  ;;  %v3282_v17 = vadd.f32 %v13221_v33, %v2804_v43  ;;  %v2810_v29 = vadd.f32 %v13222_v31, %v2518_v62  ;;  %v2813_v40 = vadd.f32 %v11417_v7, %v2521_v6  ;;  %v3280_v47 = vadd.f32 %v13223_v36, %v2802_v10  ;;  %v13226_v22 = vld [vmem:[#allocation32_spill] sm:$0xff]  ;;  %v11557_v14 = vld [vmem:[%s13102_s2] ss:$0 sm:$0xff]  ;;  %v13228_v62 = vld [vmem:[#allocation35_spill] sm:$0xff] }
 0x1ab   : > { %v3283_v48 = vadd.f32 %v13224_v23, %v2805_v19  ;;  %v3281_v41 = vadd.f32 %v13225_v45, %v2803_v59  ;;  %v3286_v52 = vadd.f32 %v13226_v22, %v2808_v50  ;;  %v13227_v61 = vld [vmem:[#allocation34_spill] sm:$0xff]  ;;  %v11561_v51 = vadd.f32 %v13228_v62, %v2809_v37  ;;  %v13229_v10 = vld [vmem:[#allocation37_spill] sm:$0xff]  ;;  %v13230_v45 = vld [vmem:[#allocation39_spill] sm:$0xff] }
 0x1ac   : > { %v11497_v21 = vpop.f32.mrf.mxu1  ;;  %v2787_v13 = vpop.f32.mrf.mxu0  ;;  %v3284_v43 = vadd.f32 %v13227_v61, %v2806_v42  ;;  %v2811_v7 = vadd.f32 %v11426_v26, %v2519_v28  ;;  %v11565_v19 = vadd.f32 %v13229_v10, %v2807_v11  ;;  %v11568_v59 = vadd.f32 %v13230_v45, %v2812_v18  ;;  %v11575_v42 = vld [vmem:[%s13103_s3] ss:$0 sm:$0xff]  ;;  %v13231_v33 = vld [vmem:[#allocation40_spill] sm:$0xff]  ;;  %vm11649_vm12 = vmand %vm4100_vm15, %vm3806_vm8 }
 0x1ad   : > { %v2816_v50 = vadd.f32 %v11436_v1, %v2524_v2  ;;  %v2814_v54 = vadd.f32 %v11445_v0, %v2522_v56  ;;  %v11578_v31 = vadd.f32 %v13231_v33, %v2810_v29  ;;  %v11581_v26 = vadd.f32 %v11428_v60, %v2813_v40 }
 0x1ae   : > { %v11517_v57 = vpop.f32.mrf.mxu1  ;;  %v8912_v3 = vpop.f32.mrf.mxu0  ;;  %v2817_v1 = vadd.f32 %v11455_v8, %v2525_v39  ;;  %v2815_v0 = vadd.f32 %v11478_v55, %v2523_v63  ;;  %v2820_v2 = vadd.f32 %v11499_v16, %v2528_v53  ;;  %v2818_v56 = vadd.f32 %v2787_v13, %v2526_v46 }
 0x1af   : > { %vm3706_vm0 = vcmp.ge.s32.totalorder %v11458_v49, 0  ;;  %vm3716_vm1 = vcmp.lt.s32.totalorder %v11458_v49, 16  ;;  %v11590_v60 = vadd.f32 %v11438_v20, %v2811_v7  ;;  %vm3705_vm3 = vcmp.ge.s32.totalorder %v11461_v25, 0 }
 0x1b0   : > { %v11531_v38 = vpop.f32.mrf.mxu1  ;;  %v2790_v12 = vpop.f32.mrf.mxu0  ;;  %vm3715_vm4 = vcmp.lt.s32.totalorder %v11461_v25, 16  ;;  %v11597_v8 = vadd.f32 %v11453_v5, %v2816_v50  ;;  %v11600_v55 = vadd.f32 %v11476_v15, %v2814_v54  ;;  %v2821_v16 = vadd.f32 %v8912_v3, %v2529_v44  ;;  %vm11660_vm13 = vmand %vm3706_vm0, %vm3716_vm1 }
 0x1b1   : > { %v2819_v13 = vadd.f32 %v2790_v12, %v2527_v35  ;;  %v11613_v15 = vadd.f32 %v11497_v21, %v2817_v1  ;;  %v11616_v3 = vadd.f32 %v11517_v57, %v2815_v0  ;;  %v11619_v24 = vadd.f32 %v11531_v38, %v2820_v2  ;;  %vm11670_vm8 = vmand %vm3705_vm3, %vm3715_vm4 }
 0x1b2   : > { %v3265_v30 = vpop.f32.mrf.mxu1  ;;  %vm3898_vm11 = vsmask.f32 4368  ;;  %vm3708_vm15 = vcmp.ge.s32.totalorder %v11465_v32, 0  ;;  %vm3718_vm0 = vcmp.lt.s32.totalorder %v11465_v32, 16  ;;  %vm3717_vm1 = vcmp.lt.s32.totalorder %v11468_v58, 16 }
 0x1b3   : > { %v8967_v9 = vpop.f32.mrf.mxu0  ;;  %v11621_v44 = vadd.f32 %v3265_v30, %v2818_v56  ;;  %v4109_v56 = vld [vmem:[#allocation2 + $0xc] sm:$0xf]  ;;  %vm11678_vm14 = vmor %vm3774_vm7, %vm3898_vm11  ;;  %vm3707_vm7 = vcmp.ge.s32.totalorder %v11468_v58, 0  ;;  %vm3710_vm4 = vcmp.ge.s32.totalorder %v11471_v34, 0  ;;  %vm3709_vm11 = vcmp.ge.s32.totalorder %v11481_v4, 0 }
 0x1b4   : > { %v3600_v6 = vadd.f32 %v8967_v9, %v3282_v17  ;;  %v8948_v28 = vpop.f32.mrf.mxu1  ;;  %vm11728_vm3 = vmand %vm3708_vm15, %vm3718_vm0 }
 0x1b5   : > { %v3519_v37 = vpop.f32.mrf.mxu0  ;;  %v11635_v30 = vadd.f32 %v8948_v28, %v2821_v16 }
 0x1b6   : > { %v3627_v11 = vmul.f32 %v11557_v14, %v3600_v6  ;;  %v3598_v18 = vadd.f32 %v3519_v37, %v3280_v47  ;;  %v3268_v63 = vpop.f32.mrf.mxu1 }
 0x1b7   : > { %v8968_v17 = vpop.f32.mrf.mxu0 }
 0x1b8   : > { %v3654_v29 = vadd.f32 %v11575_v42, %v3627_v11  ;;  %v3625_v40 = vmul.f32 %v11557_v14, %v3598_v18  ;;  %v3601_v47 = vadd.f32 %v8968_v17, %v3283_v48  ;;  %v11637_v48 = vadd.f32 %v3268_v63, %v2819_v13 }
 0x1b9   : > { %v3522_v39 = vpop.f32.mrf.mxu0 }
 0x1ba   : > { %v3674_v53 = vmax.f32 %v3654_v29, 0.0  ;;  %v3652_v46 = vadd.f32 %v11575_v42, %v3625_v40  ;;  %v3628_v5 = vmul.f32 %v11557_v14, %v3601_v47  ;;  %v3599_v36 = vadd.f32 %v3522_v39, %v3281_v41 }
 0x1bb   : > { %v8971_v35 = vpop.f32.mrf.mxu0 }
 0x1bc   : > { %v3755_v21 = vsel %vm11606_vm6, %v3674_v53, 0.0  ;;  %v3672_v57 = vmax.f32 %v3652_v46, 0.0  ;;  %v3655_v23 = vadd.f32 %v11575_v42, %v3628_v5  ;;  %v3626_v38 = vmul.f32 %v11557_v14, %v3599_v36  ;;  %v4102_v53 = vld [vmem:[#allocation2] sm:$0xf] }
 0x1bd   : > { %v8320_v41 = vpack.c.bf16 %v3755_v21, %v3755_v21  ;;  %v3604_v27 = vadd.f32 %v8971_v35, %v3286_v52  ;;  %v3535_v22 = vpop.f32.mrf.mxu0 }
 0x1be   : > { %v3753_v9 = vsel %vm11627_vm10, %v3672_v57, 0.0  ;;  %v3675_v61 = vmax.f32 %v3655_v23, 0.0  ;;  %v3653_v62 = vadd.f32 %v11575_v42, %v3626_v38  ;;  %v3602_v7 = vadd.f32 %v3535_v22, %v3284_v43 }
 0x1bf   : > { %v3918_v6 = vshrl.u32 %v8320_v41, 16  ;;  %v3921_v10 = vshll.u32 %v8320_v41, 16  ;;  %v8318_v45 = vpack.c.bf16 %v3753_v9, %v3753_v9  ;;  %v3631_v50 = vmul.f32 %v11557_v14, %v3604_v27  ;;  %v8972_v54 = vpop.f32.mrf.mxu0  ;;  %v4113_v41 = vld [vmem:[#allocation2 + $0x14] sm:$0x1] }
 0x1c0   : > { %v3756_v37 = vsel %vm11606_vm6, %v3675_v61, 0.0  ;;  %v3673_v33 = vmax.f32 %v3653_v62, 0.0  ;;  %v3629_v52 = vmul.f32 %v11557_v14, %v3602_v7  ;;  %v3605_v28 = vadd.f32 %v8972_v54, %v11561_v51 }
 0x1c1   : > { %v3920_v11 = vrot.slane %v3918_v6, 7  ;;  %v3901_v43 = vshrl.u32 %v8318_v45, 16  ;;  %v3904_v1 = vshll.u32 %v8318_v45, 16  ;;  %v8321_v0 = vpack.c.bf16 %v3756_v37, %v3756_v37  ;;  %v3538_v2 = vpop.f32.mrf.mxu0 }
 0x1c2   : > { %v3754_v17 = vsel %vm11627_vm10, %v3673_v33, 0.0  ;;  %v3658_v29 = vadd.f32 %v11575_v42, %v3631_v50  ;;  %v3656_v40 = vadd.f32 %v11575_v42, %v3629_v52  ;;  %v3632_v47 = vmul.f32 %v11557_v14, %v3605_v28  ;;  %vm11743_vm10 = vmand %vm3707_vm7, %vm3717_vm1 }
 0x1c3   : > { %v3923_v16 = vor.u32 %v3921_v10, %v3920_v11  ;;  %v3924_v13 = vrot.slane %v3920_v11, 4  ;;  %v3903_v20 = vrot.slane %v3901_v43, 7  ;;  %v3926_v39 = vshrl.u32 %v8321_v0, 16  ;;  %v8975_v49 = vpop.f32.mrf.mxu0  ;;  %v4106_v43 = vld [vmem:[#allocation2 + $0x8] sm:$0x1] }
 0x1c4   : > { %v3929_v46 = vshll.u32 %v8321_v0, 16  ;;  %v8319_v5 = vpack.c.bf16 %v3754_v17, %v3754_v17  ;;  %v3678_v36 = vmax.f32 %v3658_v29, 0.0  ;;  %v3676_v12 = vmax.f32 %v3656_v40, 0.0 }
 0x1c5   : > { %v4110_v35 = vsel %vm11649_vm12, %v3923_v16, %v4109_v56  ;;  %v3906_v21 = vor.u32 %v3904_v1, %v3903_v20  ;;  %v3907_v57 = vrot.slane %v3903_v20, 4  ;;  %v3928_v23 = vrot.slane %v3926_v39, 7  ;;  %v3551_v38 = vpop.f32.mrf.mxu0 }
 0x1c6   : > { %4111 = vst [vmem:[#allocation2 + $0xc] sm:$0xf] %v4110_v35  ;;  %v3909_v27 = vshrl.u32 %v8319_v5, 16  ;;  %v3912_v22 = vshll.u32 %v8319_v5, 16  ;;  %v3759_v9 = vsel %vm11660_vm13, %v3678_v36, 0.0  ;;  %v3757_v61 = vsel %vm11670_vm8, %v3676_v12, 0.0 }
 0x1c7   : > { %v4103_v62 = vsel %vm11649_vm12, %v3906_v21, %v4102_v53  ;;  %v3931_v7 = vor.u32 %v3929_v46, %v3928_v23  ;;  %v3933_v6 = vrot.slane %v3928_v23, 4  ;;  %v8324_v10 = vpack.c.bf16 %v3759_v9, %v3759_v9  ;;  %v8976_v45 = vpop.f32.mrf.mxu0  ;;  %v4123_v46 = vld [vmem:[#allocation2 + $0x24] sm:$0xf]  ;;  %v4116_v21 = vld [vmem:[#allocation2 + $0x18] sm:$0xf] }
 0x1c8   : > { %4104 = vst [vmem:[#allocation2] sm:$0xf] %v4103_v62  ;;  %v3911_v50 = vrot.slane %v3909_v27, 7  ;;  %v8322_v54 = vpack.c.bf16 %v3757_v61, %v3757_v61  ;;  %v3659_v37 = vadd.f32 %v11575_v42, %v3632_v47  ;;  %v3603_v33 = vadd.f32 %v3538_v2, %v11565_v19 }
 0x1c9   : > { %v3932_v52 = vsel %vm11678_vm14, %v3924_v13, %v3931_v7  ;;  %v4114_v11 = vsel %vm11173_vm9, %v3933_v6, %v4113_v41  ;;  %v3952_v1 = vshrl.u32 %v8324_v10, 16  ;;  %v3955_v0 = vshll.u32 %v8324_v10, 16  ;;  %v3554_v56 = vpop.f32.mrf.mxu0 }
 0x1ca   : > { %4112 = vst [vmem:[#allocation2 + $0x10] sm:$0xf] %v3932_v52  ;;  %4115 = vst [vmem:[#allocation2 + $0x14] sm:$0x1] %v4114_v11  ;;  %v3914_v17 = vor.u32 %v3912_v22, %v3911_v50  ;;  %v3916_v29 = vrot.slane %v3911_v50, 4  ;;  %v3935_v40 = vshrl.u32 %v8322_v54, 16  ;;  %v3630_v19 = vmul.f32 %v11557_v14, %v3603_v33 }
 0x1cb   : > { %v3938_v16 = vshll.u32 %v8322_v54, 16  ;;  %v3954_v20 = vrot.slane %v3952_v1, 7  ;;  %v3679_v47 = vmax.f32 %v3659_v37, 0.0  ;;  %v3608_v2 = vadd.f32 %v8975_v49, %v11568_v59  ;;  %v8979_v13 = vpop.f32.mrf.mxu0 }
 0x1cc   : > { %v3915_v39 = vsel %vm11678_vm14, %v3907_v57, %v3914_v17  ;;  %v4107_v53 = vsel %vm11173_vm9, %v3916_v29, %v4106_v43  ;;  %v11704_v5 = vrot.slane %v3935_v40, 7  ;;  %v3606_v36 = vadd.f32 %v3551_v38, %v11578_v31 }
 0x1cd   : > { %4105 = vst [vmem:[#allocation2 + $0x4] sm:$0xf] %v3915_v39  ;;  %4108 = vst [vmem:[#allocation2 + $0x8] sm:$0x1] %v4107_v53  ;;  %v3957_v12 = vor.u32 %v3955_v0, %v3954_v20  ;;  %v3958_v35 = vrot.slane %v3954_v20, 4  ;;  %v3760_v59 = vsel %vm11660_vm13, %v3679_v47, 0.0  ;;  %v3657_v49 = vadd.f32 %v11575_v42, %v3630_v19  ;;  %v3567_v23 = vpop.f32.mrf.mxu0 }
 0x1ce   : > { %v3940_v57 = vor.u32 %v3938_v16, %v11704_v5  ;;  %v3941_v41 = vrot.slane %v11704_v5, 4  ;;  %v8325_v27 = vpack.c.bf16 %v3760_v59, %v3760_v59  ;;  %v3635_v22 = vmul.f32 %v11557_v14, %v3608_v2 }
 0x1cf   : > { %v4124_v31 = vsel %vm11649_vm12, %v3957_v12, %v4123_v46  ;;  %v3677_v38 = vmax.f32 %v3657_v49, 0.0  ;;  %v3633_v9 = vmul.f32 %v11557_v14, %v3606_v36  ;;  %v3609_v61 = vadd.f32 %v8976_v45, %v11581_v26  ;;  %v11717_v51 = vpop.f32.mrf.mxu0  ;;  %v4120_v46 = vld [vmem:[#allocation2 + $0x20] sm:$0x1] }
 0x1d0   : > { %4125 = vst [vmem:[#allocation2 + $0x24] sm:$0xf] %v4124_v31  ;;  %v4117_v62 = vsel %vm11649_vm12, %v3940_v57, %v4116_v21  ;;  %v3960_v7 = vshrl.u32 %v8325_v27, 16  ;;  %v3963_v6 = vshll.u32 %v8325_v27, 16  ;;  %v3662_v10 = vadd.f32 %v11575_v42, %v3635_v22 }
 0x1d1   : > { %4118 = vst [vmem:[#allocation2 + $0x18] sm:$0xf] %v4117_v62  ;;  %v3758_v50 = vsel %vm11670_vm8, %v3677_v38, 0.0  ;;  %v3660_v45 = vadd.f32 %v11575_v42, %v3633_v9  ;;  %v3636_v54 = vmul.f32 %v11557_v14, %v3609_v61  ;;  %v3607_v37 = vadd.f32 %v3554_v56, %v11590_v60  ;;  %v11737_v63 = vpop.f32.mrf.mxu0  ;;  %v4127_v60 = vld [vmem:[#allocation2 + $0x2c] sm:$0x1] }
 0x1d2   : > { %vm3720_vm6 = vcmp.lt.s32.totalorder %v11471_v34, 16  ;;  %v3962_v33 = vrot.slane %v3960_v7, 7  ;;  %v8323_v52 = vpack.c.bf16 %v3758_v50, %v3758_v50  ;;  %v3682_v11 = vmax.f32 %v3662_v10, 0.0  ;;  %v4130_v10 = vld [vmem:[#allocation2 + $0x30] sm:$0xf] }
 0x1d3   : > { %v3612_v43 = vadd.f32 %v8979_v13, %v11597_v8  ;;  %v3680_v1 = vmax.f32 %v3660_v45, 0.0  ;;  %v3663_v0 = vadd.f32 %v11575_v42, %v3636_v54  ;;  %v3634_v56 = vmul.f32 %v11557_v14, %v3607_v37  ;;  %v11756_v2 = vpop.f32.mrf.mxu0  ;;  %vm11780_vm8 = vmand %vm3710_vm4, %vm3720_vm6 }
 0x1d4   : > { %v3610_v17 = vadd.f32 %v3567_v23, %v11600_v55  ;;  %v3965_v29 = vor.u32 %v3963_v6, %v3962_v33  ;;  %v3967_v40 = vrot.slane %v3962_v33, 4  ;;  %v3943_v16 = vshrl.u32 %v8323_v52, 16  ;;  %v4137_v6 = vld [vmem:[#allocation2 + $0x3c] sm:$0xf] }
 0x1d5   : > { %v3946_v20 = vshll.u32 %v8323_v52, 16  ;;  %v3763_v58 = vsel %vm11728_vm3, %v3682_v11, 0.0  ;;  %v3761_v47 = vsel %vm11743_vm10, %v3680_v1, 0.0  ;;  %v3683_v19 = vmax.f32 %v3663_v0, 0.0  ;;  %v3583_v9 = vpop.f32.mrf.mxu0  ;;  %v13251_v0 = vld [vmem:[#allocation41_spill] sm:$0xff] }
 0x1d6   : > { %v3661_v8 = vadd.f32 %v11575_v42, %v3634_v56  ;;  %v3966_v13 = vsel %vm11678_vm14, %v3958_v35, %v3965_v29  ;;  %v4128_v55 = vsel %vm11173_vm9, %v3967_v40, %v4127_v60  ;;  %v3945_v39 = vrot.slane %v3943_v16, 7  ;;  %v4141_v40 = vld [vmem:[#allocation2 + $0x44] sm:$0x1] }
 0x1d7   : > { %v8328_v53 = vpack.c.bf16 %v3763_v58, %v3763_v58  ;;  %4126 = vst [vmem:[#allocation2 + $0x28] sm:$0xf] %v3966_v13  ;;  %4129 = vst [vmem:[#allocation2 + $0x2c] sm:$0x1] %v4128_v55  ;;  %v8326_v36 = vpack.c.bf16 %v3761_v47, %v3761_v47  ;;  %v3764_v12 = vsel %vm11728_vm3, %v3683_v19, 0.0  ;;  %v3639_v59 = vmul.f32 %v11557_v14, %v3612_v43  ;;  %v8984_v56 = vpop.f32.mrf.mxu0  ;;  %v13252_v55 = vld [vmem:[#allocation42_spill] sm:$0xff] }
 0x1d8   : > { %v3681_v21 = vmax.f32 %v3661_v8, 0.0  ;;  %vm3719_vm13 = vcmp.lt.s32.totalorder %v11481_v4, 16  ;;  %v3948_v35 = vor.u32 %v3946_v20, %v3945_v39  ;;  %v3950_v49 = vrot.slane %v3945_v39, 4  ;;  %v4134_v8 = vld [vmem:[#allocation2 + $0x38] sm:$0x1] }
 0x1d9   : > { %v3986_v23 = vshrl.u32 %v8328_v53, 16  ;;  %v3989_v57 = vshll.u32 %v8328_v53, 16  ;;  %v3969_v27 = vshrl.u32 %v8326_v36, 16  ;;  %v3972_v22 = vshll.u32 %v8326_v36, 16  ;;  %vm11813_vm3 = vmand %vm3709_vm11, %vm3719_vm13 }
 0x1da   : > { %v8329_v31 = vpack.c.bf16 %v3764_v12, %v3764_v12  ;;  %v3762_v38 = vsel %vm11743_vm10, %v3681_v21, 0.0  ;;  %v3949_v61 = vsel %vm11678_vm14, %v3941_v41, %v3948_v35  ;;  %v4121_v62 = vsel %vm11173_vm9, %v3950_v49, %v4120_v46  ;;  %v3586_v21 = vpop.f32.mrf.mxu0 }
 0x1db   : > { %v3988_v7 = vrot.slane %v3986_v23, 7  ;;  %v8327_v50 = vpack.c.bf16 %v3762_v38, %v3762_v38  ;;  %4119 = vst [vmem:[#allocation2 + $0x1c] sm:$0xf] %v3949_v61  ;;  %4122 = vst [vmem:[#allocation2 + $0x20] sm:$0x1] %v4121_v62  ;;  %v3971_v26 = vrot.slane %v3969_v27, 7  ;;  %v3666_v37 = vadd.f32 %v11575_v42, %v3639_v59 }
 0x1dc   : > { %v3994_v45 = vshrl.u32 %v8329_v31, 16  ;;  %v3997_v54 = vshll.u32 %v8329_v31, 16  ;;  %vm3712_vm15 = vcmp.ge.s32.totalorder %v13251_v0, 0  ;;  %vm3722_vm0 = vcmp.lt.s32.totalorder %v13251_v0, 16  ;;  %v4151_v62 = vld [vmem:[#allocation2 + $0x54] sm:$0xf] }
 0x1dd   : > { %v3991_v33 = vor.u32 %v3989_v57, %v3988_v7  ;;  %v3992_v52 = vrot.slane %v3988_v7, 4  ;;  %v3977_v5 = vshrl.u32 %v8327_v50, 16  ;;  %v3980_v11 = vshll.u32 %v8327_v50, 16  ;;  %vm11839_vm4 = vmand %vm3712_vm15, %vm3722_vm0 }
 0x1de   : > { %v3974_v32 = vor.u32 %v3972_v22, %v3971_v26  ;;  %v3975_v43 = vrot.slane %v3971_v26, 4  ;;  %v3996_v60 = vrot.slane %v3994_v45, 7  ;;  %v3686_v1 = vmax.f32 %v3666_v37, 0.0  ;;  %v11925_v28 = vld [vmem:[#allocation2 + $0x28] sm:$0xf] }
 0x1df   : > { %v4138_v29 = vsel %vm11649_vm12, %v3991_v33, %v4137_v6  ;;  %v3979_v16 = vrot.slane %v3977_v5, 7  ;;  %v3637_v34 = vmul.f32 %v11557_v14, %v3610_v17  ;;  %v3613_v20 = vadd.f32 %v11717_v51, %v11613_v15 }
 0x1e0   : > { %4139 = vst [vmem:[#allocation2 + $0x3c] sm:$0xf] %v4138_v29  ;;  %v4131_v58 = vsel %vm11649_vm12, %v3974_v32, %v4130_v10  ;;  %v3999_v47 = vor.u32 %v3997_v54, %v3996_v60  ;;  %v4001_v19 = vrot.slane %v3996_v60, 4  ;;  %v3767_v13 = vsel %vm11780_vm8, %v3686_v1, 0.0 }
 0x1e1   : > { %vm3711_vm7 = vcmp.ge.s32.totalorder %v13252_v55, 0  ;;  %vm3721_vm1 = vcmp.lt.s32.totalorder %v13252_v55, 16  ;;  %4132 = vst [vmem:[#allocation2 + $0x30] sm:$0xf] %v4131_v58  ;;  %v3982_v39 = vor.u32 %v3980_v11, %v3979_v16  ;;  %v3984_v17 = vrot.slane %v3979_v16, 4 }
 0x1e2   : > { %v8332_v53 = vpack.c.bf16 %v3767_v13, %v3767_v13  ;;  %v3664_v15 = vadd.f32 %v11575_v42, %v3637_v34  ;;  %v4000_v51 = vsel %vm11678_vm14, %v3992_v52, %v3999_v47  ;;  %v4142_v46 = vsel %vm11173_vm9, %v4001_v19, %v4141_v40  ;;  %vm11851_vm6 = vmand %vm3711_vm7, %vm3721_vm1  ;;  %v4144_v40 = vld [vmem:[#allocation2 + $0x48] sm:$0xf] }
 0x1e3   : > { %v3640_v36 = vmul.f32 %v11557_v14, %v3613_v20  ;;  %v3611_v12 = vadd.f32 %v11737_v63, %v11616_v3  ;;  %4140 = vst [vmem:[#allocation2 + $0x40] sm:$0xf] %v4000_v51  ;;  %4143 = vst [vmem:[#allocation2 + $0x44] sm:$0x1] %v4142_v46  ;;  %v3983_v59 = vsel %vm11678_vm14, %v3975_v43, %v3982_v39  ;;  %v4155_v39 = vld [vmem:[#allocation2 + $0x5c] sm:$0x1] }
 0x1e4   : > { %v4135_v35 = vsel %vm11173_vm9, %v3984_v17, %v4134_v8  ;;  %v4020_v49 = vshrl.u32 %v8332_v53, 16  ;;  %v4023_v23 = vshll.u32 %v8332_v53, 16  ;;  %4133 = vst [vmem:[#allocation2 + $0x34] sm:$0xf] %v3983_v59  ;;  %v3684_v3 = vmax.f32 %v3664_v15, 0.0 }
 0x1e5   : > { %4136 = vst [vmem:[#allocation2 + $0x38] sm:$0x1] %v4135_v35  ;;  %v3667_v63 = vadd.f32 %v11575_v42, %v3640_v36  ;;  %v3638_v27 = vmul.f32 %v11557_v14, %v3611_v12  ;;  %v3616_v22 = vadd.f32 %v11756_v2, %v11619_v24  ;;  %v3614_v38 = vadd.f32 %v3583_v9, %v11621_v44 }
 0x1e6   : > { %v4022_v31 = vrot.slane %v4020_v49, 7  ;;  %v3617_v61 = vadd.f32 %v8984_v56, %v11635_v30  ;;  %v3615_v4 = vadd.f32 %v3586_v21, %v11637_v48  ;;  %v3765_v7 = vsel %vm11813_vm3, %v3684_v3, 0.0 }
 0x1e7   : > { %v3687_v6 = vmax.f32 %v3667_v63, 0.0  ;;  %v3665_v10 = vadd.f32 %v11575_v42, %v3638_v27  ;;  %v3643_v50 = vmul.f32 %v11557_v14, %v3616_v22  ;;  %v8330_v54 = vpack.c.bf16 %v3765_v7, %v3765_v7  ;;  %v4165_v27 = vld [vmem:[#allocation2 + $0x6c] sm:$0xf]  ;;  %v11868_v22 = vld [vmem:[#allocation2 + $0x4] sm:$0xf] }
 0x1e8   : > { %v4025_v26 = vor.u32 %v4023_v23, %v4022_v31  ;;  %v4026_v45 = vrot.slane %v4022_v31, 4  ;;  %v3641_v24 = vmul.f32 %v11557_v14, %v3614_v38  ;;  %v3644_v2 = vmul.f32 %v11557_v14, %v3617_v61  ;;  %v4791_v31 = vld [vmem:[#allocation2] sm:$0xe]  ;;  %v11870_v7 = vld [vmem:[#allocation2 + $0x8] sm:$0x1] }
 0x1e9   : > { %v3768_v44 = vsel %vm11780_vm8, %v3687_v6, 0.0  ;;  %v3685_v30 = vmax.f32 %v3665_v10, 0.0  ;;  %v3670_v48 = vadd.f32 %v11575_v42, %v3643_v50  ;;  %v4003_v37 = vshrl.u32 %v8330_v54, 16  ;;  %v4158_v50 = vld [vmem:[#allocation2 + $0x60] sm:$0xf] }
 0x1ea   : > { %v4152_v9 = vsel %vm11649_vm12, %v4025_v26, %v4151_v62  ;;  %v4006_v33 = vshll.u32 %v8330_v54, 16  ;;  %v8333_v52 = vpack.c.bf16 %v3768_v44, %v3768_v44  ;;  %v3668_v32 = vadd.f32 %v11575_v42, %v3641_v24  ;;  %v4792_v54 = vld [vmem:[#allocation2 + $0xc] sm:$0xe] }
 0x1eb   : > { %4153 = vst [vmem:[#allocation2 + $0x54] sm:$0xf] %v4152_v9  ;;  %v3766_v11 = vsel %vm11813_vm3, %v3685_v30, 0.0  ;;  %v3690_v41 = vmax.f32 %v3670_v48, 0.0  ;;  %v3671_v43 = vadd.f32 %v11575_v42, %v3644_v2  ;;  %v4005_v60 = vrot.slane %v4003_v37, 7 }
 0x1ec   : > { %v4028_v1 = vshrl.u32 %v8333_v52, 16  ;;  %v4031_v56 = vshll.u32 %v8333_v52, 16  ;;  %v8331_v29 = vpack.c.bf16 %v3766_v11, %v3766_v11  ;;  %v3688_v34 = vmax.f32 %v3668_v32, 0.0  ;;  %v4169_v2 = vld [vmem:[#allocation2 + $0x74] sm:$0x1] }
 0x1ed   : > { %v3771_v16 = vsel %vm11839_vm4, %v3690_v41, 0.0  ;;  %v3691_v20 = vmax.f32 %v3671_v43, 0.0  ;;  %v3642_v58 = vmul.f32 %v11557_v14, %v3615_v4  ;;  %v4008_v47 = vor.u32 %v4006_v33, %v4005_v60  ;;  %v4148_v14 = vld [vmem:[#allocation2 + $0x50] sm:$0x1]  ;;  %v11879_v37 = vld [vmem:[#allocation2 + $0x14] sm:$0x1] }
 0x1ee   : > { %v4009_v19 = vrot.slane %v4005_v60, 4  ;;  %v4030_v8 = vrot.slane %v4028_v1, 7  ;;  %v4011_v13 = vshrl.u32 %v8331_v29, 16  ;;  %v4014_v17 = vshll.u32 %v8331_v29, 16  ;;  %v11877_v9 = vld [vmem:[#allocation2 + $0x10] sm:$0xf] }
 0x1ef   : > { %v8336_v53 = vpack.c.bf16 %v3771_v16, %v3771_v16  ;;  %v3769_v55 = vsel %vm11851_vm6, %v3688_v34, 0.0  ;;  %v3772_v15 = vsel %vm11839_vm4, %v3691_v20, 0.0  ;;  %v4145_v51 = vsel %vm11649_vm12, %v4008_v47, %v4144_v40  ;;  %v11889_v16 = vld [vmem:[#allocation2] sm:$0xf] }
 0x1f0   : > { %v4033_v46 = vor.u32 %v4031_v56, %v4030_v8  ;;  %v4035_v36 = vrot.slane %v4030_v8, 4  ;;  %v4013_v12 = vrot.slane %v4011_v13, 7  ;;  %4146 = vst [vmem:[#allocation2 + $0x48] sm:$0xf] %v4145_v51  ;;  %v8334_v35 = vpack.c.bf16 %v3769_v55, %v3769_v55  ;;  %v11902_v55 = vld [vmem:[#allocation2 + $0xc] sm:$0xf] }
 0x1f1   : > { %v4054_v21 = vshrl.u32 %v8336_v53, 16  ;;  %v4057_v59 = vshll.u32 %v8336_v53, 16  ;;  %v8337_v49 = vpack.c.bf16 %v3772_v15, %v3772_v15  ;;  %v8130_v52 = vrot.slane %v4791_v31, 9 }
 0x1f2   : > { %v4034_v23 = vsel %vm11678_vm14, %v4026_v45, %v4033_v46  ;;  %v4156_v57 = vsel %vm11173_vm9, %v4035_v36, %v4155_v39  ;;  %v4016_v3 = vor.u32 %v4014_v17, %v4013_v12  ;;  %v4018_v63 = vrot.slane %v4013_v12, 4 }
 0x1f3   : > { %4154 = vst [vmem:[#allocation2 + $0x58] sm:$0xf] %v4034_v23  ;;  %4157 = vst [vmem:[#allocation2 + $0x5c] sm:$0x1] %v4156_v57  ;;  %v4056_v38 = vrot.slane %v4054_v21, 7  ;;  %v4037_v61 = vshrl.u32 %v8334_v35, 16  ;;  %v3669_v45 = vadd.f32 %v11575_v42, %v3642_v58 }
 0x1f4   : > { %v4040_v4 = vshll.u32 %v8334_v35, 16  ;;  %v4062_v62 = vshrl.u32 %v8337_v49, 16  ;;  %v4017_v6 = vsel %vm11678_vm14, %v4009_v19, %v4016_v3  ;;  %v4149_v10 = vsel %vm11173_vm9, %v4018_v63, %v4148_v14  ;;  %v4162_v35 = vld [vmem:[#allocation2 + $0x68] sm:$0x1] }
 0x1f5   : > { %v4065_v26 = vshll.u32 %v8337_v49, 16  ;;  %4147 = vst [vmem:[#allocation2 + $0x4c] sm:$0xf] %v4017_v6  ;;  %4150 = vst [vmem:[#allocation2 + $0x50] sm:$0x1] %v4149_v10  ;;  %v4059_v24 = vor.u32 %v4057_v59, %v4056_v38  ;;  %v4060_v44 = vrot.slane %v4056_v38, 4 }
 0x1f6   : > { %v4039_v30 = vrot.slane %v4037_v61, 7  ;;  %v4064_v48 = vrot.slane %v4062_v62, 7  ;;  %v3689_v33 = vmax.f32 %v3669_v45, 0.0  ;;  %v4817_v5 = vrot.slane %v11868_v22, 5  ;;  %v9528_v63 = vld [vmem:[#allocation3 + $0x130] sm:$0xff]  }
 0x1f7   : > { %v4820_v11 = vrot.slane %v11870_v7, 5  ;;  %v4166_v42 = vsel %vm11649_vm12, %v4059_v24, %v4165_v27  ;;  %v8131_v47 = vrot.slane %v4792_v54, 9  ;;  %v4824_v8 = vrot.slane %v11877_v9, 5  ;;  %v4793_v62 = vld [vmem:[#allocation2 + $0x18] sm:$0xe] }
 0x1f8   : > { %v4042_v41 = vor.u32 %v4040_v4, %v4039_v30  ;;  %v4043_v32 = vrot.slane %v4039_v30, 4  ;;  %v4067_v43 = vor.u32 %v4065_v26, %v4064_v48  ;;  %4167 = vst [vmem:[#allocation2 + $0x6c] sm:$0xf] %v4166_v42  ;;  %v4069_v60 = vrot.slane %v4064_v48, 4  ;;  %v11913_v4 = vld [vmem:[#allocation2 + $0x1c] sm:$0xf] }
 0x1f9   : > { %v3770_v1 = vsel %vm11851_vm6, %v3689_v33, 0.0  ;;  %v4818_v29 = vsel %vm10210_vm5, %v8130_v52, %v4817_v5  ;;  %v4819_v40 = vrot.slane %v4817_v5, 4  ;;  %v4827_v13 = vrot.slane %v11879_v37, 5  ;;  %v4794_v30 = vld [vmem:[#allocation2 + $0x24] sm:$0xe] }
 0x1fa   : > { %v4159_v34 = vsel %vm11649_vm12, %v4042_v41, %v4158_v50  ;;  %v4068_v20 = vsel %vm11678_vm14, %v4060_v44, %v4067_v43  ;;  %v8335_v58 = vpack.c.bf16 %v3770_v1, %v3770_v1  ;;  %v4170_v0 = vsel %vm11173_vm9, %v4069_v60, %v4169_v2  ;;  %v11921_v44 = vld [vmem:[#allocation2 + $0x20] sm:$0x1]  ;;  %v9614_v2 = vld [vmem:[#allocation3 + $0x138] sm:$0xff]   ;;  %v11929_v42 = vld [vmem:[#allocation2 + $0x18] sm:$0xf] }
 0x1fb   : > { %4160 = vst [vmem:[#allocation2 + $0x60] sm:$0xf] %v4159_v34  ;;  %4168 = vst [vmem:[#allocation2 + $0x70] sm:$0xf] %v4068_v20  ;;  %v4821_v19 = vsel %vm10210_vm5, %v4819_v40, %v4820_v11  ;;  %v4213_v53 = vshrl.u32 %v11889_v16, 16  ;;  %v4825_v15 = vsel %vm10210_vm5, %v8131_v47, %v4824_v8  ;;  %v4826_v51 = vrot.slane %v4824_v8, 4 }
 0x1fc   : > { %4171 = vst [vmem:[#allocation2 + $0x74] sm:$0x1] %v4170_v0  ;;  %v4045_v18 = vshrl.u32 %v8335_v58, 16  ;;  %v4048_v39 = vshll.u32 %v8335_v58, 16  ;;  %v8138_v17 = vcombine.low %v4818_v29, %v4821_v19  ;;  %v4216_v46 = vshll.u32 %v11889_v16, 16  ;;  %v9530_v48 = vld [vmem:[#allocation3 + $0x128] sm:$0xff]  }
 0x1fd   : > { %v4222_v36 = vshll.u32 %v11868_v22, 16  ;;  %v4215_v14 = vrot.slane %v4213_v53, 4  ;;  %v4226_v21 = vshrl.u32 %v11868_v22, 16  ;;  %v4232_v59 = vshll.u32 %v11870_v7, 16  ;;  %v11927_v11 = vld [vmem:[#allocation2 + $0x2c] sm:$0x1] }
 0x1fe   : > { %v4047_v12 = vrot.slane %v4045_v18, 7  ;;  %9065 = vmatprep.mubr.bf16.mxu0 %v8138_v17  ;;  %v4828_v49 = vsel %vm10210_vm5, %v4826_v51, %v4827_v13  ;;  %v4218_v23 = vrot.slane %v4216_v46, 5  ;;  %v4237_v3 = vshrl.u32 %v11902_v55, 16  ;;  %v9532_v51 = vld [vmem:[#allocation3 + $0x120] sm:$0xff]  }
 0x1ff   : > { %v4224_v57 = vrot.slane %v4222_v36, 5  ;;  %v8139_v38 = vcombine.low %v4825_v15, %v4828_v49  ;;  %v4228_v61 = vrot.slane %v4226_v21, 4  ;;  %v4234_v10 = vrot.slane %v4232_v59, 5  ;;  %v11947_v21 = vld [vmem:[#allocation2 + $0x24] sm:$0xf]  ;;  %v9529_v59 = vld [vmem:[#allocation3 + $0x30] sm:$0xff]  }
 0x200   : > { %v4050_v27 = vor.u32 %v4048_v39, %v4047_v12  ;;  %v4052_v31 = vrot.slane %v4047_v12, 4  ;;  %v4219_v6 = vor.u32 %v4218_v23, %v4215_v14  ;;  %v4239_v50 = vrot.slane %v4237_v3, 4 }
 0x201   : > { %v4240_v7 = vshll.u32 %v11902_v55, 16  ;;  %9066 = vmatmul.mubr.bf16.vlgmr.msra.gmra.mxu0 %v8139_v38  ;;  %v4229_v54 = vor.u32 %v4228_v61, %v4224_v57  ;;  %v4246_v24 = vshll.u32 %v11877_v9, 16  ;;  %v4250_v25 = vshrl.u32 %v11877_v9, 16  ;;  %v4795_v38 = vld [vmem:[#allocation2 + $0x30] sm:$0xe] }
 0x202   : > { %v4051_v26 = vsel %vm11678_vm14, %v4043_v32, %v4050_v27  ;;  %v4163_v45 = vsel %vm11173_vm9, %v4052_v31, %v4162_v35  ;;  %9114 = vmatpush3.bf16.msra.mxu0 %v9614_v2  ;;  %v4220_v33 = vrot.slane %v4219_v6, 4  ;;  %v4256_v5 = vshll.u32 %v11879_v37, 16  ;;  %v9534_v61 = vld [vmem:[#allocation3 + $0x118] sm:$0xff]  }
 0x203   : > { %4161 = vst [vmem:[#allocation2 + $0x64] sm:$0xf] %v4051_v26  ;;  %4164 = vst [vmem:[#allocation2 + $0x68] sm:$0x1] %v4163_v45  ;;  %v4242_v52 = vrot.slane %v4240_v7, 5  ;;  %v4230_v41 = vrot.slane %v4229_v54, 4  ;;  %9115 = vmatprep.subr.bf16.mxu0 %v9528_v63 }
 0x204   : > { %v4248_v32 = vrot.slane %v4246_v24, 5  ;;  %v8132_v43 = vrot.slane %v4793_v62, 9  ;;  %v4831_v60 = vrot.slane %v11913_v4, 5  ;;  %v4225_v29 = vsel %vm9986_vm2, %v4220_v33, %v4224_v57  ;;  %v11959_v24 = vld [vmem:[#allocation2 + $0x34] sm:$0xf] }
 0x205   : > { %v4243_v40 = vor.u32 %v4242_v52, %v4239_v50  ;;  %v4252_v34 = vrot.slane %v4250_v25, 4  ;;  %v4258_v20 = vrot.slane %v4256_v5, 5  ;;  %v4235_v37 = vsel %vm9986_vm2, %v4230_v41, %v4234_v10  ;;  %v11964_v33 = vld [vmem:[#allocation2 + $0x38] sm:$0x1]  ;;  %v4796_v52 = vld [vmem:[#allocation2 + $0x3c] sm:$0xe] }
 0x206   : > { %v4832_v58 = vsel %vm10210_vm5, %v8132_v43, %v4831_v60  ;;  %v4833_v47 = vrot.slane %v4831_v60, 4  ;;  %v4834_v0 = vrot.slane %v11921_v44, 5  ;;  %v8098_v19 = vcombine.low %v4225_v29, %v4235_v37  ;;  %9116 = vmatpush3.bf16.msra.mxu0 %v9528_v63  ;;  %v9615_v25 = vld [vmem:[#allocation3 + $0x38] sm:$0xff]   ;;  %v9531_v43 = vld [vmem:[#allocation3 + $0x28] sm:$0xff]  }
 0x207   : > { %v4244_v8 = vrot.slane %v4243_v40, 4  ;;  %v4253_v13 = vor.u32 %v4252_v34, %v4248_v32  ;;  %v8133_v18 = vrot.slane %v4794_v30, 9  ;;  %v4838_v17 = vrot.slane %v11925_v28, 5  ;;  %9117 = vmatprep.subr.bf16.mxu0 %v9530_v48  ;;  %v11967_v29 = vld [vmem:[#allocation2 + $0x40] sm:$0xf] }
 0x208   : > { %v4835_v39 = vsel %vm10210_vm5, %v4833_v47, %v4834_v0  ;;  %v4841_v53 = vrot.slane %v11927_v11, 5  ;;  %v4261_v15 = vshrl.u32 %v11929_v42, 16  ;;  %9001 = vmatprep.mubr.bf16.mxu1 %v8098_v19  ;;  %v4264_v14 = vshll.u32 %v11929_v42, 16 }
 0x209   : > { %v4249_v46 = vsel %vm9986_vm2, %v4244_v8, %v4248_v32  ;;  %v4254_v36 = vrot.slane %v4253_v13, 4  ;;  %v8140_v12 = vcombine.low %v4832_v58, %v4835_v39  ;;  %v4839_v35 = vsel %vm10210_vm5, %v8133_v18, %v4838_v17  ;;  %v11970_v58 = vld [vmem:[#allocation2 + $0x44] sm:$0x1]  ;;  %v9536_v8 = vld [vmem:[#allocation3 + $0x110] sm:$0xff]  }
 0x20a   : > { %v4840_v49 = vrot.slane %v4838_v17, 4  ;;  %v4263_v23 = vrot.slane %v4261_v15, 4  ;;  %v4270_v57 = vshll.u32 %v11913_v4, 16  ;;  %9118 = vmatpush3.bf16.msra.mxu0 %v9530_v48  ;;  %v4266_v63 = vrot.slane %v4264_v14, 5 }
 0x20b   : > { %v4259_v3 = vsel %vm9986_vm2, %v4254_v36, %v4258_v20  ;;  %9069 = vmatprep.mubr.bf16.mxu0 %v8140_v12  ;;  %v4274_v27 = vshrl.u32 %v11913_v4, 16  ;;  %v4280_v31 = vshll.u32 %v11921_v44, 16  ;;  %v4285_v50 = vshrl.u32 %v11947_v21, 16  ;;  %9119 = vmatprep.subr.bf16.mxu0 %v9532_v51 }
 0x20c   : > { %v8099_v62 = vcombine.low %v4249_v46, %v4259_v3  ;;  %v4842_v6 = vsel %vm10210_vm5, %v4840_v49, %v4841_v53  ;;  %v4272_v10 = vrot.slane %v4270_v57, 5  ;;  %v4267_v26 = vor.u32 %v4266_v63, %v4263_v23  ;;  %v11977_v53 = vld [vmem:[#allocation2 + $0x30] sm:$0xf]  ;;  %v9533_v23 = vld [vmem:[#allocation3 + $0x20] sm:$0xff]  }
 0x20d   : > { %v8141_v7 = vcombine.low %v4839_v35, %v4842_v6  ;;  %v4276_v45 = vrot.slane %v4274_v27, 4  ;;  %v4282_v54 = vrot.slane %v4280_v31, 5  ;;  %v4287_v30 = vrot.slane %v4285_v50, 4  ;;  %v9538_v27 = vld [vmem:[#allocation3 + $0x108] sm:$0xff]   ;;  %v11994_v6 = vld [vmem:[#allocation2 + $0x3c] sm:$0xf] }
 0x20e   : > { %9002 = vmatmul.mubr.bf16.vlgmr.msra.gmra.mxu1 %v8099_v62  ;;  %v4288_v44 = vshll.u32 %v11947_v21, 16  ;;  %v4294_v48 = vshll.u32 %v11925_v28, 16  ;;  %v4298_v2 = vshrl.u32 %v11925_v28, 16  ;;  %v4268_v5 = vrot.slane %v4267_v26, 4  ;;  %9120 = vmatpush3.bf16.msra.mxu0 %v9532_v51 }
 0x20f   : > { %9018 = vmatpush3.bf16.msra.mxu1 %v9615_v25  ;;  %9070 = vmatmul.mubr.bf16.gmra.mxu0 %v8141_v7  ;;  %v4277_v41 = vor.u32 %v4276_v45, %v4272_v10  ;;  %v4304_v32 = vshll.u32 %v11927_v11, 16  ;;  %v8134_v60 = vrot.slane %v4795_v38, 9  ;;  %v4845_v37 = vrot.slane %v11959_v24, 5  ;;  %v9535_v45 = vld [vmem:[#allocation3 + $0x18] sm:$0xff]  }
 0x210   : > { %9019 = vmatprep.subr.bf16.mxu1 %v9529_v59  ;;  %v4290_v40 = vrot.slane %v4288_v44, 5  ;;  %v4296_v34 = vrot.slane %v4294_v48, 5  ;;  %v4300_v20 = vrot.slane %v4298_v2, 4  ;;  %v4273_v47 = vsel %vm9986_vm2, %v4268_v5, %v4272_v10  ;;  %9121 = vmatprep.subr.bf16.mxu0 %v9534_v61  ;;  %v4797_v2 = vld [vmem:[#allocation2 + $0x48] sm:$0xe] }
 0x211   : > { %v4278_v0 = vrot.slane %v4277_v41, 4  ;;  %v4306_v19 = vrot.slane %v4304_v32, 5  ;;  %v4848_v11 = vrot.slane %v11964_v33, 5  ;;  %v4846_v39 = vsel %vm10210_vm5, %v8134_v60, %v4845_v37  ;;  %v4798_v60 = vld [vmem:[#allocation2 + $0x54] sm:$0xe] }
 0x212   : > { %v4291_v13 = vor.u32 %v4290_v40, %v4287_v30  ;;  %v4301_v18 = vor.u32 %v4300_v20, %v4296_v34  ;;  %v4847_v17 = vrot.slane %v4845_v37, 4  ;;  %v8135_v51 = vrot.slane %v4796_v52, 9  ;;  %9122 = vmatpush3.bf16.msra.mxu0 %v9534_v61  ;;  %v9540_v52 = vld [vmem:[#allocation3 + $0x100] sm:$0xff]   ;;  %v12007_v37 = vld [vmem:[#allocation2 + $0x50] sm:$0x1] }
 0x213   : > { %9020 = vmatpush3.bf16.msra.mxu1 %v9529_v59  ;;  %v4283_v15 = vsel %vm9986_vm2, %v4278_v0, %v4282_v54  ;;  %v4852_v46 = vrot.slane %v11967_v29, 5  ;;  %v4855_v36 = vrot.slane %v11970_v58, 5  ;;  %v4309_v63 = vshrl.u32 %v11977_v53, 16  ;;  %9123 = vmatprep.subr.bf16.mxu0 %v9536_v8 }
 0x214   : > { %v8100_v12 = vcombine.low %v4273_v47, %v4283_v15  ;;  %v4292_v14 = vrot.slane %v4291_v13, 4  ;;  %v4302_v35 = vrot.slane %v4301_v18, 4  ;;  %9021 = vmatprep.subr.bf16.mxu1 %v9531_v43  ;;  %v4849_v49 = vsel %vm10210_vm5, %v4847_v17, %v4848_v11  ;;  %v9537_v15 = vld [vmem:[#allocation3 + $0x10] sm:$0xff]  }
 0x215   : > { %v8142_v57 = vcombine.low %v4846_v39, %v4849_v49  ;;  %v4853_v59 = vsel %vm10210_vm5, %v8135_v51, %v4852_v46  ;;  %v4854_v3 = vrot.slane %v4852_v46, 4  ;;  %v4312_v62 = vshll.u32 %v11977_v53, 16  ;;  %v12017_v49 = vld [vmem:[#allocation2 + $0x5c] sm:$0x1] }
 0x216   : > { %9005 = vmatprep.mubr.bf16.mxu1 %v8100_v12  ;;  %v4297_v31 = vsel %vm9986_vm2, %v4292_v14, %v4296_v34  ;;  %v4307_v38 = vsel %vm9986_vm2, %v4302_v35, %v4306_v19  ;;  %v4318_v61 = vshll.u32 %v11959_v24, 16  ;;  %v4311_v7 = vrot.slane %v4309_v63, 4  ;;  %9124 = vmatpush3.bf16.msra.mxu0 %v9536_v8  ;;  %v12009_v8 = vld [vmem:[#allocation2 + $0x58] sm:$0xf]  ;;  %v12013_v12 = vld [vmem:[#allocation3 + $0x1b8] sm:$0xff]  }
 0x217   : > { %v8101_v10 = vcombine.low %v4297_v31, %v4307_v38  ;;  %9022 = vmatpush3.bf16.msra.mxu1 %v9531_v43  ;;  %9073 = vmatprep.mubr.bf16.mxu0 %v8142_v57  ;;  %v4856_v50 = vsel %vm10210_vm5, %v4854_v3, %v4855_v36  ;;  %v4322_v26 = vshrl.u32 %v11959_v24, 16  ;;  %v4314_v30 = vrot.slane %v4312_v62, 5  ;;  %v12003_v43 = vld [vmem:[#allocation2 + $0x4c] sm:$0xf]  ;;  %v12024_v38 = vld [vmem:[#allocation2 + $0x10] sm:$0xf] }
 0x218   : > { %9023 = vmatprep.subr.bf16.mxu1 %v9533_v23  ;;  %v8143_v54 = vcombine.low %v4853_v59, %v4856_v50  ;;  %v4320_v44 = vrot.slane %v4318_v61, 5  ;;  %v4328_v48 = vshll.u32 %v11964_v33, 16  ;;  %v4333_v5 = vshrl.u32 %v11994_v6, 16  ;;  %9125 = vmatprep.subr.bf16.mxu0 %v9538_v27  ;;  %v5324_v59 = vld [vmem:[#allocation2 + $0xc] sm:$0xf] }
 0x219   : > { %9006 = vmatmul.mubr.bf16.gmra.mxu1 %v8101_v10  ;;  %v4324_v25 = vrot.slane %v4322_v26, 4  ;;  %v4336_v41 = vshll.u32 %v11994_v6, 16  ;;  %v4342_v32 = vshll.u32 %v11967_v29, 16  ;;  %v4315_v40 = vor.u32 %v4314_v30, %v4311_v7  ;;  %v9539_v7 = vld [vmem:[#allocation3 + $0x8] sm:$0xff]   ;;  %v12033_v30 = vld [vmem:[#allocation2 + $0x14] sm:$0x1] }
 0x21a   : > { %9074 = vmatmul.mubr.bf16.gmra.mxu0 %v8143_v54  ;;  %v4330_v34 = vrot.slane %v4328_v48, 5  ;;  %v4346_v33 = vshrl.u32 %v11967_v29, 16  ;;  %v4352_v20 = vshll.u32 %v11970_v58, 16  ;;  %v4335_v0 = vrot.slane %v4333_v5, 4  ;;  %v12039_v5 = vld [vmem:[#allocation2 + $0x48] sm:$0xf] }
 0x21b   : > { %9024 = vmatpush3.bf16.msra.mxu1 %v9533_v23  ;;  %v4325_v47 = vor.u32 %v4324_v25, %v4320_v44  ;;  %v4338_v19 = vrot.slane %v4336_v41, 5  ;;  %v4344_v11 = vrot.slane %v4342_v32, 5  ;;  %v4316_v13 = vrot.slane %v4315_v40, 4  ;;  %9126 = vmatpush3.bf16.msra.mxu0 %v9538_v27 }
 0x21c   : > { %v4348_v18 = vrot.slane %v4346_v33, 4  ;;  %v4354_v39 = vrot.slane %v4352_v20, 5  ;;  %9025 = vmatprep.subr.bf16.mxu1 %v9535_v45  ;;  %v8136_v17 = vrot.slane %v4797_v2, 9  ;;  %v4859_v58 = vrot.slane %v12003_v43, 5  ;;  %9127 = vmatprep.subr.bf16.mxu0 %v9540_v52 }
 0x21d   : > { %v4326_v51 = vrot.slane %v4325_v47, 4  ;;  %v4339_v46 = vor.u32 %v4338_v19, %v4335_v0  ;;  %v4862_v36 = vrot.slane %v12007_v37, 5  ;;  %v4321_v14 = vsel %vm9986_vm2, %v4316_v13, %v4320_v44  ;;  %v9542_v0 = vld [vmem:[#allocation3] sm:$0xff]  }
 0x21e   : > { %v4349_v35 = vor.u32 %v4348_v18, %v4344_v11  ;;  %v8137_v23 = vrot.slane %v4798_v60, 9  ;;  %v4866_v57 = vrot.slane %v12009_v8, 5  ;;  %v4860_v27 = vsel %vm10210_vm5, %v8136_v17, %v4859_v58 }
 0x21f   : > { %v4331_v3 = vsel %vm9986_vm2, %v4326_v51, %v4330_v34  ;;  %v4340_v63 = vrot.slane %v4339_v46, 4  ;;  %9026 = vmatpush3.bf16.msra.mxu1 %v9535_v45  ;;  %v4861_v31 = vrot.slane %v4859_v58, 4  ;;  %9128 = vmatpush3.bf16.msra.mxu0 %v9540_v52  ;;  %v4869_v54 = vrot.slane %v12017_v49, 5 }
 0x220   : > { %v8102_v62 = vcombine.low %v4321_v14, %v4331_v3  ;;  %v4350_v61 = vrot.slane %v4349_v35, 4  ;;  %9027 = vmatprep.subr.bf16.mxu1 %v9537_v15  ;;  %v4867_v10 = vsel %vm10210_vm5, %v8137_v23, %v4866_v57  ;;  %v4868_v50 = vrot.slane %v4866_v57, 4  ;;  %9177 = vmatprep.subr.bf16.mxu0 %v12013_v12 }
 0x221   : > { %v4345_v26 = vsel %vm9986_vm2, %v4340_v63, %v4344_v11  ;;  %v4863_v45 = vsel %vm10210_vm5, %v4861_v31, %v4862_v36  ;;  %v5349_v44 = vshrl.u32 %v5324_v59, 16  ;;  %v5352_v25 = vshll.u32 %v5324_v59, 16  ;;  %v12053_v63 = vld [vmem:[#allocation3 + $0xf8] sm:$0xff]  }
 0x222   : > { %9009 = vmatprep.mubr.bf16.mxu1 %v8102_v62  ;;  %v4355_v48 = vsel %vm9986_vm2, %v4350_v61, %v4354_v39  ;;  %v8144_v2 = vcombine.low %v4860_v27, %v4863_v45  ;;  %v5358_v52 = vshll.u32 %v12024_v38, 16  ;;  %v4870_v32 = vsel %vm10210_vm5, %v4868_v50, %v4869_v54  ;;  %v12048_v39 = vld [vmem:[#allocation2 + $0x54] sm:$0xf] }
 0x223   : > { %v8103_v41 = vcombine.low %v4345_v26, %v4355_v48  ;;  %9028 = vmatpush3.bf16.msra.mxu1 %v9537_v15  ;;  %v5351_v60 = vrot.slane %v5349_v44, 4  ;;  %v5362_v40 = vshrl.u32 %v12024_v38, 16  ;;  %v8145_v34 = vcombine.low %v4867_v10, %v4870_v32  ;;  %v5327_v26 = vld [vmem:[#allocation2 + $0x18] sm:$0xf]  ;;  %v12063_v32 = vld [vmem:[#allocation2 + $0x1c] sm:$0xf] }
 0x224   : > { %9077 = vmatprep.mubr.bf16.mxu0 %v8144_v2  ;;  %v5354_v33 = vrot.slane %v5352_v25, 5  ;;  %v5360_v20 = vrot.slane %v5358_v52, 5  ;;  %v5368_v47 = vshll.u32 %v12033_v30, 16  ;;  %9029 = vmatprep.subr.bf16.mxu1 %v9539_v7  ;;  %v4357_v11 = vshrl.u32 %v12039_v5, 16 }
 0x225   : > { %9010 = vmatmul.mubr.bf16.gmra.mxu1 %v8103_v41  ;;  %v5364_v19 = vrot.slane %v5362_v40, 4  ;;  %v4360_v13 = vshll.u32 %v12039_v5, 16  ;;  %v4366_v18 = vshll.u32 %v12003_v43, 16  ;;  %9078 = vmatmul.mubr.bf16.gmra.mxu0 %v8145_v34  ;;  %v4370_v51 = vshrl.u32 %v12003_v43, 16 }
 0x226   : > { %v5355_v17 = vor.u32 %v5354_v33, %v5351_v60  ;;  %v5370_v15 = vrot.slane %v5368_v47, 5  ;;  %v4376_v46 = vshll.u32 %v12007_v37, 16  ;;  %v4359_v36 = vrot.slane %v4357_v11, 4 }
 0x227   : > { %v5365_v58 = vor.u32 %v5364_v19, %v5360_v20  ;;  %v4362_v14 = vrot.slane %v4360_v13, 5  ;;  %v4368_v35 = vrot.slane %v4366_v18, 5  ;;  %9030 = vmatpush3.bf16.msra.mxu1 %v9539_v7  ;;  %v4372_v57 = vrot.slane %v4370_v51, 4  ;;  %v5330_v19 = vld [vmem:[#allocation2 + $0x24] sm:$0xf] }
 0x228   : > { %v5356_v23 = vrot.slane %v5355_v17, 4  ;;  %v4378_v59 = vrot.slane %v4376_v46, 5  ;;  %v4381_v3 = vshrl.u32 %v12048_v39, 16  ;;  %9031 = vmatprep.subr.bf16.mxu1 %v9542_v0  ;;  %v4384_v62 = vshll.u32 %v12048_v39, 16 }
 0x229   : > { %v5366_v27 = vrot.slane %v5365_v58, 4  ;;  %v4363_v31 = vor.u32 %v4362_v14, %v4359_v36  ;;  %v4390_v61 = vshll.u32 %v12009_v8, 16  ;;  %v4373_v10 = vor.u32 %v4372_v57, %v4368_v35  ;;  %v12076_v36 = vld [vmem:[#allocation2 + $0x28] sm:$0xf] }
 0x22a   : > { %v5361_v37 = vsel %vm9986_vm2, %v5356_v23, %v5360_v20  ;;  %v4383_v50 = vrot.slane %v4381_v3, 4  ;;  %v4394_v7 = vshrl.u32 %v12009_v8, 16  ;;  %v4386_v44 = vrot.slane %v4384_v62, 5 }
 0x22b   : > { %v5371_v45 = vsel %vm9986_vm2, %v5366_v27, %v5370_v15  ;;  %v4364_v54 = vrot.slane %v4363_v31, 4  ;;  %v4392_v48 = vrot.slane %v4390_v61, 5  ;;  %9032 = vmatpush3.bf16.msra.mxu1 %v9542_v0  ;;  %v4374_v25 = vrot.slane %v4373_v10, 4  ;;  %v12072_v0 = vld [vmem:[#allocation2 + $0x20] sm:$0x1] }
 0x22c   : > { %v8170_v2 = vcombine.low %v5361_v37, %v5371_v45  ;;  %v4396_v52 = vrot.slane %v4394_v7, 4  ;;  %v4400_v41 = vshll.u32 %v12017_v49, 16  ;;  %9081 = vmatprep.subr.bf16.mxu1 %v12053_v63  ;;  %v4387_v40 = vor.u32 %v4386_v44, %v4383_v50  ;;  %v5333_v10 = vld [vmem:[#allocation2 + $0x30] sm:$0xf] }
 0x22d   : > { %v4369_v60 = vsel %vm9986_vm2, %v4364_v54, %v4368_v35  ;;  %v5373_v34 = vshrl.u32 %v5327_v26, 16  ;;  %v4379_v33 = vsel %vm9986_vm2, %v4374_v25, %v4378_v59  ;;  %v8114_v47 = vcombine.low %v11889_v16, %v11868_v22  ;;  %v12079_v16 = vld [vmem:[#allocation2 + $0x2c] sm:$0x1]  ;;  %v12088_v54 = vld [vmem:[#allocation2 + $0x34] sm:$0xf] }
 0x22e   : > { %9129 = vmatprep.mubr.bf16.mxu0 %v8170_v2  ;;  %v4397_v20 = vor.u32 %v4396_v52, %v4392_v48  ;;  %v5376_v49 = vshll.u32 %v5327_v26, 16  ;;  %v8104_v11 = vcombine.low %v4369_v60, %v4379_v33  ;;  %v4388_v13 = vrot.slane %v4387_v40, 4 }
 0x22f   : > { %v5375_v18 = vrot.slane %v5373_v34, 4  ;;  %v5382_v17 = vshll.u32 %v12063_v32, 16  ;;  %v4402_v51 = vrot.slane %v4400_v41, 5  ;;  %v5386_v58 = vshrl.u32 %v12063_v32, 16  ;;  %v12096_v34 = vld [vmem:[#allocation2 + $0x38] sm:$0x1] }
 0x230   : > { %v4398_v15 = vrot.slane %v4397_v20, 4  ;;  %v5378_v46 = vrot.slane %v5376_v49, 5  ;;  %9013 = vmatprep.mubr.bf16.mxu1 %v8104_v11  ;;  %v5392_v22 = vshll.u32 %v12072_v0, 16  ;;  %v5397_v35 = vshrl.u32 %v5330_v19, 16 }
 0x231   : > { %v5384_v14 = vrot.slane %v5382_v17, 5  ;;  %v5400_v23 = vshll.u32 %v5330_v19, 16  ;;  %v4393_v57 = vsel %vm9986_vm2, %v4388_v13, %v4392_v48  ;;  %v5388_v27 = vrot.slane %v5386_v58, 4  ;;  %v5336_v13 = vld [vmem:[#allocation2 + $0x3c] sm:$0xf] }
 0x232   : > { %v4403_v59 = vsel %vm9986_vm2, %v4398_v15, %v4402_v51  ;;  %v5379_v3 = vor.u32 %v5378_v46, %v5375_v18  ;;  %v5399_v62 = vrot.slane %v5397_v35, 4  ;;  %v5406_v37 = vshll.u32 %v12076_v36, 16  ;;  %v12102_v18 = vld [vmem:[#allocation2 + $0x40] sm:$0xf]  ;;  %v9546_v15 = vld [vmem:[#allocation3 + $0x1b0] sm:$0xff]  }
 0x233   : > { %v8105_v31 = vcombine.low %v4393_v57, %v4403_v59  ;;  %v5402_v61 = vrot.slane %v5400_v23, 5  ;;  %v5389_v7 = vor.u32 %v5388_v27, %v5384_v14  ;;  %v5410_v26 = vshrl.u32 %v12076_v36, 16  ;;  %v12105_v46 = vld [vmem:[#allocation2 + $0x44] sm:$0x1]  ;;  %v9548_v23 = vld [vmem:[#allocation3 + $0xf0] sm:$0xff]  }
 0x234   : > { %v5380_v50 = vrot.slane %v5379_v3, 4  ;;  %v5416_v45 = vshll.u32 %v12079_v16, 16  ;;  %v5394_v44 = vrot.slane %v5392_v22, 5  ;;  %v5408_v2 = vrot.slane %v5406_v37, 5 }
 0x235   : > { %9014 = vmatmul.mubr.bf16.gmra.mxu1 %v8105_v31  ;;  %v5403_v48 = vor.u32 %v5402_v61, %v5399_v62  ;;  %v8115_v25 = vcombine.low %v11902_v55, %v11877_v9  ;;  %v5390_v41 = vrot.slane %v5389_v7, 4  ;;  %v5412_v60 = vrot.slane %v5410_v26, 4  ;;  %v9549_v26 = vld [vmem:[#allocation3 + $0x1a8] sm:$0xff]  }
 0x236   : > { %9033 = vmatprep.mubr.bf16.mxu1 %v8114_v47  ;;  %v5385_v52 = vsel %vm9986_vm2, %v5380_v50, %v5384_v14  ;;  %v8116_v40 = vcombine.low %v11929_v42, %v11913_v4  ;;  %v5421_v20 = vshrl.u32 %v5333_v10, 16  ;;  %v5424_v49 = vshll.u32 %v5333_v10, 16  ;;  %v5339_v10 = vld [vmem:[#allocation2 + $0x48] sm:$0xf] }
 0x237   : > { %v5404_v33 = vrot.slane %v5403_v48, 4  ;;  %v5430_v19 = vshll.u32 %v12088_v54, 16  ;;  %v5395_v11 = vsel %vm9986_vm2, %v5390_v41, %v5394_v44  ;;  %v5413_v9 = vor.u32 %v5412_v60, %v5408_v2  ;;  %v12116_v41 = vld [vmem:[#allocation2 + $0x4c] sm:$0xf] }
 0x238   : > { %v5418_v55 = vrot.slane %v5416_v45, 5  ;;  %v5434_v47 = vshrl.u32 %v12088_v54, 16  ;;  %v8171_v17 = vcombine.low %v5385_v52, %v5395_v11  ;;  %v5423_v4 = vrot.slane %v5421_v20, 4  ;;  %v9551_v20 = vld [vmem:[#allocation3 + $0xe8] sm:$0xff]   ;;  %v12124_v11 = vld [vmem:[#allocation2 + $0x50] sm:$0x1] }
 0x239   : > { %v5426_v42 = vrot.slane %v5424_v49, 5  ;;  %v5440_v51 = vshll.u32 %v12096_v34, 16  ;;  %v5409_v58 = vsel %vm9986_vm2, %v5404_v33, %v5408_v2  ;;  %v5414_v14 = vrot.slane %v5413_v9, 4 }
 0x23a   : > { %v5432_v22 = vrot.slane %v5430_v19, 5  ;;  %v5436_v35 = vrot.slane %v5434_v47, 4  ;;  %9130 = vmatmul.mubr.bf16.vlgmr.msra.gmra.mxu0 %v8171_v17  ;;  %v5445_v59 = vshrl.u32 %v5336_v13, 16  ;;  %v5448_v3 = vshll.u32 %v5336_v13, 16  ;;  %v9552_v17 = vld [vmem:[#allocation3 + $0x1a0] sm:$0xff]  }
 0x23b   : > { %v5427_v57 = vor.u32 %v5426_v42, %v5423_v4  ;;  %v5454_v27 = vshll.u32 %v12102_v18, 16  ;;  %v5419_v31 = vsel %vm9986_vm2, %v5414_v14, %v5418_v55  ;;  %9178 = vmatpush3.bf16.msra.mxu0 %v12013_v12  ;;  %v5458_v61 = vshrl.u32 %v12102_v18, 16  ;;  %v5342_v55 = vld [vmem:[#allocation2 + $0x54] sm:$0xf] }
 0x23c   : > { %v5437_v62 = vor.u32 %v5436_v35, %v5432_v22  ;;  %v5464_v37 = vshll.u32 %v12105_v46, 16  ;;  %v8172_v50 = vcombine.low %v5409_v58, %v5419_v31  ;;  %9179 = vmatprep.subr.bf16.mxu0 %v9546_v15  ;;  %v5447_v45 = vrot.slane %v5445_v59, 4 }
 0x23d   : > { %9034 = vmatmul.mubr.bf16.vlgmr.msra.gmra.mxu1 %v8115_v25  ;;  %v5428_v7 = vrot.slane %v5427_v57, 4  ;;  %v5450_v44 = vrot.slane %v5448_v3, 5  ;;  %v5442_v2 = vrot.slane %v5440_v51, 5  ;;  %v5456_v52 = vrot.slane %v5454_v27, 5  ;;  %v12137_v27 = vld [vmem:[#allocation2 + $0x5c] sm:$0x1] }
 0x23e   : > { %9037 = vmatprep.mubr.bf16.mxu1 %v8116_v40  ;;  %9082 = vmatpush3.bf16.msra.mxu1 %v12053_v63  ;;  %v5438_v48 = vrot.slane %v5437_v62, 4  ;;  %v5460_v12 = vrot.slane %v5458_v61, 4  ;;  %v5466_v33 = vrot.slane %v5464_v37, 5  ;;  %v5469_v49 = vshrl.u32 %v5339_v10, 16  ;;  %v9555_v62 = vld [vmem:[#allocation3 + $0x198] sm:$0xff]  }
 0x23f   : > { %9133 = vmatprep.mubr.bf16.mxu0 %v8172_v50  ;;  %9083 = vmatprep.subr.bf16.mxu1 %v9548_v23  ;;  %v5433_v60 = vsel %vm9986_vm2, %v5428_v7, %v5432_v22  ;;  %v5451_v25 = vor.u32 %v5450_v44, %v5447_v45  ;;  %v8117_v19 = vcombine.low %v11947_v21, %v11925_v28  ;;  %v5472_v9 = vshll.u32 %v5339_v10, 16  ;;  %v12130_v28 = vld [vmem:[#allocation2 + $0x58] sm:$0xf]  ;;  %v5345_v44 = vld [vmem:[#allocation2 + $0x60] sm:$0xf] }
 0x240   : > { %9180 = vmatpush3.bf16.msra.mxu0 %v9546_v15  ;;  %v5443_v40 = vsel %vm9986_vm2, %v5438_v48, %v5442_v2  ;;  %v5461_v63 = vor.u32 %v5460_v12, %v5456_v52  ;;  %v5471_v4 = vrot.slane %v5469_v49, 4  ;;  %v5478_v42 = vshll.u32 %v12116_v41, 16  ;;  %v9554_v21 = vld [vmem:[#allocation3 + $0xe0] sm:$0xff]  }
 0x241   : > { %v8173_v47 = vcombine.low %v5433_v60, %v5443_v40  ;;  %9181 = vmatprep.subr.bf16.mxu0 %v9549_v26  ;;  %v5452_v13 = vrot.slane %v5451_v25, 4  ;;  %v8118_v51 = vcombine.low %v11977_v53, %v11959_v24  ;;  %v5474_v58 = vrot.slane %v5472_v9, 5  ;;  %v9557_v60 = vld [vmem:[#allocation3 + $0xd8] sm:$0xff]  }
 0x242   : > { %9084 = vmatpush3.bf16.msra.mxu1 %v9548_v23  ;;  %v5462_v15 = vrot.slane %v5461_v63, 4  ;;  %v5482_v14 = vshrl.u32 %v12116_v41, 16  ;;  %v5480_v22 = vrot.slane %v5478_v42, 5  ;;  %v5488_v35 = vshll.u32 %v12124_v11, 16  ;;  %v12150_v63 = vld [vmem:[#allocation2 + $0x68] sm:$0x1] }
 0x243   : > { %9134 = vmatmul.mubr.bf16.gmra.mxu0 %v8173_v47  ;;  %9085 = vmatprep.subr.bf16.mxu1 %v9551_v20  ;;  %v5493_v57 = vshrl.u32 %v5342_v55, 16  ;;  %v5496_v59 = vshll.u32 %v5342_v55, 16  ;;  %v5457_v23 = vsel %vm9986_vm2, %v5452_v13, %v5456_v52  ;;  %v5475_v24 = vor.u32 %v5474_v58, %v5471_v4 }
 0x244   : > { %v5467_v3 = vsel %vm9986_vm2, %v5462_v15, %v5466_v33  ;;  %9182 = vmatpush3.bf16.msra.mxu0 %v9549_v26  ;;  %v5484_v53 = vrot.slane %v5482_v14, 4  ;;  %v5502_v10 = vshll.u32 %v12130_v28, 16  ;;  %v5506_v45 = vshrl.u32 %v12130_v28, 16  ;;  %v12141_v26 = vld [vmem:[#allocation2 + $0x64] sm:$0xf] }
 0x245   : > { %v8174_v31 = vcombine.low %v5457_v23, %v5467_v3  ;;  %9038 = vmatmul.mubr.bf16.gmra.mxu1 %v8117_v19  ;;  %9183 = vmatprep.subr.bf16.mxu0 %v9552_v17  ;;  %v5495_v61 = vrot.slane %v5493_v57, 4  ;;  %v5498_v37 = vrot.slane %v5496_v59, 5  ;;  %v5476_v50 = vrot.slane %v5475_v24, 4  ;;  %v5750_v3 = vld [vmem:[#allocation2 + $0xc] sm:$0xe] }
 0x246   : > { %9041 = vmatprep.mubr.bf16.mxu1 %v8118_v51  ;;  %9086 = vmatpush3.bf16.msra.mxu1 %v9551_v20  ;;  %v5485_v7 = vor.u32 %v5484_v53, %v5480_v22  ;;  %v5490_v48 = vrot.slane %v5488_v35, 5  ;;  %v5504_v52 = vrot.slane %v5502_v10, 5  ;;  %v5512_v12 = vshll.u32 %v12137_v27, 16  ;;  %v9560_v51 = vld [vmem:[#allocation3 + $0xd0] sm:$0xff]   ;;  %v9561_v35 = vld [vmem:[#allocation3 + $0x188] sm:$0xff]  }
 0x247   : > { %9137 = vmatprep.mubr.bf16.mxu0 %v8174_v31  ;;  %9087 = vmatprep.subr.bf16.mxu1 %v9554_v21  ;;  %v5499_v2 = vor.u32 %v5498_v37, %v5495_v61  ;;  %v5508_v33 = vrot.slane %v5506_v45, 4  ;;  %v8119_v20 = vcombine.low %v11994_v6, %v11967_v29  ;;  %v8120_v49 = vcombine.low %v12039_v5, %v12003_v43  ;;  %v9558_v29 = vld [vmem:[#allocation3 + $0x190] sm:$0xff]   ;;  %v9564_v61 = vld [vmem:[#allocation3 + $0xc8] sm:$0xff]   ;;  %v9565_v45 = vld [vmem:[#allocation3 + $0x180] sm:$0xff]  }
 0x248   : > { %9184 = vmatpush3.bf16.msra.mxu0 %v9552_v17  ;;  %v5486_v25 = vrot.slane %v5485_v7, 4  ;;  %v5481_v40 = vsel %vm9986_vm2, %v5476_v50, %v5480_v22  ;;  %v5517_v19 = vshrl.u32 %v5345_v44, 16  ;;  %v5520_v9 = vshll.u32 %v5345_v44, 16 }
 0x249   : > { %9185 = vmatprep.subr.bf16.mxu0 %v9555_v62  ;;  %v5526_v55 = vshll.u32 %v12141_v26, 16  ;;  %v5500_v13 = vrot.slane %v5499_v2, 4  ;;  %v5509_v17 = vor.u32 %v5508_v33, %v5504_v52  ;;  %v5530_v6 = vshrl.u32 %v12141_v26, 16  ;;  %v5751_v33 = vld [vmem:[#allocation2 + $0x18] sm:$0xe] }
 0x24a   : > { %v5491_v47 = vsel %vm9986_vm2, %v5486_v25, %v5490_v48  ;;  %9088 = vmatpush3.bf16.msra.mxu1 %v9554_v21  ;;  %v5514_v5 = vrot.slane %v5512_v12, 5  ;;  %v5519_v4 = vrot.slane %v5517_v19, 4  ;;  %v5522_v42 = vrot.slane %v5520_v9, 5  ;;  %v9567_v12 = vld [vmem:[#allocation3 + $0xc0] sm:$0xff]  }
 0x24b   : > { %v8175_v43 = vcombine.low %v5481_v40, %v5491_v47  ;;  %9089 = vmatprep.subr.bf16.mxu1 %v9557_v60  ;;  %v5510_v15 = vrot.slane %v5509_v17, 4  ;;  %v5528_v58 = vrot.slane %v5526_v55, 5  ;;  %v5532_v14 = vrot.slane %v5530_v6, 4  ;;  %v9572_v47 = vld [vmem:[#allocation3 + $0x178] sm:$0xff]  }
 0x24c   : > { %9186 = vmatpush3.bf16.msra.mxu0 %v9555_v62  ;;  %v5536_v22 = vshll.u32 %v12150_v63, 16  ;;  %v5523_v21 = vor.u32 %v5522_v42, %v5519_v4  ;;  %v5505_v57 = vsel %vm9986_vm2, %v5500_v13, %v5504_v52  ;;  %v5784_v37 = vrot.slane %v12024_v38, 5  ;;  %v9562_v38 = vld [vmem:[#allocation2 + $0x18] sm:$0xff]   ;;  %v5753_v42 = vld [vmem:[#allocation2 + $0x30] sm:$0xe] }
 0x24d   : > { %9138 = vmatmul.mubr.bf16.gmra.mxu0 %v8175_v43  ;;  %9042 = vmatmul.mubr.bf16.gmra.mxu1 %v8119_v20  ;;  %v5515_v59 = vsel %vm9986_vm2, %v5510_v15, %v5514_v5  ;;  %v5533_v23 = vor.u32 %v5532_v14, %v5528_v58  ;;  %v8186_v10 = vrot.slane %v5750_v3, 9  ;;  %v5787_v48 = vrot.slane %v12033_v30, 5  ;;  %v9566_v30 = vld [vmem:[#allocation2 + $0xc] sm:$0xff]   ;;  %v9571_v14 = vld [vmem:[#allocation2 + $0x18] sm:$0xff]   ;;  %v9577_v3 = vld [vmem:[#allocation3 + $0x228] sm:$0xff]  }
 0x24e   : > { %9187 = vmatprep.subr.bf16.mxu0 %v9558_v29  ;;  %9045 = vmatprep.mubr.bf16.mxu1 %v8120_v49  ;;  %v8176_v24 = vcombine.low %v5505_v57, %v5515_v59  ;;  %v5524_v53 = vrot.slane %v5523_v21, 4  ;;  %v5538_v62 = vrot.slane %v5536_v22, 5  ;;  %v5786_v44 = vrot.slane %v5784_v37, 4  ;;  %v9569_v20 = vld [vmem:[#allocation3 + $0x238] sm:$0xff]   ;;  %v5752_v49 = vld [vmem:[#allocation2 + $0x24] sm:$0xe] }
 0x24f   : > { %9090 = vmatpush3.bf16.msra.mxu1 %v9557_v60  ;;  %v5534_v31 = vrot.slane %v5533_v23, 4  ;;  %v8121_v52 = vcombine.low %v12048_v39, %v12009_v8  ;;  %v12171_v60 = vsel %vm10210_vm5, %v8186_v10, %v5784_v37  ;;  %v5791_v39 = vrot.slane %v12063_v32, 5  ;;  %v9573_v43 = vld [vmem:[#allocation3 + $0x230] sm:$0xff]   ;;  %v9570_v15 = vld [vmem:[#allocation2 + $0x30] sm:$0xff]  }
 0x250   : > { %9188 = vmatpush3.bf16.msra.mxu0 %v9558_v29  ;;  %9091 = vmatprep.subr.bf16.mxu1 %v9560_v51  ;;  %v5529_v50 = vsel %vm9986_vm2, %v5524_v53, %v5528_v58  ;;  %v12175_v25 = vsel %vm10210_vm5, %v5786_v44, %v5787_v48  ;;  %v8187_v40 = vrot.slane %v5751_v33, 9  ;;  %v5794_v9 = vrot.slane %v12072_v0, 5  ;;  %v5754_v58 = vld [vmem:[#allocation2 + $0x3c] sm:$0xe]  ;;  %v9575_v22 = vld [vmem:[#allocation3 + $0x170] sm:$0xff]  }
 0x251   : > { %9141 = vmatprep.mubr.bf16.mxu0 %v8176_v24  ;;  %9189 = vmatprep.subr.bf16.mxu0 %v9561_v35  ;;  %v5539_v7 = vsel %vm9986_vm2, %v5534_v31, %v5538_v62  ;;  %v5793_v19 = vrot.slane %v5791_v39, 4  ;;  %v5798_v55 = vrot.slane %v12076_v36, 5  ;;  %v8188_v13 = vrot.slane %v5752_v49, 9  ;;  %v9568_v36 = vld [vmem:[#allocation2 + $0x24] sm:$0xff]   ;;  %v5756_v48 = vld [vmem:[#allocation2 + $0x54] sm:$0xe] }
 0x252   : > { %v8177_v2 = vcombine.low %v5529_v50, %v5539_v7  ;;  %v12184_v17 = vsel %vm10210_vm5, %v8187_v40, %v5791_v39  ;;  %v5801_v6 = vrot.slane %v12079_v16, 5  ;;  %v9574_v21 = vld [vmem:[#allocation2 + $0x24] sm:$0xff]   ;;  %v5808_v59 = vrot.slane %v12096_v34, 5  ;;  %v9576_v7 = vld [vmem:[#allocation2 + $0x3c] sm:$0xff]  }
 0x253   : > { %9092 = vmatpush3.bf16.msra.mxu1 %v9560_v51  ;;  %v12188_v32 = vsel %vm10210_vm5, %v5793_v19, %v5794_v9  ;;  %v5800_v29 = vrot.slane %v5798_v55, 4  ;;  %v12195_v5 = vsel %vm10210_vm5, %v8188_v13, %v5798_v55  ;;  %v5805_v51 = vrot.slane %v12088_v54, 5  ;;  %v9580_v34 = vld [vmem:[#allocation3 + $0x168] sm:$0xff]   ;;  %v5755_v50 = vld [vmem:[#allocation2 + $0x48] sm:$0xe]  ;;  %v9588_v55 = vld [vmem:[#allocation3 + $0x158] sm:$0xff]  }
 0x254   : > { %9190 = vmatpush3.bf16.msra.mxu0 %v9561_v35  ;;  %9093 = vmatprep.subr.bf16.mxu1 %v9564_v61  ;;  %v8189_v35 = vrot.slane %v5753_v42, 9  ;;  %v5812_v23 = vrot.slane %v12102_v18, 5  ;;  %v8190_v24 = vrot.slane %v5754_v58, 9  ;;  %v5815_v62 = vrot.slane %v12105_v46, 5  ;;  %v9582_v39 = vld [vmem:[#allocation2 + $0x3c] sm:$0xff]   ;;  %v9584_v58 = vld [vmem:[#allocation2 + $0x54] sm:$0xff]  }
 0x255   : > { %9142 = vmatmul.mubr.bf16.gmra.mxu0 %v8177_v2  ;;  %9046 = vmatmul.mubr.bf16.gmra.mxu1 %v8121_v52  ;;  %v12199_v4 = vsel %vm10210_vm5, %v5800_v29, %v5801_v6  ;;  %v5807_v57 = vrot.slane %v5805_v51, 4  ;;  %v5819_v44 = vrot.slane %v12116_v41, 5  ;;  %v9578_v2 = vld [vmem:[#allocation2 + $0x48] sm:$0xff]   ;;  %v9579_v52 = vld [vmem:[#allocation2 + $0x30] sm:$0xff]   ;;  %v8192_v40 = vrot.slane %v5756_v48, 9  ;;  %v9594_v18 = vld [vmem:[#allocation2 + $0x60] sm:$0xff]  }
 0x256   : > { %9193 = vmatprep.mubr.bf16.mxu0 %v9562_v38  ;;  %9191 = vmatprep.subr.bf16.mxu0 %v9565_v45  ;;  %v12208_v54 = vsel %vm10210_vm5, %v8189_v35, %v5805_v51  ;;  %v5814_v31 = vrot.slane %v5812_v23, 4  ;;  %v12219_v37 = vsel %vm10210_vm5, %v8190_v24, %v5812_v23  ;;  %v9583_v38 = vld [vmem:[#allocation3 + $0x160] sm:$0xff]   ;;  %v9585_v41 = vld [vmem:[#allocation3 + $0x218] sm:$0xff]   ;;  %v5757_v29 = vld [vmem:[#allocation2 + $0x60] sm:$0xe]  ;;  %v5833_v51 = vrot.slane %v12141_v26, 5 }
 0x257   : > { %9094 = vmatpush3.bf16.msra.mxu1 %v9564_v61  ;;  %9097 = vmatprep.mubr.bf16.mxu1 %v9566_v30  ;;  %v12212_v53 = vsel %vm10210_vm5, %v5807_v57, %v5808_v59  ;;  %v9581_v61 = vld [vmem:[#allocation3 + $0x220] sm:$0xff]   ;;  %v5821_v33 = vrot.slane %v5819_v44, 4  ;;  %v5822_v30 = vrot.slane %v12124_v11, 5  ;;  %v12246_v6 = vld [vmem:[#allocation3 + $0x210] sm:$0xff]   ;;  %v12250_v42 = vld [vmem:[#allocation2 + $0x34] sm:$0xf] }
 0x258   : > { %9192 = vmatpush3.bf16.msra.mxu0 %v9565_v45  ;;  %9095 = vmatprep.subr.bf16.mxu1 %v9567_v12  ;;  %v12223_v10 = vsel %vm10210_vm5, %v5814_v31, %v5815_v62  ;;  %v12225_v45 = vld [vmem:[#allocation2 + $0x1c] sm:$0xf]  ;;  %v9587_v57 = vld [vmem:[#allocation2 + $0x48] sm:$0xff]   ;;  %v8193_v26 = vrot.slane %v5757_v29, 9  ;;  %v5835_v24 = vrot.slane %v5833_v51, 4  ;;  %v5836_v31 = vrot.slane %v12150_v63, 5 }
 0x259   : > { %9241 = vmatprep.subr.bf16.mxu0 %v9569_v20  ;;  %v6751_v49 = vrot.slane %v12225_v45, 5  ;;  %v12239_v9 = vsel %vm10210_vm5, %v5821_v33, %v5822_v30  ;;  %v12269_v59 = vld [vmem:[#allocation3 + $0x150] sm:$0xff]   ;;  %v9586_v62 = vld [vmem:[#allocation2 + $0x60] sm:$0xff]   ;;  %v6722_v35 = vld [vmem:[#allocation2 + $0x54] sm:$0xe] }
 0x25a   : > { %v12279_v48 = vld [vmem:[#allocation2 + $0x2c] sm:$0x1]  ;;  %v6291_v46 = vld [vmem:[#allocation2 + $0x18] sm:$0xf] }
 0x25b   : > { %9096 = vmatpush3.bf16.msra.mxu1 %v9567_v12  ;;  %v8191_v12 = vrot.slane %v5755_v50, 9  ;;  %v6718_v50 = vld [vmem:[#allocation2 + $0x24] sm:$0xe]  ;;  %v9597_v16 = vld [vmem:[#allocation3 + $0x140] sm:$0xff]  }
 0x25c   : > { %9145 = vmatprep.subr.bf16.mxu1 %v9572_v47  ;;  %v8243_v29 = vrot.slane %v6718_v50, 9  ;;  %v12321_v50 = vld [vmem:[#allocation2 + $0x5c] sm:$0x1] }
 0x25d   : > { %9194 = vmatmul.mubr.bf16.vlgmr.msra.gmra.mxu0 %v9568_v36  ;;  %v12235_v19 = vsel %vm10210_vm5, %v8191_v12, %v5819_v44  ;;  %v12248_v36 = vld [vmem:[#allocation2 + $0x20] sm:$0x1]  ;;  %v12291_v12 = vsel %vm10210_vm5, %v5835_v24, %v5836_v31  ;;  %v12308_v24 = vld [vmem:[#allocation2 + $0x50] sm:$0x1]  ;;  %13263 = vst [vmem:[#allocation29_spill] sm:$0xff] %v12321_v50 }
 0x25e   : > { %9197 = vmatprep.mubr.bf16.mxu0 %v9570_v15  ;;  %9242 = vmatpush3.bf16.msra.mxu0 %v9569_v20  ;;  %v5826_v20 = vrot.slane %v12130_v28, 5  ;;  %v5829_v28 = vrot.slane %v12137_v27, 5  ;;  %v12277_v44 = vld [vmem:[#allocation3 + $0x208] sm:$0xff]   ;;  %v9592_v31 = vld [vmem:[#allocation2 + $0x6c] sm:$0xff]  }
 0x25f   : > { %9098 = vmatmul.mubr.bf16.vlgmr.msra.gmra.mxu1 %v9571_v14  ;;  %9243 = vmatprep.subr.bf16.mxu0 %v9573_v43  ;;  %v6753_v14 = vrot.slane %v6751_v49, 4 }
 0x260   : > { %9101 = vmatprep.mubr.bf16.mxu1 %v9574_v21  ;;  %9146 = vmatpush3.bf16.msra.mxu1 %v9572_v47  ;;  %v5828_v11 = vrot.slane %v5826_v20, 4  ;;  %v12242_v47 = vld [vmem:[#allocation2 + $0x28] sm:$0xf]  ;;  %v12254_v27 = vsel %vm10210_vm5, %v8192_v40, %v5826_v20  ;;  %v12265_v21 = vld [vmem:[#allocation2 + $0x4c] sm:$0xf] }
 0x261   : > { %9147 = vmatprep.subr.bf16.mxu1 %v9575_v22  ;;  %v6758_v23 = vrot.slane %v12242_v47, 5  ;;  %v13124_v63 = vrot.slane %v12265_v21, 5  ;;  %v6719_v20 = vld [vmem:[#allocation2 + $0x30] sm:$0xe] }
 0x262   : > { %9244 = vmatpush3.bf16.msra.mxu0 %v9573_v43  ;;  %v6717_v43 = vld [vmem:[#allocation2 + $0x18] sm:$0xe]  ;;  %v12258_v15 = vsel %vm10210_vm5, %v5828_v11, %v5829_v28  ;;  %v9595_v28 = vld [vmem:[#allocation3 + $0x148] sm:$0xff]  }
 0x263   : > { %9245 = vmatprep.subr.bf16.mxu0 %v9577_v3  ;;  %v8242_v33 = vrot.slane %v6717_v43, 9 }
 0x264   : > { %9148 = vmatpush3.bf16.msra.mxu1 %v9575_v22  ;;  %v12263_v22 = vld [vmem:[#allocation2 + $0x40] sm:$0xf] }
 0x265   : > { %9198 = vmatmul.mubr.bf16.gmra.mxu0 %v9576_v7  ;;  %9149 = vmatprep.subr.bf16.mxu1 %v9580_v34  ;;  %v6765_v7 = vrot.slane %v12250_v42, 5  ;;  %v6752_v43 = vsel %vm10210_vm5, %v8242_v33, %v6751_v49  ;;  %v6781_v49 = vrot.slane %v13124_v63, 4  ;;  %v8244_v33 = vrot.slane %v6719_v20, 9  ;;  %v6723_v20 = vld [vmem:[#allocation2 + $0x60] sm:$0xe] }
 0x266   : > { %9201 = vmatprep.mubr.bf16.mxu0 %v9578_v2  ;;  %9246 = vmatpush3.bf16.msra.mxu0 %v9577_v3  ;;  %v12272_v3 = vld [vmem:[#allocation2 + $0x58] sm:$0xf] }
 0x267   : > { %9102 = vmatmul.mubr.bf16.gmra.mxu1 %v9579_v52  ;;  %9247 = vmatprep.subr.bf16.mxu0 %v9581_v61  ;;  %v12281_v2 = vld [vmem:[#allocation2 + $0x38] sm:$0x1]  ;;  %v6772_v52 = vrot.slane %v12263_v22, 5  ;;  %v13123_v40 = vrot.slane %v12272_v3, 5  ;;  %v12339_v0 = vsel %vm10210_vm5, %v8244_v33, %v6765_v7  ;;  %v12354_v33 = vld [vmem:[#allocation2 + $0x68] sm:$0x1] }
 0x268   : > { %9105 = vmatprep.mubr.bf16.mxu1 %v9582_v39  ;;  %9150 = vmatpush3.bf16.msra.mxu1 %v9580_v34  ;;  %v9590_v34 = vld [vmem:[#allocation2 + $0x54] sm:$0xff]   ;;  %v12295_v39 = vld [vmem:[#allocation2 + $0x44] sm:$0x1]  ;;  %v6768_v11 = vrot.slane %v12281_v2, 5  ;;  %13264 = vst [vmem:[#allocation17_spill] sm:$0xff] %v12354_v33 }
 0x269   : > { %9151 = vmatprep.subr.bf16.mxu1 %v9583_v38  ;;  %v6775_v13 = vrot.slane %v12295_v39, 5 }
 0x26a   : > { %9248 = vmatpush3.bf16.msra.mxu0 %v9581_v61  ;;  %v6754_v61 = vrot.slane %v12248_v36, 5 }
 0x26b   : > { %9249 = vmatprep.subr.bf16.mxu0 %v9585_v41 }
 0x26c   : > { %9152 = vmatpush3.bf16.msra.mxu1 %v9583_v38  ;;  %v12287_v38 = vsel %vm10210_vm5, %v8193_v26, %v5833_v51  ;;  %v6755_v30 = vsel %vm10210_vm5, %v6753_v14, %v6754_v61  ;;  %v6760_v51 = vrot.slane %v6758_v23, 4  ;;  %v6761_v14 = vrot.slane %v12279_v48, 5  ;;  %v6721_v61 = vld [vmem:[#allocation2 + $0x48] sm:$0xe] }
 0x26d   : > { %9202 = vmatmul.mubr.bf16.gmra.mxu0 %v9584_v58  ;;  %9153 = vmatprep.subr.bf16.mxu1 %v9588_v55  ;;  %v6720_v58 = vld [vmem:[#allocation2 + $0x3c] sm:$0xe]  ;;  %v6767_v26 = vrot.slane %v6765_v7, 4  ;;  %v8247_v7 = vrot.slane %v6722_v35, 9 }
 0x26e   : > { %9205 = vmatprep.mubr.bf16.mxu0 %v9586_v62  ;;  %9250 = vmatpush3.bf16.msra.mxu0 %v9585_v41  ;;  %v12301_v41 = vld [vmem:[#allocation2 + $0x64] sm:$0xf]  ;;  %v8250_v62 = vcombine.low %v6752_v43, %v6755_v30  ;;  %v6788_v30 = vrot.slane %v13123_v40, 4  ;;  %v12331_v43 = vsel %vm10210_vm5, %v6760_v51, %v6761_v14  ;;  %v8245_v51 = vrot.slane %v6720_v58, 9  ;;  %v12363_v58 = vld [vmem:[#allocation2 + $0x74] sm:$0x1] }
 0x26f   : > { %9106 = vmatmul.mubr.bf16.gmra.mxu1 %v9587_v57  ;;  %9251 = vmatprep.subr.bf16.mxu0 %v12246_v6  ;;  %13261 = vst [vmem:[#allocation16_spill] sm:$0xff] %v12301_v41  ;;  %v12310_v57 = vld [vmem:[#allocation2 + $0x70] sm:$0xf]  ;;  %v12343_v40 = vsel %vm10210_vm5, %v6767_v26, %v6768_v11  ;;  %v6789_v14 = vrot.slane %v12321_v50, 5  ;;  %13265 = vst [vmem:[#allocation20_spill] sm:$0xff] %v12363_v58  ;;  %v6316_v26 = vshrl.u32 %v6291_v46, 16 }
 0x270   : > { %9109 = vmatprep.mubr.bf16.mxu1 %v9590_v34  ;;  %9154 = vmatpush3.bf16.msra.mxu1 %v9588_v55  ;;  %13262 = vst [vmem:[#allocation27_spill] sm:$0xff] %v12310_v57  ;;  %v12315_v34 = vsel %vm10210_vm5, %v8243_v29, %v6758_v23  ;;  %v6774_v55 = vrot.slane %v6772_v52, 4  ;;  %v6793_v23 = vrot.slane %v12301_v41, 5  ;;  %v9596_v29 = vld [vmem:[#allocation3 + $0x200] sm:$0xff]  }
 0x271   : > { %9155 = vmatprep.subr.bf16.mxu1 %v12269_v59  ;;  %v12359_v11 = vsel %vm10210_vm5, %v6788_v30, %v6789_v14  ;;  %v8251_v35 = vcombine.low %v12315_v34, %v12331_v43  ;;  %v8268_v43 = vld [vmem:[%s9937_s18 + $0x18] sm:$0xf]  ;;  %v6803_v14 = vrot.slane %v12363_v58, 5 }
 0x272   : > { %9252 = vmatpush3.bf16.msra.mxu0 %v12246_v6  ;;  %v6782_v6 = vrot.slane %v12308_v24, 5  ;;  %v12348_v63 = vsel %vm10210_vm5, %v6774_v55, %v6775_v13  ;;  %v6795_v13 = vrot.slane %v6793_v23, 4  ;;  %v12378_v55 = vld [vmem:[%s13107_s7 + $0x38] sm:$0xff]  }
 0x273   : > { %9253 = vmatprep.subr.bf16.mxu0 %v12277_v44  ;;  %13266 = vst [vmem:[#allocation18_spill] sm:$0xff] %v12378_v55 }
 0x274   : > { %9156 = vmatpush3.bf16.msra.mxu1 %v12269_v59  ;;  %v8246_v59 = vrot.slane %v6721_v61, 9  ;;  %v12352_v8 = vsel %vm10210_vm5, %v6781_v49, %v6782_v6  ;;  %v13270_v49 = vrot.slane %v12272_v3, 5  ;;  %v7086_v6 = vshrl.u32 %v8268_v43, 16 }
 0x275   : > { %9206 = vmatmul.mubr.bf16.gmra.mxu0 %v9592_v31  ;;  %9157 = vmatprep.subr.bf16.mxu1 %v9595_v28  ;;  %v6319_v31 = vshll.u32 %v6291_v46, 16  ;;  %v13267_v46 = vrot.slane %v12310_v57, 5 }
 0x276   : > { %9254 = vmatpush3.bf16.msra.mxu0 %v12277_v44  ;;  %9257 = vmatprep.mubr.bf16.mxu0 %v8250_v62  ;;  %v8252_v44 = vcombine.low %v12339_v0, %v12343_v40  ;;  %v12373_v62 = vsel %vm10210_vm5, %v8245_v51, %v6772_v52  ;;  %v13268_v0 = vcombine.low %v12171_v60, %v12175_v25  ;;  %v13269_v52 = vrot.slane %v12265_v21, 5  ;;  %v9598_v60 = vld [vmem:[#allocation3 + $0x1f8] sm:$0xff]   ;;  %v9599_v40 = vld [vmem:[#allocation3 + $0x1f0] sm:$0xff]  }
 0x277   : > { %9110 = vmatmul.mubr.bf16.gmra.mxu1 %v9594_v18  ;;  %9255 = vmatprep.subr.bf16.mxu0 %v9596_v29  ;;  %v6724_v18 = vld [vmem:[#allocation2 + $0x6c] sm:$0xe]  ;;  %v6802_v61 = vrot.slane %v13267_v46, 4  ;;  %v12397_v30 = vsel %vm10210_vm5, %v8247_v7, %v13270_v49  ;;  %v8248_v51 = vrot.slane %v6723_v20, 9  ;;  %v6294_v49 = vld [vmem:[#allocation2 + $0x24] sm:$0xf] }
 0x278   : > { %9158 = vmatpush3.bf16.msra.mxu1 %v9595_v28  ;;  %9161 = vmatprep.mubr.bf16.mxu1 %v13268_v0  ;;  %v12391_v34 = vsel %vm10210_vm5, %v8246_v59, %v13269_v52  ;;  %v6796_v28 = vrot.slane %v12354_v33, 5  ;;  %v8269_v59 = vld [vmem:[%s9937_s18 + $0x1c] sm:$0xf]  ;;  %v8249_v46 = vrot.slane %v6724_v18, 9  ;;  %v6318_v0 = vrot.slane %v6316_v26, 4  ;;  %v12415_v25 = vld [vmem:[%s13107_s7 + $0x30] sm:$0xff]  }
 0x279   : > { %9159 = vmatprep.subr.bf16.mxu1 %v9597_v16  ;;  %v6321_v52 = vrot.slane %v6319_v31, 5  ;;  %13271 = vst [vmem:[#allocation31_spill] sm:$0xff] %v12415_v25  ;;  %v12419_v20 = vsel %vm10210_vm5, %v6802_v61, %v6803_v14  ;;  %v6329_v26 = vshrl.u32 %v12225_v45, 16  ;;  %v6335_v31 = vshll.u32 %v12248_v36, 16  ;;  %v8271_v33 = vld [vmem:[%s9937_s18 + $0x24] sm:$0xf] }
 0x27a   : > { %9256 = vmatpush3.bf16.msra.mxu0 %v9596_v29  ;;  %v12409_v7 = vsel %vm10210_vm5, %v6795_v13, %v6796_v28  ;;  %v6325_v29 = vshll.u32 %v12225_v45, 16  ;;  %v7089_v13 = vshll.u32 %v8268_v43, 16  ;;  %v7095_v18 = vshll.u32 %v8269_v59, 16 }
 0x27b   : > { %9273 = vmatprep.subr.bf16.mxu0 %v12378_v55  ;;  %v7099_v28 = vshrl.u32 %v8269_v59, 16  ;;  %v12428_v61 = vsel %vm10210_vm5, %v8248_v51, %v6793_v23  ;;  %v6340_v14 = vshrl.u32 %v6294_v49, 16  ;;  %v6343_v58 = vshll.u32 %v6294_v49, 16  ;;  %v6297_v23 = vld [vmem:[#allocation2 + $0x30] sm:$0xf]  ;;  %v9601_v59 = vld [vmem:[#allocation3 + $0x1e8] sm:$0xff]  }
 0x27c   : > { %9160 = vmatpush3.bf16.msra.mxu1 %v9597_v16  ;;  %v6349_v16 = vshll.u32 %v12242_v47, 16  ;;  %v13272_v36 = vrot.slane %v12310_v57, 5  ;;  %v6322_v43 = vor.u32 %v6321_v52, %v6318_v0  ;;  %v13273_v51 = vcombine.low %v12184_v17, %v12188_v32  ;;  %v8270_v0 = vld [vmem:[%s9937_s18 + $0x20] sm:$0x1] }
 0x27d   : > { %9258 = vmatmul.mubr.bf16.vlgmr.msra.gmra.mxu0 %v8251_v35  ;;  %9209 = vmatprep.subr.bf16.mxu1 %v9598_v60  ;;  %v7088_v52 = vrot.slane %v7086_v6, 4  ;;  %v7091_v49 = vrot.slane %v7089_v13, 5  ;;  %v13274_v17 = vcombine.low %v12195_v5, %v12199_v4  ;;  %v6331_v32 = vrot.slane %v6329_v26, 4  ;;  %v8272_v13 = vld [vmem:[%s9937_s18 + $0x28] sm:$0xf] }
 0x27e   : > { %9261 = vmatprep.mubr.bf16.mxu0 %v8252_v44  ;;  %9274 = vmatpush3.bf16.msra.mxu0 %v12378_v55  ;;  %v12438_v35 = vsel %vm10210_vm5, %v8249_v46, %v13272_v36  ;;  %v12447_v44 = vld [vmem:[%s13107_s7 + $0x28] sm:$0xff]   ;;  %v12451_v46 = vrot.slane %v6325_v29, 5  ;;  %v12457_v36 = vrot.slane %v6335_v31, 5  ;;  %v7101_v45 = vrot.slane %v7099_v28, 4  ;;  %v12474_v31 = vld [vmem:[%s13107_s7 + $0x20] sm:$0xff]  }
 0x27f   : > { %9162 = vmatmul.mubr.bf16.vlgmr.msra.gmra.mxu1 %v13273_v51  ;;  %9275 = vmatprep.subr.bf16.mxu0 %v12415_v25  ;;  %v12459_v51 = vrot.slane %v7095_v18, 5  ;;  %v6342_v56 = vrot.slane %v6340_v14, 4  ;;  %v6345_v29 = vrot.slane %v6343_v58, 5  ;;  %v12462_v57 = vrot.slane %v6349_v16, 5 }
 0x280   : > { %9165 = vmatprep.mubr.bf16.mxu1 %v13274_v17  ;;  %9210 = vmatpush3.bf16.msra.mxu1 %v9598_v60  ;;  %v6353_v6 = vshrl.u32 %v12242_v47, 16  ;;  %v12467_v5 = vrot.slane %v6322_v43, 4  ;;  %v6364_v4 = vshrl.u32 %v6297_v23, 16  ;;  %v6367_v60 = vshll.u32 %v6297_v23, 16 }
 0x281   : > { %9211 = vmatprep.subr.bf16.mxu1 %v9599_v40  ;;  %v6373_v26 = vshll.u32 %v12250_v42, 16  ;;  %v6377_v58 = vshrl.u32 %v12250_v42, 16  ;;  %v7092_v18 = vor.u32 %v7091_v49, %v7088_v52  ;;  %v7105_v47 = vshll.u32 %v8270_v0, 16 }
 0x282   : > { %9276 = vmatpush3.bf16.msra.mxu0 %v12415_v25  ;;  %v7110_v28 = vshrl.u32 %v8271_v33, 16  ;;  %v7102_v14 = vor.u32 %v7101_v45, %v12459_v51  ;;  %v7113_v16 = vshll.u32 %v8271_v33, 16  ;;  %v7119_v43 = vshll.u32 %v8272_v13, 16  ;;  %v9603_v25 = vld [vmem:[#allocation3 + $0x1e0] sm:$0xff]  }
 0x283   : > { %9277 = vmatprep.subr.bf16.mxu0 %v12447_v44  ;;  %v7123_v23 = vshrl.u32 %v8272_v13, 16  ;;  %v13275_v17 = vcombine.low %v12373_v62, %v12348_v63  ;;  %v6332_v55 = vor.u32 %v6331_v32, %v12451_v46  ;;  %v6346_v50 = vor.u32 %v6345_v29, %v6342_v56  ;;  %v6300_v56 = vld [vmem:[#allocation2 + $0x3c] sm:$0xf] }
 0x284   : > { %9212 = vmatpush3.bf16.msra.mxu1 %v9599_v40  ;;  %v6355_v41 = vrot.slane %v6353_v6, 4  ;;  %v6359_v42 = vshll.u32 %v12279_v48, 16  ;;  %v13276_v40 = vcombine.low %v12391_v34, %v12352_v8  ;;  %v6328_v63 = vsel %vm9986_vm2, %v12467_v5, %v12451_v46  ;;  %v12500_v8 = vld [vmem:[%s13107_s7 + $0x18] sm:$0xff]   ;;  %v8273_v6 = vld [vmem:[%s9937_s18 + $0x2c] sm:$0x1] }
 0x285   : > { %9262 = vmatmul.mubr.bf16.gmra.mxu0 %v13275_v17  ;;  %9213 = vmatprep.subr.bf16.mxu1 %v9601_v59  ;;  %v6366_v33 = vrot.slane %v6364_v4, 4  ;;  %v6369_v62 = vrot.slane %v6367_v60, 5  ;;  %v12491_v45 = vrot.slane %v6373_v26, 5  ;;  %v13277_v48 = vcombine.low %v12208_v54, %v12212_v53  ;;  %v9605_v4 = vld [vmem:[#allocation3 + $0x1d8] sm:$0xff]  }
 0x286   : > { %9265 = vmatprep.mubr.bf16.mxu0 %v13276_v40  ;;  %9278 = vmatpush3.bf16.msra.mxu0 %v12447_v44  ;;  %v6379_v34 = vrot.slane %v6377_v58, 4  ;;  %v7093_v0 = vrot.slane %v7092_v18, 4  ;;  %v7107_v52 = vrot.slane %v7105_v47, 5  ;;  %v7112_v49 = vrot.slane %v7110_v28, 4  ;;  %v6303_v28 = vld [vmem:[#allocation2 + $0x48] sm:$0xf] }
 0x287   : > { %9166 = vmatmul.mubr.bf16.gmra.mxu1 %v13277_v48  ;;  %9279 = vmatprep.subr.bf16.mxu0 %v12474_v31  ;;  %v13278_v32 = vcombine.low %v12219_v37, %v12223_v10  ;;  %v7103_v29 = vrot.slane %v7102_v14, 4  ;;  %v7115_v54 = vrot.slane %v7113_v16, 5  ;;  %v12506_v53 = vrot.slane %v7119_v43, 5  ;;  %v9607_v40 = vld [vmem:[#allocation3 + $0x1d0] sm:$0xff]  }
 0x288   : > { %9214 = vmatpush3.bf16.msra.mxu1 %v9601_v59  ;;  %v7125_v13 = vrot.slane %v7123_v23, 4  ;;  %v6333_v60 = vrot.slane %v6332_v55, 4  ;;  %v12508_v26 = vrot.slane %v6359_v42, 5  ;;  %v6388_v58 = vshrl.u32 %v6300_v56, 16  ;;  %v12519_v55 = vld [vmem:[%s13107_s7 + $0x10] sm:$0xff]  }
 0x289   : > { %9169 = vmatprep.mubr.bf16.mxu1 %v13278_v32  ;;  %9215 = vmatprep.subr.bf16.mxu1 %v9603_v25  ;;  %v6391_v18 = vshll.u32 %v6300_v56, 16  ;;  %v12511_v47 = vrot.slane %v6346_v50, 4  ;;  %v6356_v37 = vor.u32 %v6355_v41, %v12462_v57  ;;  %v6370_v10 = vor.u32 %v6369_v62, %v6366_v33 }
 0x28a   : > { %9280 = vmatpush3.bf16.msra.mxu0 %v12474_v31  ;;  %v6383_v59 = vshll.u32 %v12281_v2, 16  ;;  %v6380_v14 = vor.u32 %v6379_v34, %v12491_v45  ;;  %v7129_v16 = vshll.u32 %v8273_v6, 16  ;;  %v6397_v43 = vshll.u32 %v12263_v22, 16 }
 0x28b   : > { %9281 = vmatprep.subr.bf16.mxu0 %v12500_v8  ;;  %v6401_v50 = vshrl.u32 %v12263_v22, 16  ;;  %v7098_v2 = vsel %vm9986_vm2, %v7093_v0, %v12459_v51  ;;  %v7108_v41 = vsel %vm9986_vm2, %v7103_v29, %v7107_v52  ;;  %v7116_v23 = vor.u32 %v7115_v54, %v7112_v49  ;;  %v6306_v49 = vld [vmem:[#allocation2 + $0x54] sm:$0xf] }
 0x28c   : > { %9216 = vmatpush3.bf16.msra.mxu1 %v9603_v25  ;;  %v7126_v17 = vor.u32 %v7125_v13, %v12506_v53  ;;  %v13279_v42 = vcombine.low %v12397_v30, %v12359_v11  ;;  %v6390_v33 = vrot.slane %v6388_v58, 4  ;;  %v6393_v62 = vrot.slane %v6391_v18, 5  ;;  %v12543_v11 = vld [vmem:[%s13107_s7 + $0x8] sm:$0xff]  }
 0x28d   : > { %9217 = vmatprep.subr.bf16.mxu1 %v9605_v4  ;;  %v6412_v22 = vshrl.u32 %v6303_v28, 16  ;;  %v6415_v25 = vshll.u32 %v6303_v28, 16  ;;  %v13280_v56 = vcombine.low %v12428_v61, %v12409_v7  ;;  %v6338_v51 = vsel %vm9986_vm2, %v6333_v60, %v12457_v36 }
 0x28e   : > { %9266 = vmatmul.mubr.bf16.gmra.mxu0 %v13279_v42  ;;  %v12545_v30 = vrot.slane %v6356_v37, 4  ;;  %v6421_v48 = vshll.u32 %v12265_v21, 16  ;;  %v6425_v34 = vshrl.u32 %v12265_v21, 16  ;;  %v13281_v7 = vcombine.low %v12235_v19, %v12239_v9  ;;  %v9609_v19 = vld [vmem:[#allocation3 + $0x1c8] sm:$0xff]  }
 0x28f   : > { %9269 = vmatprep.mubr.bf16.mxu0 %v13280_v56  ;;  %9282 = vmatpush3.bf16.msra.mxu0 %v12500_v8  ;;  %v6371_v61 = vrot.slane %v6370_v10, 4  ;;  %v6385_v0 = vrot.slane %v6383_v59, 5  ;;  %v12553_v36 = vrot.slane %v6397_v43, 5  ;;  %v6403_v52 = vrot.slane %v6401_v50, 4  ;;  %v9611_v43 = vld [vmem:[#allocation3 + $0x1c0] sm:$0xff]  }
 0x290   : > { %9170 = vmatmul.mubr.bf16.gmra.mxu1 %v13281_v7  ;;  %9283 = vmatprep.subr.bf16.mxu0 %v12519_v55  ;;  %v13282_v32 = vcombine.low %v12254_v27, %v12258_v15  ;;  %v6381_v29 = vrot.slane %v6380_v14, 4  ;;  %v8292_v6 = vcombine.low %v7098_v2, %v7108_v41  ;;  %v7117_v21 = vrot.slane %v7116_v23, 4  ;;  %v12570_v15 = vld [vmem:[%s13107_s7] sm:$0xff]  }
 0x291   : > { %9218 = vmatpush3.bf16.msra.mxu1 %v9605_v4  ;;  %v7131_v54 = vrot.slane %v7129_v16, 5  ;;  %v7127_v9 = vrot.slane %v7126_v17, 4  ;;  %v6394_v13 = vor.u32 %v6393_v62, %v6390_v33  ;;  %v6414_v60 = vrot.slane %v6412_v22, 4  ;;  %v6309_v50 = vld [vmem:[#allocation2 + $0x60] sm:$0xf]  ;;  %v13285_v62 = vld [vmem:[#allocation16_spill] sm:$0xff] }
 0x292   : > { %9173 = vmatprep.mubr.bf16.mxu1 %v13282_v32  ;;  %9219 = vmatprep.subr.bf16.mxu1 %v9607_v40  ;;  %v6417_v58 = vrot.slane %v6415_v25, 5  ;;  %v12559_v18 = vrot.slane %v6421_v48, 5  ;;  %v6427_v37 = vrot.slane %v6425_v34, 4  ;;  %v6436_v10 = vshrl.u32 %v6306_v49, 16  ;;  %v13286_v34 = vld [vmem:[#allocation29_spill] sm:$0xff] }
 0x293   : > { %9284 = vmatpush3.bf16.msra.mxu0 %v12519_v55  ;;  %v6439_v59 = vshll.u32 %v6306_v49, 16  ;;  %v8226_v27 = vcombine.low %v6328_v63, %v6338_v51  ;;  %v6404_v4 = vor.u32 %v6403_v52, %v12553_v36  ;;  %v6445_v28 = vshll.u32 %v12272_v3, 16 }
 0x294   : > { %9285 = vmatprep.subr.bf16.mxu0 %v12543_v11  ;;  %v6449_v14 = vshrl.u32 %v12272_v3, 16  ;;  %v6352_v46 = vsel %vm9986_vm2, %v12511_v47, %v12462_v57  ;;  %v6362_v5 = vsel %vm9986_vm2, %v12545_v30, %v12508_v26  ;;  %v6376_v63 = vsel %vm9986_vm2, %v6371_v61, %v12491_v45  ;;  %v6312_v61 = vld [vmem:[#allocation2 + $0x6c] sm:$0xf] }
 0x295   : > { %9220 = vmatpush3.bf16.msra.mxu1 %v9607_v40  ;;  %v6386_v16 = vsel %vm9986_vm2, %v6381_v29, %v6385_v0  ;;  %v13283_v3 = vcombine.low %v12438_v35, %v12419_v20  ;;  %v7122_v57 = vsel %vm9986_vm2, %v7117_v21, %v12506_v53  ;;  %v7132_v26 = vsel %vm9986_vm2, %v7127_v9, %v7131_v54  ;;  %v13287_v9 = vld [vmem:[#allocation18_spill] sm:$0xff] }
 0x296   : > { %9221 = vmatprep.subr.bf16.mxu1 %v9609_v19  ;;  %v12596_v47 = vrot.slane %v6394_v13, 4  ;;  %v6407_v45 = vshll.u32 %v12295_v39, 16  ;;  %v6418_v2 = vor.u32 %v6417_v58, %v6414_v60  ;;  %v6428_v20 = vor.u32 %v6427_v37, %v12559_v18 }
 0x297   : > { %9270 = vmatmul.mubr.bf16.gmra.mxu0 %v13283_v3  ;;  %v6438_v35 = vrot.slane %v6436_v10, 4  ;;  %v6441_v41 = vrot.slane %v6439_v59, 5  ;;  %v13284_v23 = vcombine.low %v12287_v38, %v12291_v12  ;;  %v6405_v53 = vrot.slane %v6404_v4, 4  ;;  %v8275_v10 = vld [vmem:[%s9937_s18 + $0x34] sm:$0xf] }
 0x298   : > { %9286 = vmatpush3.bf16.msra.mxu0 %v12543_v11  ;;  %9289 = vmatprep.mubr.bf16.mxu0 %v8292_v6  ;;  %v6431_v17 = vshll.u32 %v12308_v24, 16  ;;  %v12606_v42 = vrot.slane %v6445_v28, 5  ;;  %v6451_v39 = vrot.slane %v6449_v14, 4  ;;  %v6460_v40 = vshrl.u32 %v6309_v50, 16 }
 0x299   : > { %9174 = vmatmul.mubr.bf16.gmra.mxu1 %v13284_v23  ;;  %9287 = vmatprep.subr.bf16.mxu0 %v12570_v15  ;;  %v6463_v33 = vshll.u32 %v6309_v50, 16  ;;  %v6469_v22 = vshll.u32 %v13285_v62, 16  ;;  %v6473_v25 = vshrl.u32 %v13285_v62, 16  ;;  %v8227_v56 = vcombine.low %v6352_v46, %v6362_v5  ;;  %v13289_v46 = vld [vmem:[#allocation17_spill] sm:$0xff] }
 0x29a   : > { %9222 = vmatpush3.bf16.msra.mxu1 %v9609_v19  ;;  %9225 = vmatprep.mubr.bf16.mxu1 %v8226_v27  ;;  %v8228_v38 = vcombine.low %v6376_v63, %v6386_v16  ;;  %v8293_v12 = vcombine.low %v7122_v57, %v7132_v26  ;;  %v6409_v51 = vrot.slane %v6407_v45, 5  ;;  %v6419_v24 = vrot.slane %v6418_v2, 4  ;;  %v8274_v19 = vld [vmem:[%s9937_s18 + $0x30] sm:$0xf]  ;;  %v13290_v26 = vld [vmem:[#allocation31_spill] sm:$0xff] }
 0x29b   : > { %9223 = vmatprep.subr.bf16.mxu1 %v9611_v43  ;;  %v6429_v30 = vrot.slane %v6428_v20, 4  ;;  %v6442_v48 = vor.u32 %v6441_v41, %v6438_v35  ;;  %v6455_v7 = vshll.u32 %v13286_v34, 16  ;;  %v6400_v0 = vsel %vm9986_vm2, %v12596_v47, %v12553_v36  ;;  %v13288_v36 = vld [vmem:[#allocation27_spill] sm:$0xff]  ;;  %v8277_v20 = vld [vmem:[%s9937_s18 + $0x3c] sm:$0xf] }
 0x29c   : > { %9288 = vmatpush3.bf16.msra.mxu0 %v12570_v15  ;;  %v6410_v52 = vsel %vm9986_vm2, %v6405_v53, %v6409_v51  ;;  %v6433_v49 = vrot.slane %v6431_v17, 5  ;;  %v6452_v32 = vor.u32 %v6451_v39, %v12606_v42  ;;  %v6462_v29 = vrot.slane %v6460_v40, 4  ;;  %v8276_v53 = vld [vmem:[%s9937_s18 + $0x38] sm:$0x1]  ;;  %v8278_v17 = vld [vmem:[%s9937_s18 + $0x40] sm:$0xf] }
 0x29d   : > { %v6465_v6 = vrot.slane %v6463_v33, 5  ;;  %v12619_v21 = vrot.slane %v6469_v22, 5  ;;  %v6475_v54 = vrot.slane %v6473_v25, 4  ;;  %v6484_v13 = vshrl.u32 %v6312_v61, 16  ;;  %v8280_v22 = vld [vmem:[%s9937_s18 + $0x48] sm:$0xf] }
 0x29e   : > { %9224 = vmatpush3.bf16.msra.mxu1 %v9611_v43  ;;  %v6487_v60 = vshll.u32 %v6312_v61, 16  ;;  %v6493_v58 = vshll.u32 %v13288_v36, 16  ;;  %v6497_v37 = vshrl.u32 %v13288_v36, 16  ;;  %v6424_v59 = vsel %vm9986_vm2, %v6419_v24, %v12559_v18  ;;  %v8281_v51 = vld [vmem:[%s9937_s18 + $0x4c] sm:$0xf] }
 0x29f   : > { %9305 = vmatprep.subr.bf16.mxu1 %v13287_v9  ;;  %9290 = vmatmul.mubr.bf16.vlgmr.msra.gmra.mxu0 %v8293_v12  ;;  %v6434_v27 = vsel %vm9986_vm2, %v6429_v30, %v6433_v49  ;;  %v12631_v4 = vrot.slane %v6442_v48, 4  ;;  %v12633_v28 = vrot.slane %v6455_v7, 5  ;;  %v12635_v14 = vrot.slane %v6452_v32, 4 }
 0x2a0   : > { %v6479_v5 = vshll.u32 %v13289_v46, 16  ;;  %v7134_v63 = vshrl.u32 %v8274_v19, 16  ;;  %v7137_v16 = vshll.u32 %v8274_v19, 16  ;;  %v6466_v18 = vor.u32 %v6465_v6, %v6462_v29 }
 0x2a1   : > { %9226 = vmatmul.mubr.bf16.vlgmr.msra.gmra.mxu1 %v8227_v56  ;;  %v6476_v3 = vor.u32 %v6475_v54, %v12619_v21  ;;  %v7143_v43 = vshll.u32 %v8275_v10, 16  ;;  %v7147_v57 = vshrl.u32 %v8275_v10, 16  ;;  %v6486_v47 = vrot.slane %v6484_v13, 4  ;;  %v8279_v10 = vld [vmem:[%s9937_s18 + $0x44] sm:$0x1] }
 0x2a2   : > { %9229 = vmatprep.mubr.bf16.mxu1 %v8228_v38  ;;  %9313 = vmatpush3.bf16.msra.mxu1 %v13287_v9  ;;  %v6489_v45 = vrot.slane %v6487_v60, 5  ;;  %v12641_v50 = vrot.slane %v6493_v58, 5  ;;  %v6499_v2 = vrot.slane %v6497_v37, 4  ;;  %v8229_v35 = vcombine.low %v6400_v0, %v6410_v52  ;;  %v13291_v52 = vld [vmem:[#allocation20_spill] sm:$0xff] }
 0x2a3   : > { %9306 = vmatprep.subr.bf16.mxu1 %v13290_v26  ;;  %v8230_v41 = vcombine.low %v6424_v59, %v6434_v27  ;;  %v6448_v23 = vsel %vm9986_vm2, %v12631_v4, %v12606_v42  ;;  %v6458_v39 = vsel %vm9986_vm2, %v12635_v14, %v12633_v28  ;;  %v6481_v40 = vrot.slane %v6479_v5, 5  ;;  %v8282_v27 = vld [vmem:[%s9937_s18 + $0x50] sm:$0x1] }
 0x2a4   : > { %v7136_v33 = vrot.slane %v7134_v63, 4  ;;  %v7139_v62 = vrot.slane %v7137_v16, 5  ;;  %v12656_v25 = vrot.slane %v7143_v43, 5  ;;  %v7149_v56 = vrot.slane %v7147_v57, 4  ;;  %v8283_v16 = vld [vmem:[%s9937_s18 + $0x54] sm:$0xf] }
 0x2a5   : > { %v7158_v38 = vshrl.u32 %v8277_v20, 16  ;;  %v7161_v12 = vshll.u32 %v8277_v20, 16  ;;  %v6467_v42 = vrot.slane %v6466_v18, 4  ;;  %v6477_v24 = vrot.slane %v6476_v3, 4  ;;  %v8284_v57 = vld [vmem:[%s9937_s18 + $0x58] sm:$0xf] }
 0x2a6   : > { %9314 = vmatpush3.bf16.msra.mxu1 %v13290_v26  ;;  %v6490_v30 = vor.u32 %v6489_v45, %v6486_v47  ;;  %v6500_v48 = vor.u32 %v6499_v2, %v12641_v50  ;;  %v7167_v34 = vshll.u32 %v8278_v17, 16  ;;  %v7171_v7 = vshrl.u32 %v8278_v17, 16  ;;  %v8287_v17 = vld [vmem:[%s9937_s18 + $0x64] sm:$0xf] }
 0x2a7   : > { %9307 = vmatprep.subr.bf16.mxu1 %v12447_v44  ;;  %v7182_v61 = vshrl.u32 %v8280_v22, 16  ;;  %v7185_v0 = vshll.u32 %v8280_v22, 16  ;;  %v6503_v49 = vshll.u32 %v13291_v52, 16  ;;  %v7153_v32 = vshll.u32 %v8276_v53, 16  ;;  %v8286_v53 = vld [vmem:[%s9937_s18 + $0x60] sm:$0xf] }
 0x2a8   : > { %v7191_v29 = vshll.u32 %v8281_v51, 16  ;;  %v7195_v6 = vshrl.u32 %v8281_v51, 16  ;;  %v7140_v54 = vor.u32 %v7139_v62, %v7136_v33  ;;  %v7150_v19 = vor.u32 %v7149_v56, %v12656_v25 }
 0x2a9   : > { %9230 = vmatmul.mubr.bf16.gmra.mxu1 %v8229_v35  ;;  %v7160_v9 = vrot.slane %v7158_v38, 4  ;;  %v7163_v13 = vrot.slane %v7161_v12, 5  ;;  %v6472_v60 = vsel %vm9986_vm2, %v6467_v42, %v12619_v21  ;;  %v6482_v36 = vsel %vm9986_vm2, %v6477_v24, %v6481_v40 }
 0x2aa   : > { %9233 = vmatprep.mubr.bf16.mxu1 %v8230_v41  ;;  %9315 = vmatpush3.bf16.msra.mxu1 %v12447_v44  ;;  %v6491_v58 = vrot.slane %v6490_v30, 4  ;;  %v6501_v37 = vrot.slane %v6500_v48, 4  ;;  %v12671_v44 = vrot.slane %v7167_v34, 5  ;;  %v7173_v59 = vrot.slane %v7171_v7, 4 }
 0x2ab   : > { %9308 = vmatprep.subr.bf16.mxu1 %v12474_v31  ;;  %v7184_v4 = vrot.slane %v7182_v61, 4  ;;  %v7187_v28 = vrot.slane %v7185_v0, 5  ;;  %v6505_v14 = vrot.slane %v6503_v49, 5  ;;  %v7155_v46 = vrot.slane %v7153_v32, 5  ;;  %v8285_v49 = vld [vmem:[%s9937_s18 + $0x5c] sm:$0x1] }
 0x2ac   : > { %v12674_v5 = vrot.slane %v7191_v29, 5  ;;  %v7197_v63 = vrot.slane %v7195_v6, 4  ;;  %v7141_v21 = vrot.slane %v7140_v54, 4  ;;  %v7151_v18 = vrot.slane %v7150_v19, 4  ;;  %v8289_v32 = vld [vmem:[%s9937_s18 + $0x6c] sm:$0xf] }
 0x2ad   : > { %v7164_v3 = vor.u32 %v7163_v13, %v7160_v9  ;;  %v7177_v43 = vshll.u32 %v8279_v10, 16  ;;  %v8231_v26 = vcombine.low %v6448_v23, %v6458_v39  ;;  %v8232_v47 = vcombine.low %v6472_v60, %v6482_v36  ;;  %v8290_v9 = vld [vmem:[%s9937_s18 + $0x70] sm:$0xf]  ;;  %v8288_v36 = vld [vmem:[%s9937_s18 + $0x68] sm:$0x1] }
 0x2ae   : > { %9316 = vmatpush3.bf16.msra.mxu1 %v12474_v31  ;;  %v6496_v45 = vsel %vm9986_vm2, %v6491_v58, %v12641_v50  ;;  %v6506_v2 = vsel %vm9986_vm2, %v6501_v37, %v6505_v14  ;;  %v7174_v20 = vor.u32 %v7173_v59, %v12671_v44  ;;  %v7188_v31 = vor.u32 %v7187_v28, %v7184_v4 }
 0x2af   : > { %9309 = vmatprep.subr.bf16.mxu1 %v12500_v8  ;;  %v7201_v35 = vshll.u32 %v8282_v27, 16  ;;  %v7206_v41 = vshrl.u32 %v8283_v16, 16  ;;  %v7198_v23 = vor.u32 %v7197_v63, %v12674_v5  ;;  %v7209_v39 = vshll.u32 %v8283_v16, 16 }
 0x2b0   : > { %v7215_v40 = vshll.u32 %v8284_v57, 16  ;;  %v7219_v33 = vshrl.u32 %v8284_v57, 16  ;;  %v7146_v50 = vsel %vm9986_vm2, %v7141_v21, %v12656_v25  ;;  %v7156_v62 = vsel %vm9986_vm2, %v7151_v18, %v7155_v46 }
 0x2b1   : > { %9234 = vmatmul.mubr.bf16.gmra.mxu1 %v8231_v26  ;;  %v7165_v22 = vrot.slane %v7164_v3, 4  ;;  %v7179_v56 = vrot.slane %v7177_v43, 5  ;;  %v7230_v38 = vshrl.u32 %v8286_v53, 16  ;;  %v7233_v12 = vshll.u32 %v8286_v53, 16 }
 0x2b2   : > { %9237 = vmatprep.mubr.bf16.mxu1 %v8232_v47  ;;  %9317 = vmatpush3.bf16.msra.mxu1 %v12500_v8  ;;  %v7239_v51 = vshll.u32 %v8287_v17, 16  ;;  %v7243_v42 = vshrl.u32 %v8287_v17, 16  ;;  %v7175_v24 = vrot.slane %v7174_v20, 4  ;;  %v7189_v30 = vrot.slane %v7188_v31, 4  ;;  %v8291_v20 = vld [vmem:[%s9937_s18 + $0x74] sm:$0x1] }
 0x2b3   : > { %9310 = vmatprep.subr.bf16.mxu1 %v12519_v55  ;;  %v7203_v8 = vrot.slane %v7201_v35, 5  ;;  %v7208_v48 = vrot.slane %v7206_v41, 4  ;;  %v7199_v34 = vrot.slane %v7198_v23, 4  ;;  %v7211_v25 = vrot.slane %v7209_v39, 5  ;;  %s8313_s18 = sshll.u32 %s9726_s17, 5 }
 0x2b4   : > { %v7217_v7 = vrot.slane %v7215_v40, 5  ;;  %v7221_v61 = vrot.slane %v7219_v33, 4  ;;  %v8233_v0 = vcombine.low %v6496_v45, %v6506_v2  ;;  %v8294_v52 = vcombine.low %v7146_v50, %v7156_v62  ;;  %s7578_s16 = sadd.s32 %s8338_s21, %s8313_s18  ;;  %s9648_s21 = scalar_lea.vmem %s9647_s11, 4096 }
 0x2b5   : > { %v7232_v29 = vrot.slane %v7230_v38, 4  ;;  %v7235_v6 = vrot.slane %v7233_v12, 5  ;;  %v7241_v54 = vrot.slane %v7239_v51, 5  ;;  %v7245_v19 = vrot.slane %v7243_v42, 4  ;;  %s8314_s17 = sshll.u32 %s7578_s16, 7  ;;  %p9650_p2 = scmp.lt.s32.totalorder %s9648_s21, %s9642_s30 }
 0x2b6   : > { %9318 = vmatpush3.bf16.msra.mxu1 %v12519_v55  ;;  %v7170_v13 = vsel %vm9986_vm2, %v7165_v22, %v12671_v44  ;;  %v7180_v60 = vsel %vm9986_vm2, %v7175_v24, %v7179_v56  ;;  %v7194_v55 = vsel %vm9986_vm2, %v7189_v30, %v12674_v5  ;;  %v7204_v58 = vsel %vm9986_vm2, %v7199_v34, %v7203_v8  ;;  %s13041_s29 = scalar_lea.hbm %s13110_s10, %s8314_s17 }
 0x2b7   : > { %9311 = vmatprep.subr.bf16.mxu1 %v12543_v11  ;;  %v7212_v37 = vor.u32 %v7211_v25, %v7208_v48  ;;  %v7222_v10 = vor.u32 %v7221_v61, %v7217_v7  ;;  %v7225_v59 = vshll.u32 %v8285_v49, 16  ;;  %v7254_v27 = vshrl.u32 %v8289_v32, 16  ;;  %p9651_p4 = por %p9650_p2, %p9649_p1 }
 0x2b8   : > { %v7257_v44 = vshll.u32 %v8289_v32, 16  ;;  %v7263_v4 = vshll.u32 %v8290_v9, 16  ;;  %v7267_v28 = vshrl.u32 %v8290_v9, 16  ;;  %v7236_v14 = vor.u32 %v7235_v6, %v7232_v29 }
 0x2b9   : > { %9238 = vmatmul.mubr.bf16.gmra.mxu1 %v8233_v0  ;;  %v7246_v46 = vor.u32 %v7245_v19, %v7241_v54  ;;  %v7249_v5 = vshll.u32 %v8288_v36, 16  ;;  %v8295_v63 = vcombine.low %v7170_v13, %v7180_v60  ;;  %v8296_v16 = vcombine.low %v7194_v55, %v7204_v58  ;;  %p9652_p5 = pnand %p9651_p4, %p9645_p0 }
 0x2ba   : > { %9319 = vmatpush3.bf16.msra.mxu1 %v12543_v11  ;;  %9293 = vmatprep.mubr.bf16.mxu1 %v8294_v52  ;;  %v7213_v21 = vrot.slane %v7212_v37, 4  ;;  %v7223_v18 = vrot.slane %v7222_v10, 4  ;;  %v7227_v3 = vrot.slane %v7225_v59, 5  ;;  %v7256_v43 = vrot.slane %v7254_v27, 4 }
 0x2bb   : > { %9312 = vmatprep.subr.bf16.mxu1 %v12570_v15  ;;  %v7259_v11 = vrot.slane %v7257_v44, 5  ;;  %v7265_v57 = vrot.slane %v7263_v4, 5  ;;  %v7269_v26 = vrot.slane %v7267_v28, 4  ;;  %v7237_v47 = vrot.slane %v7236_v14, 4 }
 0x2bc   : > { %v7247_v45 = vrot.slane %v7246_v46, 4  ;;  %v7251_v2 = vrot.slane %v7249_v5, 5  ;;  %v7218_v31 = vsel %vm9986_vm2, %v7213_v21, %v7217_v7  ;;  %v7228_v35 = vsel %vm9986_vm2, %v7223_v18, %v7227_v3 }
 0x2bd   : > { %v7260_v41 = vor.u32 %v7259_v11, %v7256_v43  ;;  %v7270_v53 = vor.u32 %v7269_v26, %v7265_v57  ;;  %v7273_v17 = vshll.u32 %v8291_v20, 16  ;;  %v8297_v40 = vcombine.low %v7218_v31, %v7228_v35 }
 0x2be   : > { %9320 = vmatpush3.bf16.msra.mxu1 %v12570_v15  ;;  %v7242_v15 = vsel %vm9986_vm2, %v7237_v47, %v7241_v54  ;;  %v7252_v23 = vsel %vm9986_vm2, %v7247_v45, %v7251_v2 }
 0x2bf   : > { %v8298_v33 = vcombine.low %v7242_v15, %v7252_v23  ;;  %v7261_v50 = vrot.slane %v7260_v41, 4  ;;  %v7271_v62 = vrot.slane %v7270_v53, 4  ;;  %v7275_v22 = vrot.slane %v7273_v17, 5 }
 0x2c1   : > { %9294 = vmatmul.mubr.bf16.vlgmr.msra.gmra.mxu1 %v8295_v63  ;;  %v9067_v39 = vpop.f32.mrf.mxu0  ;;  %v7266_v12 = vsel %vm9986_vm2, %v7261_v50, %v7265_v57  ;;  %v7276_v51 = vsel %vm9986_vm2, %v7271_v62, %v7275_v22 }
 0x2c2   : > { %9297 = vmatprep.mubr.bf16.mxu1 %v8296_v16  ;;  %v8299_v42 = vcombine.low %v7266_v12, %v7276_v51 }
 0x2c3   : > { %v5002_v56 = vpop.f32.mrf.mxu0 }
 0x2c5   : > { %v9068_v38 = vpop.f32.mrf.mxu0 }
 0x2c7   : > { %v5005_v24 = vpop.f32.mrf.mxu0 }
 0x2c9   : > { %9298 = vmatmul.mubr.bf16.gmra.mxu1 %v8297_v40 }
 0x2ca   : > { %9301 = vmatprep.mubr.bf16.mxu1 %v8298_v33 }
 0x2ce   : > { %v9003_v30 = vpop.f32.mrf.mxu1 }
 0x2cf   : > { %v9071_v8 = vpop.f32.mrf.mxu0 }
 0x2d0   : > { %v4535_v48 = vpop.f32.mrf.mxu1 }
 0x2d1   : > { %9302 = vmatmul.mubr.bf16.gmra.mxu1 %v8299_v42  ;;  %v5018_v34 = vpop.f32.mrf.mxu0 }
 0x2d2   : > { %v9004_v25 = vpop.f32.mrf.mxu1 }
 0x2d3   : > { %v9072_v7 = vpop.f32.mrf.mxu0 }
 0x2d4   : > { %v4538_v61 = vpop.f32.mrf.mxu1 }
 0x2d5   : > { %v5021_v0 = vpop.f32.mrf.mxu0 }
 0x2d9   : > { %v9007_v52 = vpop.f32.mrf.mxu1 }
 0x2da   : > { %v9075_v32 = vpop.f32.mrf.mxu0 }
 0x2db   : > { %v4551_v49 = vpop.f32.mrf.mxu1 }
 0x2dc   : > { %v5034_v6 = vpop.f32.mrf.mxu0 }
 0x2dd   : > { %v9008_v29 = vpop.f32.mrf.mxu1 }
 0x2de   : > { %v9076_v19 = vpop.f32.mrf.mxu0 }
 0x2df   : > { %v4554_v54 = vpop.f32.mrf.mxu1 }
 0x2e0   : > { %v5037_v9 = vpop.f32.mrf.mxu0 }
 0x2e5   : > { %v9011_v1 = vpop.f32.mrf.mxu1  ;;  %v12728_v60 = vpop.f32.mrf.mxu0 }
 0x2e7   : > { %v4567_v13 = vpop.f32.mrf.mxu1  ;;  %v12730_v36 = vpop.f32.mrf.mxu0 }
 0x2e9   : > { %v9012_v55 = vpop.f32.mrf.mxu1  ;;  %v12732_v37 = vpop.f32.mrf.mxu0 }
 0x2eb   : > { %v4570_v58 = vpop.f32.mrf.mxu1  ;;  %v12734_v27 = vpop.f32.mrf.mxu0 }
 0x2f5   : > { %v9015_v10 = vpop.f32.mrf.mxu1 }
 0x2f7   : > { %v4583_v59 = vpop.f32.mrf.mxu1 }
 0x2f9   : > { %v9016_v44 = vpop.f32.mrf.mxu1 }
 0x2fa   : > { %v12736_v4 = vpop.f32.mrf.mxu0 }
 0x2fb   : > { %v4586_v28 = vpop.f32.mrf.mxu1 }
 0x2fc   : > { %v12738_v14 = vpop.f32.mrf.mxu0 }
 0x2fd   : > { %v9035_v46 = vpop.f32.mrf.mxu1 }
 0x2fe   : > { %v4737_v5 = vadd.f32 %v9035_v46, %v9003_v30  ;;  %v12740_v63 = vpop.f32.mrf.mxu0 }
 0x2ff   : > { %v4728_v16 = vpop.f32.mrf.mxu1 }
 0x300   : > { %v4729_v21 = vadd.f32 %v4728_v16, %v4535_v48  ;;  %v5067_v18 = vadd.f32 %v9067_v39, %v4737_v5  ;;  %v12742_v3 = vpop.f32.mrf.mxu0 }
 0x301   : > { %v9036_v43 = vpop.f32.mrf.mxu1 }
 0x302   : > { %v4740_v11 = vadd.f32 %v9036_v43, %v9004_v25  ;;  %v5065_v57 = vadd.f32 %v5002_v56, %v4729_v21 }
 0x303   : > { %v12744_v26 = vpop.f32.mrf.mxu0  ;;  %v4731_v47 = vpop.f32.mrf.mxu1 }
 0x304   : > { %v4732_v45 = vadd.f32 %v4731_v47, %v4538_v61  ;;  %v5068_v2 = vadd.f32 %v9068_v38, %v4740_v11 }
 0x305   : > { %v12746_v20 = vpop.f32.mrf.mxu0  ;;  %v9039_v31 = vpop.f32.mrf.mxu1 }
 0x306   : > { %v4753_v35 = vadd.f32 %v9039_v31, %v9007_v52  ;;  %v5066_v41 = vadd.f32 %v5005_v24, %v4732_v45 }
 0x307   : > { %v12748_v53 = vpop.f32.mrf.mxu0  ;;  %v4744_v17 = vpop.f32.mrf.mxu1 }
 0x308   : > { %v4745_v15 = vadd.f32 %v4744_v17, %v4551_v49  ;;  %v5071_v23 = vadd.f32 %v9071_v8, %v4753_v35 }
 0x309   : > { %v12750_v39 = vpop.f32.mrf.mxu0  ;;  %v9040_v40 = vpop.f32.mrf.mxu1 }
 0x30a   : > { %v4756_v33 = vadd.f32 %v9040_v40, %v9008_v29  ;;  %v5069_v50 = vadd.f32 %v5018_v34, %v4745_v15 }
 0x30b   : > { %v4747_v62 = vpop.f32.mrf.mxu1 }
 0x30c   : > { %v4748_v22 = vadd.f32 %v4747_v62, %v4554_v54  ;;  %v5072_v56 = vadd.f32 %v9072_v7, %v4756_v33 }
 0x30d   : > { %v12752_v12 = vpop.f32.mrf.mxu0  ;;  %v9043_v38 = vpop.f32.mrf.mxu1 }
 0x30e   : > { %v4769_v51 = vadd.f32 %v9043_v38, %v9011_v1  ;;  %v5070_v42 = vadd.f32 %v5021_v0, %v4748_v22 }
 0x30f   : > { %v12754_v30 = vpop.f32.mrf.mxu0  ;;  %v4760_v24 = vpop.f32.mrf.mxu1 }
 0x310   : > { %v4761_v48 = vadd.f32 %v4760_v24, %v4567_v13  ;;  %v5075_v25 = vadd.f32 %v9075_v32, %v4769_v51 }
 0x311   : > { %v12756_v61 = vpop.f32.mrf.mxu0  ;;  %v9044_v8 = vpop.f32.mrf.mxu1 }
 0x312   : > { %v4772_v52 = vadd.f32 %v9044_v8, %v9012_v55  ;;  %v5073_v49 = vadd.f32 %v5034_v6, %v4761_v48 }
 0x313   : > { %v12758_v29 = vpop.f32.mrf.mxu0  ;;  %v4763_v34 = vpop.f32.mrf.mxu1 }
 0x314   : > { %v4764_v54 = vadd.f32 %v4763_v34, %v4570_v58  ;;  %v5076_v7 = vadd.f32 %v9076_v19, %v4772_v52 }
 0x315   : > { %v12760_v46 = vpop.f32.mrf.mxu0  ;;  %v9047_v5 = vpop.f32.mrf.mxu1 }
 0x316   : > { %v4785_v1 = vadd.f32 %v9047_v5, %v9015_v10  ;;  %v5074_v0 = vadd.f32 %v5037_v9, %v4764_v54 }
 0x317   : > { %v12762_v16 = vpop.f32.mrf.mxu0  ;;  %v4776_v21 = vpop.f32.mrf.mxu1 }
 0x318   : > { %v4777_v13 = vadd.f32 %v4776_v21, %v4583_v59  ;;  %v5079_v32 = vadd.f32 %v12728_v60, %v4785_v1 }
 0x319   : > { %v12765_v43 = vpop.f32.mrf.mxu0  ;;  %v9048_v55 = vpop.f32.mrf.mxu1 }
 0x31a   : > { %v4788_v6 = vadd.f32 %v9048_v55, %v9016_v44  ;;  %v5077_v11 = vadd.f32 %v12730_v36, %v4777_v13 }
 0x31b   : > { %v12768_v47 = vpop.f32.mrf.mxu0  ;;  %v4779_v19 = vpop.f32.mrf.mxu1 }
 0x31c   : > { %v4780_v58 = vadd.f32 %v4779_v19, %v4586_v28  ;;  %v5080_v45 = vadd.f32 %v12732_v37, %v4788_v6 }
 0x31d   : > { %v12771_v10 = vpop.f32.mrf.mxu0 }
 0x31e   : > { %v5078_v9 = vadd.f32 %v12734_v27, %v4780_v58 }
 0x31f   : > { %v12774_v31 = vpop.f32.mrf.mxu0  ;;  %v9099_v59 = vpop.f32.mrf.mxu1 }
 0x320   : > { %v5310_v60 = vadd.f32 %v9099_v59, %v5067_v18 }
 0x321   : > { %v12776_v35 = vpop.f32.mrf.mxu0  ;;  %v5245_v17 = vpop.f32.mrf.mxu1 }
 0x322   : > { %v5308_v44 = vadd.f32 %v5245_v17, %v5065_v57  ;;  %v12779_v36 = vadd.f32 %v12736_v4, %v5310_v60 }
 0x323   : > { %v12781_v15 = vpop.f32.mrf.mxu0  ;;  %v9100_v28 = vpop.f32.mrf.mxu1 }
 0x324   : > { %v5311_v40 = vadd.f32 %v9100_v28, %v5068_v2  ;;  %v12784_v37 = vadd.f32 %v12738_v14, %v5308_v44 }
 0x325   : > { %v12786_v33 = vpop.f32.mrf.mxu0  ;;  %v5248_v27 = vpop.f32.mrf.mxu1 }
 0x326   : > { %v5309_v62 = vadd.f32 %v5248_v27, %v5066_v41  ;;  %v12789_v18 = vadd.f32 %v12740_v63, %v5311_v40 }
 0x327   : > { %v12791_v22 = vpop.f32.mrf.mxu0  ;;  %v9103_v57 = vpop.f32.mrf.mxu1 }
 0x328   : > { %v5314_v38 = vadd.f32 %v9103_v57, %v5071_v23  ;;  %v12794_v4 = vadd.f32 %v12742_v3, %v5309_v62 }
 0x329   : > { %v12796_v51 = vpop.f32.mrf.mxu0  ;;  %v5261_v2 = vpop.f32.mrf.mxu1 }
 0x32a   : > { %v5312_v24 = vadd.f32 %v5261_v2, %v5069_v50  ;;  %v5740_v14 = vadd.f32 %v12744_v26, %v5314_v38 }
 0x32b   : > { %v12799_v48 = vpop.f32.mrf.mxu0  ;;  %v9104_v8 = vpop.f32.mrf.mxu1 }
 0x32c   : > { %v5315_v41 = vadd.f32 %v9104_v8, %v5072_v56  ;;  %v5738_v63 = vadd.f32 %v12746_v20, %v5312_v24 }
 0x32d   : > { %v12802_v52 = vpop.f32.mrf.mxu0  ;;  %v5264_v34 = vpop.f32.mrf.mxu1 }
 0x32e   : > { %v5313_v54 = vadd.f32 %v5264_v34, %v5070_v42  ;;  %v5741_v23 = vadd.f32 %v12748_v53, %v5315_v41 }
 0x32f   : > { %v12805_v3 = vpop.f32.mrf.mxu0  ;;  %v9107_v5 = vpop.f32.mrf.mxu1 }
 0x330   : > { %v5318_v1 = vadd.f32 %v9107_v5, %v5075_v25  ;;  %v5739_v50 = vadd.f32 %v12750_v39, %v5313_v54 }
 0x331   : > { %v12808_v21 = vpop.f32.mrf.mxu0  ;;  %v5277_v26 = vpop.f32.mrf.mxu1 }
 0x332   : > { %v5316_v13 = vadd.f32 %v5277_v26, %v5073_v49  ;;  %v5744_v56 = vadd.f32 %v12752_v12, %v5318_v1 }
 0x333   : > { %v12811_v55 = vpop.f32.mrf.mxu0  ;;  %v9108_v20 = vpop.f32.mrf.mxu1 }
 0x334   : > { %v5319_v6 = vadd.f32 %v9108_v20, %v5076_v7  ;;  %v5742_v42 = vadd.f32 %v12754_v30, %v5316_v13 }
 0x335   : > { %v12814_v19 = vpop.f32.mrf.mxu0  ;;  %v5280_v53 = vpop.f32.mrf.mxu1 }
 0x336   : > { %v5317_v58 = vadd.f32 %v5280_v53, %v5074_v0  ;;  %v5745_v25 = vadd.f32 %v12756_v61, %v5319_v6 }
 0x337   : > { %v12817_v59 = vpop.f32.mrf.mxu0  ;;  %v9111_v39 = vpop.f32.mrf.mxu1 }
 0x338   : > { %v5322_v60 = vadd.f32 %v9111_v39, %v5079_v32  ;;  %v5743_v49 = vadd.f32 %v12758_v29, %v5317_v58 }
 0x339   : > { %v12820_v17 = vpop.f32.mrf.mxu0  ;;  %v5293_v12 = vpop.f32.mrf.mxu1 }
 0x33a   : > { %v5320_v44 = vadd.f32 %v5293_v12, %v5077_v11  ;;  %v5748_v7 = vadd.f32 %v12760_v46, %v5322_v60 }
 0x33b   : > { %v12823_v28 = vpop.f32.mrf.mxu0  ;;  %v9112_v30 = vpop.f32.mrf.mxu1 }
 0x33c   : > { %v5323_v40 = vadd.f32 %v9112_v30, %v5080_v45  ;;  %v5746_v0 = vadd.f32 %v12762_v16, %v5320_v44 }
 0x33d   : > { %v12826_v27 = vpop.f32.mrf.mxu0  ;;  %v5296_v61 = vpop.f32.mrf.mxu1 }
 0x33e   : > { %v5321_v62 = vadd.f32 %v5296_v61, %v5078_v9  ;;  %v5749_v32 = vadd.f32 %v12765_v43, %v5323_v40 }
 0x33f   : > { %v12829_v57 = vpop.f32.mrf.mxu0  ;;  %v9163_v29 = vpop.f32.mrf.mxu1 }
 0x340   : > { %v5747_v38 = vadd.f32 %v12768_v47, %v5321_v62 }
 0x341   : > { %v12832_v11 = vpop.f32.mrf.mxu0  ;;  %v5969_v46 = vpop.f32.mrf.mxu1 }
 0x343   : > { %v12834_v2 = vpop.f32.mrf.mxu0  ;;  %v9164_v24 = vpop.f32.mrf.mxu1 }
 0x345   : > { %v12836_v45 = vpop.f32.mrf.mxu0  ;;  %v5972_v16 = vpop.f32.mrf.mxu1 }
 0x347   : > { %v12838_v8 = vpop.f32.mrf.mxu0  ;;  %v9167_v41 = vpop.f32.mrf.mxu1 }
 0x348   : > { %v6038_v9 = vadd.f32 %v9167_v41, %v5740_v14 }
 0x349   : > { %v12840_v34 = vpop.f32.mrf.mxu0  ;;  %v5985_v43 = vpop.f32.mrf.mxu1 }
 0x34a   : > { %v6036_v54 = vadd.f32 %v5985_v43, %v5738_v63  ;;  %v12843_v5 = vadd.f32 %v12786_v33, %v6038_v9 }
 0x34b   : > { %v12845_v47 = vpop.f32.mrf.mxu0  ;;  %v9168_v1 = vpop.f32.mrf.mxu1 }
 0x34c   : > { %v6039_v26 = vadd.f32 %v9168_v1, %v5741_v23  ;;  %v12848_v13 = vadd.f32 %v12791_v22, %v6036_v54  ;;  %v6032_v1 = vadd.f32 %v5969_v46, %v12784_v37  ;;  %v6033_v37 = vadd.f32 %v5972_v16, %v12794_v4  ;;  %v12916_v4 = vld [vmem:[%s13109_s9] ss:$0 sm:$0xff] }
 0x34d   : > { %v5988_v6 = vpop.f32.mrf.mxu1 }
 0x34e   : > { %v12850_v20 = vpop.f32.mrf.mxu0  ;;  %v6037_v53 = vadd.f32 %v5988_v6, %v5739_v50  ;;  %v12853_v14 = vadd.f32 %v12796_v51, %v6039_v26 }
 0x350   : > { %v12855_v58 = vpop.f32.mrf.mxu0  ;;  %v9171_v63 = vpop.f32.mrf.mxu1  ;;  %v12858_v33 = vadd.f32 %v12799_v48, %v6037_v53  ;;  %v12895_v53 = vld [vmem:[%s13108_s8] ss:$0 sm:$0xff] }
 0x351   : > { %v6042_v39 = vadd.f32 %v9171_v63, %v5744_v56  ;;  %v6275_v63 = vadd.f32 %v12774_v31, %v6032_v1 }
 0x352   : > { %v12860_v60 = vpop.f32.mrf.mxu0  ;;  %v6001_v23 = vpop.f32.mrf.mxu1 }
 0x353   : > { %v6040_v12 = vadd.f32 %v6001_v23, %v5742_v42  ;;  %v12863_v22 = vadd.f32 %v12802_v52, %v6042_v39 }
 0x354   : > { %v12865_v44 = vpop.f32.mrf.mxu0  ;;  %v9172_v50 = vpop.f32.mrf.mxu1 }
 0x355   : > { %v6043_v30 = vadd.f32 %v9172_v50, %v5745_v25  ;;  %v12868_v51 = vadd.f32 %v12805_v3, %v6040_v12  ;;  %v6034_v3 = vadd.f32 %v9163_v29, %v12779_v36  ;;  %v6035_v36 = vadd.f32 %v9164_v24, %v12789_v18  ;;  %v12925_v12 = vld [vmem:[%s13106_s6] ss:$0 sm:$0xff] }
 0x356   : > { %v6004_v56 = vpop.f32.mrf.mxu1  ;;  %v6276_v50 = vadd.f32 %v12781_v15, %v6033_v37 }
 0x357   : > { %v12870_v40 = vpop.f32.mrf.mxu0  ;;  %v6041_v61 = vadd.f32 %v6004_v56, %v5743_v49  ;;  %v12873_v48 = vadd.f32 %v12808_v21, %v6043_v30 }
 0x359   : > { %v12875_v62 = vpop.f32.mrf.mxu0  ;;  %v9175_v42 = vpop.f32.mrf.mxu1  ;;  %v12878_v52 = vadd.f32 %v12811_v55, %v6041_v61 }
 0x35a   : > { %v6046_v41 = vadd.f32 %v9175_v42, %v5748_v7 }
 0x35b   : > { %v12880_v9 = vpop.f32.mrf.mxu0  ;;  %v6017_v25 = vpop.f32.mrf.mxu1 }
 0x35c   : > { %v6044_v43 = vadd.f32 %v6017_v25, %v5746_v0  ;;  %v12884_v54 = vadd.f32 %v12814_v19, %v6046_v41  ;;  %v6277_v0 = vadd.f32 %v12771_v10, %v6034_v3  ;;  %v12911_v10 = vld [vmem:[%s13105_s5] ss:$0 sm:$0xff] }
 0x35d   : > { %v12886_v49 = vpop.f32.mrf.mxu0  ;;  %v9176_v21 = vpop.f32.mrf.mxu1 }
 0x35e   : > { %v6047_v26 = vadd.f32 %v9176_v21, %v5749_v32  ;;  %v12890_v7 = vadd.f32 %v12817_v59, %v6044_v43 }
 0x35f   : > { %v6020_v55 = vpop.f32.mrf.mxu1  ;;  %v9291_v6 = vpop.f32.mrf.mxu0 }
 0x360   : > { %v6045_v19 = vadd.f32 %v6020_v55, %v5747_v38  ;;  %v12900_v29 = vadd.f32 %v12820_v17, %v6047_v26  ;;  %v7479_v39 = vmul.f32 %v9291_v6, %v12895_v53 }
 0x361   : > { %v9227_v59 = vpop.f32.mrf.mxu1  ;;  %v7407_v32 = vpop.f32.mrf.mxu0 }
 0x362   : > { %v6703_v46 = vadd.f32 %v9227_v59, %v6277_v0  ;;  %v12906_v23 = vadd.f32 %v12823_v28, %v6045_v19  ;;  %v7477_v17 = vmul.f32 %v12895_v53, %v7407_v32  ;;  %v6278_v28 = vadd.f32 %v12776_v35, %v6035_v36 }
 0x363   : > { %v6638_v18 = vpop.f32.mrf.mxu1  ;;  %v9292_v38 = vpop.f32.mrf.mxu0  ;;  %v7502_v35 = vadd.f32 %v12916_v4, %v7479_v39 }
 0x364   : > { %v7001_v31 = vadd.f32 %v12826_v27, %v6703_v46  ;;  %v6701_v24 = vadd.f32 %v6638_v18, %v6275_v63  ;;  %v7480_v30 = vmul.f32 %v9292_v38, %v12895_v53  ;;  %v7500_v25 = vadd.f32 %v12916_v4, %v7477_v17 }
 0x365   : > { %v9228_v16 = vpop.f32.mrf.mxu1  ;;  %v7410_v56 = vpop.f32.mrf.mxu0 }
 0x366   : > { %v7024_v61 = vmul.f32 %v12911_v10, %v7001_v31  ;;  %v6999_v27 = vadd.f32 %v12829_v57, %v6701_v24  ;;  %v6704_v42 = vadd.f32 %v9228_v16, %v6278_v28  ;;  %v7478_v3 = vmul.f32 %v12895_v53, %v7410_v56 }
 0x367   : > { %v6641_v41 = vpop.f32.mrf.mxu1  ;;  %v7503_v57 = vadd.f32 %v12916_v4, %v7480_v30 }
 0x368   : > { %v7022_v43 = vmul.f32 %v12911_v10, %v6999_v27  ;;  %v7002_v21 = vadd.f32 %v12832_v11, %v6704_v42  ;;  %v7047_v15 = vadd.f32 %v12925_v12, %v7024_v61  ;;  %v6702_v1 = vadd.f32 %v6641_v41, %v6276_v50 }
 0x369   : > { %v9231_v26 = vpop.f32.mrf.mxu1  ;;  %v7501_v37 = vadd.f32 %v12916_v4, %v7478_v3 }
 0x36a   : > { %v7025_v55 = vmul.f32 %v12911_v10, %v7002_v21  ;;  %v7518_v6 = vadd.f32 %v7502_v35, %v7047_v15  ;;  %v7000_v36 = vadd.f32 %v12834_v2, %v6702_v1  ;;  %v7045_v19 = vadd.f32 %v12925_v12, %v7022_v43 }
 0x36b   : > { %v6654_v0 = vpop.f32.mrf.mxu1  ;;  %v6707_v56 = vadd.f32 %v9231_v26, %v12843_v5 }
 0x36c   : > { %v7534_v59 = vmax.f32 %v7518_v6, 0.0  ;;  %v7023_v11 = vmul.f32 %v12911_v10, %v7000_v36  ;;  %v7516_v32 = vadd.f32 %v7500_v25, %v7045_v19  ;;  %v7048_v46 = vadd.f32 %v12925_v12, %v7025_v55 }
 0x36d   : > { %v9232_v63 = vpop.f32.mrf.mxu1  ;;  %v6705_v27 = vadd.f32 %v6654_v0, %v12848_v13  ;;  %v7005_v41 = vadd.f32 %v12836_v45, %v6707_v56 }
 0x36e   : > { %7550 = vst [vmem:[%s12946_s12 + $0x10] sm:$0xff] %v7534_v59  ;;  %v7532_v2 = vmax.f32 %v7516_v32, 0.0  ;;  %v7519_v39 = vadd.f32 %v7503_v57, %v7048_v46  ;;  %v7046_v18 = vadd.f32 %v12925_v12, %v7023_v11  ;;  %v6708_v42 = vadd.f32 %v9232_v63, %v12853_v14 }
 0x36f   : > { %v6657_v17 = vpop.f32.mrf.mxu1  ;;  %v7003_v43 = vadd.f32 %v12838_v8, %v6705_v27  ;;  %v7028_v5 = vmul.f32 %v12911_v10, %v7005_v41 }
 0x370   : > { %7548 = vst [vmem:[%s12946_s12] sm:$0xff] %v7532_v2  ;;  %v7535_v38 = vmax.f32 %v7519_v39, 0.0  ;;  %v7517_v31 = vadd.f32 %v7501_v37, %v7046_v18  ;;  %v6706_v25 = vadd.f32 %v6657_v17, %v12858_v33  ;;  %v7006_v21 = vadd.f32 %v12840_v34, %v6708_v42 }
 0x371   : > { %v9235_v24 = vpop.f32.mrf.mxu1  ;;  %v7026_v57 = vmul.f32 %v12911_v10, %v7003_v43 }
 0x372   : > { %7551 = vst [vmem:[%s12946_s12 + $0x18] sm:$0xff] %v7535_v38  ;;  %v7533_v28 = vmax.f32 %v7517_v31, 0.0  ;;  %v6711_v15 = vadd.f32 %v9235_v24, %v12863_v22  ;;  %v7004_v26 = vadd.f32 %v12845_v47, %v6706_v25  ;;  %v7029_v33 = vmul.f32 %v12911_v10, %v7006_v21 }
 0x373   : > { %v6670_v16 = vpop.f32.mrf.mxu1  ;;  %v7051_v22 = vadd.f32 %v12925_v12, %v7028_v5  ;;  %v7049_v59 = vadd.f32 %v12925_v12, %v7026_v57 }
 0x374   : > { %7549 = vst [vmem:[%s12946_s12 + $0x8] sm:$0xff] %v7533_v28  ;;  %v6709_v13 = vadd.f32 %v6670_v16, %v12868_v51  ;;  %v7009_v8 = vadd.f32 %v12850_v20, %v6711_v15  ;;  %v7027_v51 = vmul.f32 %v12911_v10, %v7004_v26  ;;  %v7052_v63 = vadd.f32 %v12925_v12, %v7029_v33 }
 0x375   : > { %v9236_v50 = vpop.f32.mrf.mxu1 }
 0x376   : > { %v6712_v34 = vadd.f32 %v9236_v50, %v12873_v48  ;;  %v7007_v36 = vadd.f32 %v12855_v58, %v6709_v13  ;;  %v7032_v11 = vmul.f32 %v12911_v10, %v7009_v8 }
 0x377   : > { %v6673_v30 = vpop.f32.mrf.mxu1 }
 0x378   : > { %v6710_v19 = vadd.f32 %v6673_v30, %v12878_v52  ;;  %v7010_v32 = vadd.f32 %v12860_v60, %v6712_v34  ;;  %v7030_v17 = vmul.f32 %v12911_v10, %v7007_v36  ;;  %v7050_v60 = vadd.f32 %v12925_v12, %v7027_v51 }
 0x379   : > { %v9239_v61 = vpop.f32.mrf.mxu1 }
 0x37a   : > { %v6715_v46 = vadd.f32 %v9239_v61, %v12884_v54  ;;  %v7008_v38 = vadd.f32 %v12865_v44, %v6710_v19  ;;  %v7033_v30 = vmul.f32 %v12911_v10, %v7010_v32  ;;  %v7055_v44 = vadd.f32 %v12925_v12, %v7032_v11 }
 0x37b   : > { %v6686_v35 = vpop.f32.mrf.mxu1 }
 0x37c   : > { %v6713_v31 = vadd.f32 %v6686_v35, %v12890_v7  ;;  %v7013_v56 = vadd.f32 %v12870_v40, %v6715_v46  ;;  %v7031_v25 = vmul.f32 %v12911_v10, %v7008_v38  ;;  %v7053_v40 = vadd.f32 %v12925_v12, %v7030_v17 }
 0x37d   : > { %v9240_v3 = vpop.f32.mrf.mxu1  ;;  %v7056_v57 = vadd.f32 %v12925_v12, %v7033_v30 }
 0x37e   : > { %v6716_v61 = vadd.f32 %v9240_v3, %v12900_v29  ;;  %v7011_v43 = vadd.f32 %v12875_v62, %v6713_v31  ;;  %v7036_v13 = vmul.f32 %v12911_v10, %v7013_v56 }
 0x37f   : > { %v6689_v1 = vpop.f32.mrf.mxu1 }
 0x380   : > { %v6714_v21 = vadd.f32 %v6689_v1, %v12906_v23  ;;  %v7034_v8 = vmul.f32 %v12911_v10, %v7011_v43  ;;  %v7059_v19 = vadd.f32 %v12925_v12, %v7036_v13 }
 0x381   : > { %v9295_v14 = vpop.f32.mrf.mxu1 }
 0x382   : > { %v7483_v45 = vmul.f32 %v9295_v14, %v12895_v53  ;;  %v7014_v14 = vadd.f32 %v12880_v9, %v6716_v61  ;;  %v7012_v34 = vadd.f32 %v12886_v49, %v6714_v21  ;;  %v7057_v11 = vadd.f32 %v12925_v12, %v7034_v8 }
 0x383   : > { %v7423_v55 = vpop.f32.mrf.mxu1 }
 0x384   : > { %v7506_v6 = vadd.f32 %v12916_v4, %v7483_v45  ;;  %v7481_v47 = vmul.f32 %v12895_v53, %v7423_v55  ;;  %v7054_v55 = vadd.f32 %v12925_v12, %v7031_v25  ;;  %v7037_v36 = vmul.f32 %v12911_v10, %v7014_v14 }
 0x385   : > { %v9296_v0 = vpop.f32.mrf.mxu1 }
 0x386   : > { %v7522_v37 = vadd.f32 %v7506_v6, %v7051_v22  ;;  %v7504_v20 = vadd.f32 %v12916_v4, %v7481_v47  ;;  %v7484_v48 = vmul.f32 %v9296_v0, %v12895_v53 }
 0x387   : > { %v7426_v58 = vpop.f32.mrf.mxu1 }
 0x388   : > { %v7538_v2 = vmax.f32 %v7522_v37, 0.0  ;;  %v7520_v52 = vadd.f32 %v7504_v20, %v7049_v59  ;;  %v7507_v39 = vadd.f32 %v12916_v4, %v7484_v48  ;;  %v7482_v18 = vmul.f32 %v12895_v53, %v7426_v58 }
 0x389   : > { %v9299_v24 = vpop.f32.mrf.mxu1  ;;  %v7035_v48 = vmul.f32 %v12911_v10, %v7012_v34 }
 0x38a   : > { %7554 = vst [vmem:[%s12946_s12 + $0x30] sm:$0xff] %v7538_v2  ;;  %v7536_v54 = vmax.f32 %v7520_v52, 0.0  ;;  %v7523_v28 = vadd.f32 %v7507_v39, %v7052_v63  ;;  %v7505_v16 = vadd.f32 %v12916_v4, %v7482_v18  ;;  %v7487_v50 = vmul.f32 %v9299_v24, %v12895_v53 }
 0x38b   : > { %v7439_v7 = vpop.f32.mrf.mxu1  ;;  %v7060_v52 = vadd.f32 %v12925_v12, %v7037_v36  ;;  %v7058_v24 = vadd.f32 %v12925_v12, %v7035_v48 }
 0x38c   : > { %7552 = vst [vmem:[%s12946_s12 + $0x20] sm:$0xff] %v7536_v54  ;;  %v7539_v27 = vmax.f32 %v7523_v28, 0.0  ;;  %v7521_v42 = vadd.f32 %v7505_v16, %v7050_v60  ;;  %v7510_v35 = vadd.f32 %v12916_v4, %v7487_v50  ;;  %v7485_v41 = vmul.f32 %v12895_v53, %v7439_v7 }
 0x38d   : > { %v9300_v29 = vpop.f32.mrf.mxu1 }
 0x38e   : > { %7555 = vst [vmem:[%s12946_s12 + $0x38] sm:$0xff] %v7539_v27  ;;  %v7537_v3 = vmax.f32 %v7521_v42, 0.0  ;;  %v7526_v15 = vadd.f32 %v7510_v35, %v7055_v44  ;;  %v7508_v5 = vadd.f32 %v12916_v4, %v7485_v41  ;;  %v7488_v26 = vmul.f32 %v9300_v29, %v12895_v53 }
 0x38f   : > { %v7442_v62 = vpop.f32.mrf.mxu1 }
 0x390   : > { %7553 = vst [vmem:[%s12946_s12 + $0x28] sm:$0xff] %v7537_v3  ;;  %v7542_v23 = vmax.f32 %v7526_v15, 0.0  ;;  %v7524_v1 = vadd.f32 %v7508_v5, %v7053_v40  ;;  %v7511_v45 = vadd.f32 %v12916_v4, %v7488_v26  ;;  %v7486_v33 = vmul.f32 %v12895_v53, %v7442_v62 }
 0x391   : > { %v9303_v9 = vpop.f32.mrf.mxu1 }
 0x392   : > { %7558 = vst [vmem:[%s12946_s12 + $0x50] sm:$0xff] %v7542_v23  ;;  %v7540_v22 = vmax.f32 %v7524_v1, 0.0  ;;  %v7527_v6 = vadd.f32 %v7511_v45, %v7056_v57  ;;  %v7509_v47 = vadd.f32 %v12916_v4, %v7486_v33  ;;  %v7491_v51 = vmul.f32 %v9303_v9, %v12895_v53 }
 0x393   : > { %v7455_v0 = vpop.f32.mrf.mxu1 }
 0x394   : > { %7556 = vst [vmem:[%s12946_s12 + $0x40] sm:$0xff] %v7540_v22  ;;  %v7543_v49 = vmax.f32 %v7527_v6, 0.0  ;;  %v7525_v37 = vadd.f32 %v7509_v47, %v7054_v55  ;;  %v7514_v59 = vadd.f32 %v12916_v4, %v7491_v51  ;;  %v7489_v20 = vmul.f32 %v12895_v53, %v7455_v0 }
 0x395   : > { %v9304_v32 = vpop.f32.mrf.mxu1 }
 0x396   : > { %7559 = vst [vmem:[%s12946_s12 + $0x58] sm:$0xff] %v7543_v49  ;;  %v7541_v46 = vmax.f32 %v7525_v37, 0.0  ;;  %v7530_v63 = vadd.f32 %v7514_v59, %v7059_v19  ;;  %v7512_v58 = vadd.f32 %v12916_v4, %v7489_v20  ;;  %v7492_v2 = vmul.f32 %v9304_v32, %v12895_v53 }
 0x397   : > { %v7458_v39 = vpop.f32.mrf.mxu1 }
 0x398   : > { %7557 = vst [vmem:[%s12946_s12 + $0x48] sm:$0xff] %v7541_v46  ;;  %v7546_v18 = vmax.f32 %v7530_v63, 0.0  ;;  %v7528_v10 = vadd.f32 %v7512_v58, %v7057_v11  ;;  %v7515_v17 = vadd.f32 %v12916_v4, %v7492_v2  ;;  %v7490_v38 = vmul.f32 %v12895_v53, %v7458_v39 }
 0x39a   : > { %7562 = vst [vmem:[%s12946_s12 + $0x70] sm:$0xff] %v7546_v18  ;;  %v7544_v31 = vmax.f32 %v7528_v10, 0.0  ;;  %v7531_v60 = vadd.f32 %v7515_v17, %v7060_v52  ;;  %v7513_v54 = vadd.f32 %v12916_v4, %v7490_v38 }
 0x39c   : > { %7560 = vst [vmem:[%s12946_s12 + $0x60] sm:$0xff] %v7544_v31  ;;  %v7547_v28 = vmax.f32 %v7531_v60, 0.0  ;;  %v7529_v16 = vadd.f32 %v7513_v54, %v7058_v24 }
 0x39e   : > { %7563 = vst [vmem:[%s12946_s12 + $0x78] sm:$0xff] %v7547_v28  ;;  %v7545_v53 = vmax.f32 %v7529_v16, 0.0 }
 0x3a0   : > { %7561 = vst [vmem:[%s12946_s12 + $0x68] sm:$0xff] %v7545_v53 }
 0x3a1   : > { %9655 = shalt.err (!%p9652_p5)
}
 0x3a2   : > { %s9656_s19 = scalar_lea.hbm %s13041_s29, 2048  ;;  %s9660_s16 = scalar_lea.hbm %s13110_s10, 8192 }
 0x3a3   : > { %p9657_p6 = scmp.ne.s32.totalorder %s13041_s29, %s9656_s19  ;;  %p9661_p11 = scmp.lt.s32.totalorder %s13041_s29, %s13110_s10 }
 0x3a4   : > { %p9662_p13 = scmp.lt.s32.totalorder %s9660_s16, %s9656_s19 }
 0x3a5   : > { %p9658_p7 = pnand %p9657_p6, %p9853_p3 }
 0x3a6   : > { %p9663_p10 = por %p9662_p13, %p9661_p11 }
 0x3a7   : > { %p9659_p9 = pneg %p9658_p7 }
 0x3a9   : > { %p9664_p12 = pnand %p9663_p10, %p9659_p9 }
 0x3ab   : > { %9667 = shalt.err (!%p9664_p12)
}
 0x3ac   : > { %s9744_s23 = smov 128   ;;  %s9745_s30 = smov 8  }
 0x3ad   : > { %9326 = dma.vmem_to_hbm [thread:$0]  (%p9853_p3), %s13043_s24, 2048, %s13041_s29, %s13049_s25, %s9744_s23, %s9744_s23, %s9745_s30  }
 0x3ae PF: > { %p9338_p0 = scmp.ge.s32.totalorder %s9738_s20, 2  ;;  %s7596_s26 = sand.u32 1, %s9710_s13  }
 0x3af   : > { %s7597_s11 = scalar_lea.sflag [#allocation5], %s7596_s26 }
 0x3b0   : > { %p9333_p1 = pnand %p9338_p0, %p9862_p8 }
 0x3b2   : > { %p9334_p2 = pneg %p9333_p1 }
 0x3b4   : > { %9705 = dma.done.wait (%p9334_p2), %s7597_s11, 2048  }
 0x3b5   : > { %9707 = vsyncadd (%p9334_p2), %s7597_s11, 4294965248  ;;  %s24_s20 = sadd.s32 1, %s9738_s20   ;;  %s13292_s16 = sld [smem:[#allocation9_spill]] }
 0x3b6   : > { %p21_p4 = scmp.ge.s32.totalorder %s24_s20, 6   ;;  %s13293_s17 = sld [smem:[#allocation10_spill]] }
 0x3b7   : > { %s13294_s18 = sld [smem:[#allocation11_spill]]  ;;  %s13296_s13 = smov %s9714_s14 }
 0x3b8   : > { %s13295_s19 = sld [smem:[#allocation12_spill]]  ;;  %s13297_s14 = smov %s9718_s15 }
 0x3b9   : > { %s13298_s15 = smov %s9880_s22  ;;  %23 = sbr.rel (!%p21_p4) target bundleno = 8 (0x8), region = 121 }
 0x3be   :  { %7602 = vsyncpa [#allocation4], 1 }
 0x3bf   :  { %7604 = vsyncpa [#allocation4 + $0x1], 1 }
 0x3c0   :  { %7605 = vsyncpa [#allocation5], 1 }
 0x3c1   :  { %7607 = vsyncpa [#allocation5 + $0x1], 1 }

</bundles_post_ra>
